<compile_context>
chip_gen: v7x
topology: tpu7x:2x2x1
jax: 0.10.0
libtpu: 0.0.40
codegen_flags: <defaults>
</compile_context>

<pallas_src>
import functools

import jax
import jax.numpy as jnp
from jax.experimental import pallas as pl
from jax.experimental.pallas import tpu as pltpu


_VMEM_LIMIT = 32 * 1024 * 1024  # explicit scoped-VMEM limit (fits every gen)


# ----------------------------- Pallas kernels ------------------------------

def _matmul_bias_act_kernel(x_ref, w_ref, b_ref, o_ref, *, relu):
    """o = relu?(x @ w + b); bf16 operands, f32 accumulation on the MXU."""
    acc = jnp.dot(x_ref[...], w_ref[...], preferred_element_type=jnp.float32)
    acc = acc + b_ref[...]
    if relu:
        acc = jnp.maximum(acc, 0.0)
    o_ref[...] = acc.astype(o_ref.dtype)


def matmul_bias_act(x, w, b, *, relu, out_dtype=jnp.bfloat16):
    """x:(M,K) bf16, w:(K,N) bf16, b:(1,N) f32 -> (M,N) out_dtype.

    No padding copies: ragged K/N use full-extent block dims (exempt from the
    (8,128) rule).  M is split into 2 parallel grid steps when that keeps the
    blocks 8-aligned (keeps both TensorCores busy on v7x)."""
    M, K = x.shape
    _, N = w.shape
    steps = 2 if M % 16 == 0 else 1
    tile_m = M // steps
    return pl.pallas_call(
        functools.partial(_matmul_bias_act_kernel, relu=relu),
        out_shape=jax.ShapeDtypeStruct((M, N), out_dtype),
        grid=(steps,),
        in_specs=[
            pl.BlockSpec((tile_m, K), lambda i: (i, 0)),
            pl.BlockSpec((K, N), lambda i: (0, 0)),
            pl.BlockSpec((1, N), lambda i: (0, 0)),
        ],
        out_specs=pl.BlockSpec((tile_m, N), lambda i: (i, 0)),
        compiler_params=pltpu.CompilerParams(
            dimension_semantics=("parallel",),
            vmem_limit_bytes=_VMEM_LIMIT),
    )(x, w, b)


def _fc_fused_kernel(x_ref, w1_ref, b1_ref, w2_ref, b2_ref, w3_ref, b3_ref,
                     o_ref):
    """Fused fc1+fc2+fc3: all weights resident in VMEM, one launch."""
    h = jnp.dot(x_ref[...], w1_ref[...], preferred_element_type=jnp.float32)
    h = jnp.maximum(h + b1_ref[...], 0.0)
    h = jnp.dot(h.astype(w2_ref.dtype), w2_ref[...],
                preferred_element_type=jnp.float32)
    h = jnp.maximum(h + b2_ref[...], 0.0)
    h = jnp.dot(h.astype(w3_ref.dtype), w3_ref[...],
                preferred_element_type=jnp.float32)
    o_ref[...] = (h + b3_ref[...]).astype(o_ref.dtype)


def fc_fused(h, p):
    B = h.shape[0]
    n_out = p["wf3"].shape[1]
    # Whole-array blocks (default): ~3 MB of bf16 FC weights live in VMEM.
    return pl.pallas_call(
        _fc_fused_kernel,
        out_shape=jax.ShapeDtypeStruct((B, n_out), jnp.float32),
        compiler_params=pltpu.CompilerParams(vmem_limit_bytes=_VMEM_LIMIT),
    )(h, p["wf1"], p["bf1"], p["wf2"], p["bf2"], p["wf3"], p["bf3"])


# --------------------------- XLA-side glue (fused) --------------------------

def im2col_5x5(x_nhwc):
    """'Same' 5x5 patches (pad=2). Rows ordered (b,h,w); K ordered (kh,kw,c).
    Single stack+reshape, no transpose (weights are pre-laid-out to match)."""
    B, H, W, C = x_nhwc.shape
    xp = jnp.pad(x_nhwc, ((0, 0), (2, 2), (2, 2), (0, 0)))
    cols = [xp[:, dy:dy + H, dx:dx + W, :]
            for dy in range(5) for dx in range(5)]
    patches = jnp.stack(cols, axis=3)              # (B, H, W, 25, C)
    return patches.reshape(B * H * W, 25 * C)


def maxpool2x2(x_nhwc):
    """2x2 / stride-2 max pool as 4 strided views + elementwise max.
    Left to XLA (per perf review) so it fuses with the adjacent im2col."""
    return jnp.maximum(
        jnp.maximum(x_nhwc[:, 0::2, 0::2, :], x_nhwc[:, 0::2, 1::2, :]),
        jnp.maximum(x_nhwc[:, 1::2, 0::2, :], x_nhwc[:, 1::2, 1::2, :]))


# ------------------------------- LeNet forward ------------------------------

def lenet_forward(x_nchw, p):
    B, _, H, W = x_nchw.shape
    x = x_nchw.transpose(0, 2, 3, 1).astype(jnp.bfloat16)        # NHWC bf16
    h = matmul_bias_act(im2col_5x5(x), p["w1"], p["b1"], relu=True)
    h = maxpool2x2(h.reshape(B, H, W, -1))                       # (B,14,14,20)
    _, H2, W2, _ = h.shape
    h = matmul_bias_act(im2col_5x5(h), p["w2"], p["b2"], relu=True)
    h = maxpool2x2(h.reshape(B, H2, W2, -1))                     # (B,7,7,50)
    # NHWC flatten; fc1 rows were pre-permuted to match PyTorch's NCHW .view.
    h = h.reshape(B, -1)
    return fc_fused(h, p)                                        # (B,10) f32


# ------------------------- One-time weight preparation -----------------------

def prepare_params(p):
    """Runs once, OUTSIDE the jitted forward: re-layout + bf16 cast so the
    forward pass never pads/reshapes weights at runtime."""
    def conv_w(w_oihw):
        cout = w_oihw.shape[0]
        # OIHW -> (KH, KW, Cin, Cout) -> (KH*KW*Cin, Cout): matches im2col K.
        return (jnp.transpose(w_oihw, (2, 3, 1, 0))
                .reshape(-1, cout).astype(jnp.bfloat16))

    cout2 = p["w2"].shape[0]               # 50
    hid = p["wf1"].shape[1]                # 500
    hw = p["wf1"].shape[0] // cout2        # 49
    side = int(round(hw ** 0.5))           # 7
    # fc1 rows: (c,h,w) NCHW-flatten order -> (h,w,c) NHWC-flatten order.
    wf1 = (p["wf1"].reshape(cout2, side, side, hid)
           .transpose(1, 2, 0, 3).reshape(cout2 * hw, hid))
    return {
        "w1": conv_w(p["w1"]),
        "b1": p["b1"].reshape(1, -1).astype(jnp.float32),
        "w2": conv_w(p["w2"]),
        "b2": p["b2"].reshape(1, -1).astype(jnp.float32),
        "wf1": wf1.astype(jnp.bfloat16),
        "bf1": p["bf1"].reshape(1, -1).astype(jnp.float32),
        "wf2": p["wf2"].astype(jnp.bfloat16),
        "bf2": p["bf2"].reshape(1, -1).astype(jnp.float32),
        "wf3": p["wf3"].astype(jnp.bfloat16),
        "bf3": p["bf3"].reshape(1, -1).astype(jnp.float32),
    }


# --------------------------- Pure-JAX reference -----------------------------

def lenet_reference(x, p):
    def conv(x, w, b):
        y = jax.lax.conv_general_dilated(
            x, w, (1, 1), ((2, 2), (2, 2)),
            dimension_numbers=("NCHW", "OIHW", "NCHW"))
        return jax.nn.relu(y + b[None, :, None, None])

    def pool(x):
        return jax.lax.reduce_window(
            x, -jnp.inf, jax.lax.max, (1, 1, 2, 2), (1, 1, 2, 2), "VALID")

    h = pool(conv(x, p["w1"], p["b1"]))
    h = pool(conv(h, p["w2"], p["b2"]))
    h = h.reshape(x.shape[0], -1)
    h = jax.nn.relu(h @ p["wf1"] + p["bf1"])
    h = jax.nn.relu(h @ p["wf2"] + p["bf2"])
    return h @ p["wf3"] + p["bf3"]


# ----------------------------------- Main -----------------------------------

def init_params(key):
    ks = jax.random.split(key, 10)
    s = 0.05
    return {
        "w1": s * jax.random.normal(ks[0], (20, 1, 5, 5), jnp.float32),
        "b1": s * jax.random.normal(ks[1], (20,), jnp.float32),
        "w2": s * jax.random.normal(ks[2], (50, 20, 5, 5), jnp.float32),
        "b2": s * jax.random.normal(ks[3], (50,), jnp.float32),
        "wf1": s * jax.random.normal(ks[4], (50 * 7 * 7, 500), jnp.float32),
        "bf1": s * jax.random.normal(ks[5], (500,), jnp.float32),
        "wf2": s * jax.random.normal(ks[6], (500, 500), jnp.float32),
        "bf2": s * jax.random.normal(ks[7], (500,), jnp.float32),
        "wf3": s * jax.random.normal(ks[8], (500, 10), jnp.float32),
        "bf3": s * jax.random.normal(ks[9], (10,), jnp.float32),
    }


if __name__ == "__main__":
    key = jax.random.PRNGKey(0)
    kx, kp = jax.random.split(key)
    # LeNet's fc1 (50*7*7) fixes the spatial size to 28x28, 1 input channel.
    x = jax.random.normal(kx, (2, 1, 28, 28), jnp.float32)
    params = init_params(kp)
    pparams = prepare_params(params)   # one-time re-layout + bf16 cast

    out = jax.jit(lenet_forward)(x, pparams)
    out = jax.block_until_ready(out)
    assert out.shape == (2, 10)

    ref = jax.block_until_ready(lenet_reference(x, params))
    assert jnp.allclose(out, ref, rtol=5e-2, atol=5e-2), (
        f"max abs diff {jnp.max(jnp.abs(out - ref))}")

    print("KERNEL_OK")
</pallas_src>

<mosaic_0001>
module attributes {stable_mosaic.version = 11 : i64} {
  func.func @_matmul_bias_act_kernel(%arg0: i32, %arg1: memref<784x25xbf16, #tpu.memory_space<vmem>>, %arg2: memref<25x20xbf16, #tpu.memory_space<vmem>>, %arg3: memref<1x20xf32, #tpu.memory_space<vmem>>, %arg4: memref<784x20xbf16, #tpu.memory_space<vmem>>) attributes {dimension_semantics = [#tpu.dimension_semantics<parallel>], iteration_bounds = array<i64: 2>, scalar_prefetch = 0 : i64, scratch_operands = 0 : i64, tpu.core_type = #tpu.core_type<tc>, window_params = [{transform_indices = @transform_0, window_bounds = array<i64: 784, 25>}, {pipeline_mode = #tpu.pipeline_mode<synchronous>, transform_indices = @transform_1, window_bounds = array<i64: 25, 20>}, {pipeline_mode = #tpu.pipeline_mode<synchronous>, transform_indices = @transform_2, window_bounds = array<i64: 1, 20>}, {transform_indices = @transform_3, window_bounds = array<i64: 784, 20>}]} {
    %c0 = arith.constant 0 : index
    %c0_0 = arith.constant 0 : index
    %0 = vector.load %arg1[%c0, %c0_0] : memref<784x25xbf16, #tpu.memory_space<vmem>>, vector<784x25xbf16>
    %c0_1 = arith.constant 0 : index
    %c0_2 = arith.constant 0 : index
    %1 = vector.load %arg2[%c0_1, %c0_2] : memref<25x20xbf16, #tpu.memory_space<vmem>>, vector<25x20xbf16>
    %cst = arith.constant dense<0.000000e+00> : vector<784x20xf32>
    %2 = tpu.matmul %0, %1, %cst {dimension_numbers = #tpu.dot_dimension_numbers<[1], [0], [0], [1], [0, 0, 1, 1], [], []>} : vector<784x25xbf16>, vector<25x20xbf16>, vector<784x20xf32> -> vector<784x20xf32>
    %c0_3 = arith.constant 0 : index
    %c0_4 = arith.constant 0 : index
    %3 = vector.load %arg3[%c0_3, %c0_4] : memref<1x20xf32, #tpu.memory_space<vmem>>, vector<1x20xf32>
    %4 = vector.broadcast %3 : vector<1x20xf32> to vector<784x20xf32>
    %5 = arith.addf %2, %4 : vector<784x20xf32>
    %cst_5 = arith.constant 0.000000e+00 : f32
    %6 = vector.broadcast %cst_5 : f32 to vector<784x20xf32>
    %7 = arith.maximumf %5, %6 : vector<784x20xf32>
    %8 = arith.truncf %7 : vector<784x20xf32> to vector<784x20xbf16>
    %c0_6 = arith.constant 0 : index
    %c0_7 = arith.constant 0 : index
    %9 = vector.load %arg4[%c0_6, %c0_7] : memref<784x20xbf16, #tpu.memory_space<vmem>>, vector<784x20xbf16>
    tpu.vector_store %arg4[%c0_6, %c0_7], %8 {strides = array<i32>} : memref<784x20xbf16, #tpu.memory_space<vmem>>, vector<784x20xbf16>,
    return
  }
  func.func @transform_0(%arg0: i32) -> (i32, i32) {
    %c0_i32 = arith.constant 0 : i32
    %c0_i32_0 = arith.constant 0 : i32
    return %arg0, %c0_i32 : i32, i32
  }
  func.func @transform_1(%arg0: i32) -> (i32, i32) {
    %c0_i32 = arith.constant 0 : i32
    %c0_i32_0 = arith.constant 0 : i32
    %c0_i32_1 = arith.constant 0 : i32
    return %c0_i32, %c0_i32_0 : i32, i32
  }
  func.func @transform_2(%arg0: i32) -> (i32, i32) {
    %c0_i32 = arith.constant 0 : i32
    %c0_i32_0 = arith.constant 0 : i32
    %c0_i32_1 = arith.constant 0 : i32
    return %c0_i32, %c0_i32_0 : i32, i32
  }
  func.func @transform_3(%arg0: i32) -> (i32, i32) {
    %c0_i32 = arith.constant 0 : i32
    %c0_i32_0 = arith.constant 0 : i32
    return %arg0, %c0_i32 : i32, i32
  }
}

module attributes {stable_mosaic.version = 11 : i64} {
  func.func @_matmul_bias_act_kernel(%arg0: i32, %arg1: memref<392x500xbf16, #tpu.memory_space<vmem>>, %arg2: memref<500x50xbf16, #tpu.memory_space<vmem>>, %arg3: memref<1x50xf32, #tpu.memory_space<vmem>>, %arg4: memref<392x50xbf16, #tpu.memory_space<vmem>>) attributes {dimension_semantics = [#tpu.dimension_semantics<parallel>], iteration_bounds = array<i64: 1>, scalar_prefetch = 0 : i64, scratch_operands = 0 : i64, tpu.core_type = #tpu.core_type<tc>, window_params = [{transform_indices = @transform_0, window_bounds = array<i64: 392, 500>}, {pipeline_mode = #tpu.pipeline_mode<synchronous>, transform_indices = @transform_1, window_bounds = array<i64: 500, 50>}, {pipeline_mode = #tpu.pipeline_mode<synchronous>, transform_indices = @transform_2, window_bounds = array<i64: 1, 50>}, {transform_indices = @transform_3, window_bounds = array<i64: 392, 50>}]} {
    %c0 = arith.constant 0 : index
    %c0_0 = arith.constant 0 : index
    %0 = vector.load %arg1[%c0, %c0_0] : memref<392x500xbf16, #tpu.memory_space<vmem>>, vector<392x500xbf16>
    %c0_1 = arith.constant 0 : index
    %c0_2 = arith.constant 0 : index
    %1 = vector.load %arg2[%c0_1, %c0_2] : memref<500x50xbf16, #tpu.memory_space<vmem>>, vector<500x50xbf16>
    %cst = arith.constant dense<0.000000e+00> : vector<392x50xf32>
    %2 = tpu.matmul %0, %1, %cst {dimension_numbers = #tpu.dot_dimension_numbers<[1], [0], [0], [1], [0, 0, 1, 1], [], []>} : vector<392x500xbf16>, vector<500x50xbf16>, vector<392x50xf32> -> vector<392x50xf32>
    %c0_3 = arith.constant 0 : index
    %c0_4 = arith.constant 0 : index
    %3 = vector.load %arg3[%c0_3, %c0_4] : memref<1x50xf32, #tpu.memory_space<vmem>>, vector<1x50xf32>
    %4 = vector.broadcast %3 : vector<1x50xf32> to vector<392x50xf32>
    %5 = arith.addf %2, %4 : vector<392x50xf32>
    %cst_5 = arith.constant 0.000000e+00 : f32
    %6 = vector.broadcast %cst_5 : f32 to vector<392x50xf32>
    %7 = arith.maximumf %5, %6 : vector<392x50xf32>
    %8 = arith.truncf %7 : vector<392x50xf32> to vector<392x50xbf16>
    %c0_6 = arith.constant 0 : index
    %c0_7 = arith.constant 0 : index
    %9 = vector.load %arg4[%c0_6, %c0_7] : memref<392x50xbf16, #tpu.memory_space<vmem>>, vector<392x50xbf16>
    tpu.vector_store %arg4[%c0_6, %c0_7], %8 {strides = array<i32>} : memref<392x50xbf16, #tpu.memory_space<vmem>>, vector<392x50xbf16>,
    return
  }
  func.func @transform_0(%arg0: i32) -> (i32, i32) {
    %c0_i32 = arith.constant 0 : i32
    %c0_i32_0 = arith.constant 0 : i32
    return %arg0, %c0_i32 : i32, i32
  }
  func.func @transform_1(%arg0: i32) -> (i32, i32) {
    %c0_i32 = arith.constant 0 : i32
    %c0_i32_0 = arith.constant 0 : i32
    %c0_i32_1 = arith.constant 0 : i32
    return %c0_i32, %c0_i32_0 : i32, i32
  }
  func.func @transform_2(%arg0: i32) -> (i32, i32) {
    %c0_i32 = arith.constant 0 : i32
    %c0_i32_0 = arith.constant 0 : i32
    %c0_i32_1 = arith.constant 0 : i32
    return %c0_i32, %c0_i32_0 : i32, i32
  }
  func.func @transform_3(%arg0: i32) -> (i32, i32) {
    %c0_i32 = arith.constant 0 : i32
    %c0_i32_0 = arith.constant 0 : i32
    return %arg0, %c0_i32 : i32, i32
  }
}

module attributes {stable_mosaic.version = 11 : i64} {
  func.func @_fc_fused_kernel(%arg0: memref<2x2450xbf16, #tpu.memory_space<vmem>>, %arg1: memref<2450x500xbf16, #tpu.memory_space<vmem>>, %arg2: memref<1x500xf32, #tpu.memory_space<vmem>>, %arg3: memref<500x500xbf16, #tpu.memory_space<vmem>>, %arg4: memref<1x500xf32, #tpu.memory_space<vmem>>, %arg5: memref<500x10xbf16, #tpu.memory_space<vmem>>, %arg6: memref<1x10xf32, #tpu.memory_space<vmem>>, %arg7: memref<2x10xf32, #tpu.memory_space<vmem>>) attributes {dimension_semantics = [], scalar_prefetch = 0 : i64, scratch_operands = 0 : i64, tpu.core_type = #tpu.core_type<tc>} {
    %c0 = arith.constant 0 : index
    %c0_0 = arith.constant 0 : index
    %0 = vector.load %arg0[%c0, %c0_0] : memref<2x2450xbf16, #tpu.memory_space<vmem>>, vector<2x2450xbf16>
    %c0_1 = arith.constant 0 : index
    %c0_2 = arith.constant 0 : index
    %1 = vector.load %arg1[%c0_1, %c0_2] : memref<2450x500xbf16, #tpu.memory_space<vmem>>, vector<2450x500xbf16>
    %cst = arith.constant dense<0.000000e+00> : vector<2x500xf32>
    %2 = tpu.matmul %0, %1, %cst {dimension_numbers = #tpu.dot_dimension_numbers<[1], [0], [0], [1], [0, 0, 1, 1], [], []>} : vector<2x2450xbf16>, vector<2450x500xbf16>, vector<2x500xf32> -> vector<2x500xf32>
    %c0_3 = arith.constant 0 : index
    %c0_4 = arith.constant 0 : index
    %3 = vector.load %arg2[%c0_3, %c0_4] : memref<1x500xf32, #tpu.memory_space<vmem>>, vector<1x500xf32>
    %4 = vector.broadcast %3 : vector<1x500xf32> to vector<2x500xf32>
    %5 = arith.addf %2, %4 : vector<2x500xf32>
    %cst_5 = arith.constant 0.000000e+00 : f32
    %6 = vector.broadcast %cst_5 : f32 to vector<2x500xf32>
    %7 = arith.maximumf %5, %6 : vector<2x500xf32>
    %8 = arith.truncf %7 : vector<2x500xf32> to vector<2x500xbf16>
    %c0_6 = arith.constant 0 : index
    %c0_7 = arith.constant 0 : index
    %9 = vector.load %arg3[%c0_6, %c0_7] : memref<500x500xbf16, #tpu.memory_space<vmem>>, vector<500x500xbf16>
    %cst_8 = arith.constant dense<0.000000e+00> : vector<2x500xf32>
    %10 = tpu.matmul %8, %9, %cst_8 {dimension_numbers = #tpu.dot_dimension_numbers<[1], [0], [0], [1], [0, 0, 1, 1], [], []>} : vector<2x500xbf16>, vector<500x500xbf16>, vector<2x500xf32> -> vector<2x500xf32>
    %c0_9 = arith.constant 0 : index
    %c0_10 = arith.constant 0 : index
    %11 = vector.load %arg4[%c0_9, %c0_10] : memref<1x500xf32, #tpu.memory_space<vmem>>, vector<1x500xf32>
    %12 = vector.broadcast %11 : vector<1x500xf32> to vector<2x500xf32>
    %13 = arith.addf %10, %12 : vector<2x500xf32>
    %cst_11 = arith.constant 0.000000e+00 : f32
    %14 = vector.broadcast %cst_11 : f32 to vector<2x500xf32>
    %15 = arith.maximumf %13, %14 : vector<2x500xf32>
    %16 = arith.truncf %15 : vector<2x500xf32> to vector<2x500xbf16>
    %c0_12 = arith.constant 0 : index
    %c0_13 = arith.constant 0 : index
    %17 = vector.load %arg5[%c0_12, %c0_13] : memref<500x10xbf16, #tpu.memory_space<vmem>>, vector<500x10xbf16>
    %cst_14 = arith.constant dense<0.000000e+00> : vector<2x10xf32>
    %18 = tpu.matmul %16, %17, %cst_14 {dimension_numbers = #tpu.dot_dimension_numbers<[1], [0], [0], [1], [0, 0, 1, 1], [], []>} : vector<2x500xbf16>, vector<500x10xbf16>, vector<2x10xf32> -> vector<2x10xf32>
    %c0_15 = arith.constant 0 : index
    %c0_16 = arith.constant 0 : index
    %19 = vector.load %arg6[%c0_15, %c0_16] : memref<1x10xf32, #tpu.memory_space<vmem>>, vector<1x10xf32>
    %20 = vector.broadcast %19 : vector<1x10xf32> to vector<2x10xf32>
    %21 = arith.addf %18, %20 : vector<2x10xf32>
    %c0_17 = arith.constant 0 : index
    %c0_18 = arith.constant 0 : index
    %22 = vector.load %arg7[%c0_17, %c0_18] : memref<2x10xf32, #tpu.memory_space<vmem>>, vector<2x10xf32>
    tpu.vector_store %arg7[%c0_17, %c0_18], %21 {strides = array<i32>} : memref<2x10xf32, #tpu.memory_space<vmem>>, vector<2x10xf32>,
    return
  }
}

</mosaic_0001>

<bundles_post_ra>
// kernel: lenet_forward.3
= control target key start
LH: loop header
LB: loop body
LE: loop exit
PB: predicated region body
PF: predicated region fallthrough
CT: control target
= control target key end

     0   :  { %8 = vsyncpa [#allocation3], 0  ;;  %s2491_s12 = smov 0   ;;  %s3065_s0 = inlined_call_operand.vmem [shape: bf16[1568,25], index: 0, kind: input, shape index: {}]   ;;  %s3066_s1 = inlined_call_operand.vmem [shape: bf16[25,20], index: 1, kind: input, shape index: {}]   ;;  %s3067_s2 = inlined_call_operand.hbm [shape: f32[1,20], index: 2, kind: input, shape index: {}]   ;;  %s3068_s3 = inlined_call_operand.vmem [shape: bf16[1568,20], index: 3, kind: output, shape index: {}]  }
   0x1 LB: > { %s1790_s13 = sadd.s32 4294967295, %s2465_s12   ;;  %p1792_p0 = scmp.ge.s32.totalorder %s2465_s12, 1  ;;  %s2465_s12 = sphi %s2491_s12, %s14_s12  }
   0x2   : > { %p113_p1 = scmp.lt.s32.totalorder %s2465_s12, 3  ;;  %p2505_p3 = scmp.eq.s32.totalorder %s1790_s13, 0 }
   0x3   : > { %s2467_s16 = smov [#allocation2]   ;;  %s2427_s21 = scalar_lea.hbm %s3067_s2, 16 }
   0x4   : > { %p2499_p2 = pnand %p1792_p0, %p113_p1  ;;  %s129_s17 = sshll.u32 %s2467_s16, 4  ;;  %s130_s17 = int_to_ptr.vmem [resolvable:$true] %s129_s17 }
   0x5   : > { %s3073_s15 = scalar_select %p2505_p3, 1, 0 }
   0x6   : > { %s3072_s14 = scalar_select %p2499_p2, 1, 0 }
   0x7   : > { %p2357_p4 = pneg %p2499_p2  ;;  %p2428_p6 = scmp.ne.s32.totalorder %s3067_s2, %s2427_s21 }
   0x8   : > { %p2434_p10 = scmp.lt.u32.totalorder %s2427_s21, %s3067_s2 }
   0x9   : > { %p2513_p5 = pnand %p2505_p3, %p2357_p4 }
   0xb   : > { %p2429_p7 = pneg %p2513_p5 }
   0xd   : > { %p2430_p8 = pnand %p2429_p7, %p2428_p6 }
   0xf   : > { %p2431_p9 = pneg %p2430_p8 }
  0x11   : > { %p2436_p11 = pnand %p2434_p10, %p2431_p9 }
  0x13   : > { %2439 = shalt.err (!%p2436_p11)
}
  0x14   : > { %s2440_s26 = scalar_lea.vmem %s130_s17, 16  ;;  %s2447_s27 = scalar_lea.vmem %s130_s17, 32 }
  0x15   : > { %p2441_p12 = scmp.ne.s32.totalorder %s130_s17, %s2440_s26  ;;  %p2448_p1 = scmp.lt.s32.totalorder %s130_s17, %s130_s17 }
  0x16   : > { %p2449_p4 = scmp.lt.s32.totalorder %s2447_s27, %s2440_s26 }
  0x17   : > { %p2443_p13 = pnand %p2441_p12, %p2429_p7 }
  0x18   : > { %p2450_p3 = por %p2449_p4, %p2448_p1 }
  0x19   : > { %p2444_p0 = pneg %p2443_p13 }
  0x1b   : > { %p2451_p2 = pnand %p2450_p3, %p2444_p0 }
  0x1d   : > { %2454 = shalt.err (!%p2451_p2)
}
  0x1e   : > { %2360 = dma.hbm_to_vmem [thread:$0]  (!%p2513_p5), %s3067_s2, 16, %s130_s17, [#allocation3]  }
  0x1f   : > { %p3075_p6 = scmp.ne.s32.totalorder %s3072_s14, 0 }
  0x20   : > { %p3076_p8 = scmp.ne.s32.totalorder (!%p3075_p6), %s3073_s15, 0 }
  0x21   : > { %151 = sbr.rel (%p3075_p6) target bundleno = 464 (0x1d0), region = 32 }
  0x28   : > { %2460 = dma.done.wait (%p3076_p8), [#allocation3], 16  }
  0x29   : > { %2462 = vsyncadd (%p3076_p8), [#allocation3], 4294967280  ;;  %vm701_vm0 = vcmask 1043456   ;;  %v2468_v0 = vmov 0.0   ;;  %s175_s30 = smul.u32 98, %s1790_s13  ;;  %vm2469_vm1 = vmmov 0  }
  0x2a   : > { %2149 = vmatprep.subr.bf16.mxu0 %v2468_v0  ;;  %2349 = vmatprep.subr.bf16.mxu1 %v2468_v0  ;;  %vm702_vm2 = vcmask 1044480   ;;  %v2470_v1 = vmov 65535   ;;  %v2375_v4 = vld [vmem:[%s3066_s1] sm:$0xff]   ;;  %v2376_v5 = vld [vmem:[%s3066_s1 + $0x8] sm:$0x1f]   ;;  %vm553_vm3 = vcmask 203776  }
  0x2b   : > { %2153 = vmatprep.mubr.msk.bf16.mxu0 %vm2469_vm1, %v2468_v0  ;;  %2253 = vmatprep.mubr.msk.bf16.mxu1 %vm2469_vm1, %v2468_v0  ;;  %v703_v2 = vsel %vm701_vm0, 4294967295, %v2470_v1  ;;  %p176_p2 = scmp.lt.s32.totalorder %s175_s30, 195  ;;  %v2757_v56 = vld [vmem:[#allocation2] ss:$0 sm:$0xff]  ;;  %vm1623_vm4 = vcmask 158720  }
  0x2c   : > { %v704_v3 = vsel %vm702_vm2, %v703_v2, 0  ;;  %2150 = vmatpush3.bf16.msra.mxu0 %v2375_v4  ;;  %2351 = vmatpush3.bf16.msra.mxu1 %v2375_v4 }
  0x2d   : > { %s3078_s30 = smov (!%p176_p2, %s175_s30), 195  ;;  %2151 = vmatprep.subr.bf16.mxu0 %v2468_v0  ;;  %v706_v6 = vand.u32 %v2376_v5, %v704_v3  ;;  %2350 = vmatprep.subr.bf16.mxu1 %v2468_v0 }
  0x2e   : > { %s1797_s6 = sshll.u32 %s3078_s30, 2 }
  0x2f   : > { %s2561_s11 = scalar_lea.vmem %s3065_s0, %s1797_s6  ;;  %s2768_s15 = scalar_lea.vmem %s3068_s3, %s1797_s6 }
  0x30   : > { %v2377_v7 = vld [vmem:[%s2561_s11] sm:$0xff]   ;;  %v2378_v8 = vld [vmem:[%s2561_s11 + $0xc8] sm:$0xff]   ;;  %2152 = vmatpush3.bf16.msra.mxu0 %v706_v6  ;;  %2352 = vmatpush3.bf16.msra.mxu1 %v706_v6  ;;  %v2380_v10 = vld [vmem:[%s2561_s11 + $0xd0] sm:$0xff]  }
  0x31   : > { %v2379_v9 = vld [vmem:[%s2561_s11 + $0x8] sm:$0xff]   ;;  %v2381_v11 = vld [vmem:[%s2561_s11 + $0x10] sm:$0xff]   ;;  %v2382_v12 = vld [vmem:[%s2561_s11 + $0xd8] sm:$0xff]  }
  0x32   : > { %v2383_v13 = vld [vmem:[%s2561_s11 + $0x18] sm:$0xff]   ;;  %v2384_v14 = vld [vmem:[%s2561_s11 + $0xe0] sm:$0xff]   ;;  %v2386_v16 = vld [vmem:[%s2561_s11 + $0xe8] sm:$0xff]  }
  0x33   : > { %2154 = vmatmul.mubr.msk.bf16.vlgmr.msra.gmra.mrb[0].mxu0 %vm553_vm3, %v2377_v7  ;;  %2254 = vmatmul.mubr.msk.bf16.vlgmr.msra.gmra.mrb[0].mxu1 %vm553_vm3, %v2378_v8  ;;  %v2385_v15 = vld [vmem:[%s2561_s11 + $0x20] sm:$0xff]   ;;  %v2387_v17 = vld [vmem:[%s2561_s11 + $0x28] sm:$0xff]   ;;  %v2388_v18 = vld [vmem:[%s2561_s11 + $0xf0] sm:$0xff]  }
  0x34   : > { %2157 = vmatprep.mubr.msk.bf16.mxu0 %vm2469_vm1, %v2468_v0  ;;  %2257 = vmatprep.mubr.msk.bf16.mxu1 %vm2469_vm1, %v2468_v0  ;;  %v2389_v19 = vld [vmem:[%s2561_s11 + $0x30] sm:$0xff]   ;;  %v2390_v20 = vld [vmem:[%s2561_s11 + $0xf8] sm:$0xff]   ;;  %v2392_v22 = vld [vmem:[%s2561_s11 + $0x100] sm:$0xff]  }
  0x35   : > { %v2391_v21 = vld [vmem:[%s2561_s11 + $0x38] sm:$0xff]   ;;  %v2393_v23 = vld [vmem:[%s2561_s11 + $0x40] sm:$0xff]   ;;  %v2394_v24 = vld [vmem:[%s2561_s11 + $0x108] sm:$0xff]  }
  0x36   : > { %v2395_v25 = vld [vmem:[%s2561_s11 + $0x48] sm:$0xff]   ;;  %v2396_v26 = vld [vmem:[%s2561_s11 + $0x110] sm:$0xff]   ;;  %v2398_v28 = vld [vmem:[%s2561_s11 + $0x118] sm:$0xff]  }
  0x37   : > { %v2397_v27 = vld [vmem:[%s2561_s11 + $0x50] sm:$0xff]   ;;  %v2399_v29 = vld [vmem:[%s2561_s11 + $0x58] sm:$0xff]   ;;  %v2400_v30 = vld [vmem:[%s2561_s11 + $0x120] sm:$0xff]  }
  0x38   : > { %v2401_v31 = vld [vmem:[%s2561_s11 + $0x60] sm:$0xff]   ;;  %v2402_v32 = vld [vmem:[%s2561_s11 + $0x128] sm:$0xff]   ;;  %v2404_v34 = vld [vmem:[%s2561_s11 + $0x130] sm:$0xff]  }
  0x39   : > { %v2403_v33 = vld [vmem:[%s2561_s11 + $0x68] sm:$0xff]   ;;  %v2405_v35 = vld [vmem:[%s2561_s11 + $0x70] sm:$0xff]   ;;  %v2406_v36 = vld [vmem:[%s2561_s11 + $0x138] sm:$0xff]  }
  0x3a   : > { %v2407_v37 = vld [vmem:[%s2561_s11 + $0x78] sm:$0xff]   ;;  %v2408_v38 = vld [vmem:[%s2561_s11 + $0x140] sm:$0xff]   ;;  %v2410_v40 = vld [vmem:[%s2561_s11 + $0x148] sm:$0xff]  }
  0x3b   : > { %2158 = vmatmul.mubr.msk.bf16.gmra.mrb[4].mxu0 %vm553_vm3, %v2379_v9  ;;  %2258 = vmatmul.mubr.msk.bf16.gmra.mrb[4].mxu1 %vm553_vm3, %v2380_v10  ;;  %v2409_v39 = vld [vmem:[%s2561_s11 + $0x80] sm:$0xff]   ;;  %v2411_v41 = vld [vmem:[%s2561_s11 + $0x88] sm:$0xff]   ;;  %v2412_v42 = vld [vmem:[%s2561_s11 + $0x150] sm:$0xff]  }
  0x3c   : > { %2161 = vmatprep.mubr.msk.bf16.mxu0 %vm2469_vm1, %v2468_v0  ;;  %2261 = vmatprep.mubr.msk.bf16.mxu1 %vm2469_vm1, %v2468_v0  ;;  %v2413_v43 = vld [vmem:[%s2561_s11 + $0x90] sm:$0xff]   ;;  %v2414_v44 = vld [vmem:[%s2561_s11 + $0x158] sm:$0xff]   ;;  %v2416_v46 = vld [vmem:[%s2561_s11 + $0x160] sm:$0xff]  }
  0x3d   : > { %v2415_v45 = vld [vmem:[%s2561_s11 + $0x98] sm:$0xff]   ;;  %v2417_v47 = vld [vmem:[%s2561_s11 + $0xa0] sm:$0xff]   ;;  %v2418_v48 = vld [vmem:[%s2561_s11 + $0x168] sm:$0xff]  }
  0x3e   : > { %v2419_v49 = vld [vmem:[%s2561_s11 + $0xa8] sm:$0xff]   ;;  %v2420_v50 = vld [vmem:[%s2561_s11 + $0x170] sm:$0xff]   ;;  %v2422_v52 = vld [vmem:[%s2561_s11 + $0x178] sm:$0xff]  }
  0x3f   : > { %v2421_v51 = vld [vmem:[%s2561_s11 + $0xb0] sm:$0xff]   ;;  %v2423_v53 = vld [vmem:[%s2561_s11 + $0xb8] sm:$0xff]   ;;  %v2424_v54 = vld [vmem:[%s2561_s11 + $0x180] sm:$0xff]  }
  0x40   : > { %v2425_v55 = vld [vmem:[%s2561_s11 + $0xc0] sm:$0xff]  }
  0x43   : > { %2162 = vmatmul.mubr.msk.bf16.gmra.mrb[8].mxu0 %vm553_vm3, %v2381_v11  ;;  %2262 = vmatmul.mubr.msk.bf16.gmra.mrb[8].mxu1 %vm553_vm3, %v2382_v12 }
  0x44   : > { %2165 = vmatprep.mubr.msk.bf16.mxu0 %vm2469_vm1, %v2468_v0  ;;  %2265 = vmatprep.mubr.msk.bf16.mxu1 %vm2469_vm1, %v2468_v0 }
  0x4b   : > { %2166 = vmatmul.mubr.msk.bf16.gmra.mrb[12].mxu0 %vm553_vm3, %v2383_v13  ;;  %2266 = vmatmul.mubr.msk.bf16.gmra.mrb[12].mxu1 %vm553_vm3, %v2384_v14 }
  0x4c   : > { %2169 = vmatprep.mubr.msk.bf16.mxu0 %vm2469_vm1, %v2468_v0  ;;  %2269 = vmatprep.mubr.msk.bf16.mxu1 %vm2469_vm1, %v2468_v0 }
  0x53   : > { %2170 = vmatmul.mubr.msk.bf16.gmra.mrb[16].mxu0 %vm553_vm3, %v2385_v15  ;;  %2270 = vmatmul.mubr.msk.bf16.gmra.mrb[16].mxu1 %vm553_vm3, %v2386_v16 }
  0x54   : > { %2173 = vmatprep.mubr.msk.bf16.mxu0 %vm2469_vm1, %v2468_v0  ;;  %2273 = vmatprep.mubr.msk.bf16.mxu1 %vm2469_vm1, %v2468_v0 }
  0x5b   : > { %2174 = vmatmul.mubr.msk.bf16.gmra.mrb[20].mxu0 %vm553_vm3, %v2387_v17  ;;  %2274 = vmatmul.mubr.msk.bf16.gmra.mrb[20].mxu1 %vm553_vm3, %v2388_v18 }
  0x5c   : > { %2177 = vmatprep.mubr.msk.bf16.mxu0 %vm2469_vm1, %v2468_v0  ;;  %2277 = vmatprep.mubr.msk.bf16.mxu1 %vm2469_vm1, %v2468_v0 }
  0x63   : > { %2178 = vmatmul.mubr.msk.bf16.gmra.mrb[24].mxu0 %vm553_vm3, %v2389_v19  ;;  %2278 = vmatmul.mubr.msk.bf16.gmra.mrb[24].mxu1 %vm553_vm3, %v2390_v20 }
  0x64   : > { %2181 = vmatprep.mubr.msk.bf16.mxu0 %vm2469_vm1, %v2468_v0  ;;  %2281 = vmatprep.mubr.msk.bf16.mxu1 %vm2469_vm1, %v2468_v0 }
  0x6b   : > { %2182 = vmatmul.mubr.msk.bf16.gmra.mrb[28].mxu0 %vm553_vm3, %v2391_v21  ;;  %2282 = vmatmul.mubr.msk.bf16.gmra.mrb[28].mxu1 %vm553_vm3, %v2392_v22 }
  0x6c   : > { %2185 = vmatprep.mubr.msk.bf16.mxu0 %vm2469_vm1, %v2468_v0  ;;  %2285 = vmatprep.mubr.msk.bf16.mxu1 %vm2469_vm1, %v2468_v0 }
  0x73   : > { %2186 = vmatmul.mubr.msk.bf16.gmra.mrb[32].mxu0 %vm553_vm3, %v2393_v23  ;;  %2286 = vmatmul.mubr.msk.bf16.gmra.mrb[32].mxu1 %vm553_vm3, %v2394_v24 }
  0x74   : > { %2189 = vmatprep.mubr.msk.bf16.mxu0 %vm2469_vm1, %v2468_v0  ;;  %2289 = vmatprep.mubr.msk.bf16.mxu1 %vm2469_vm1, %v2468_v0 }
  0x7b   : > { %2190 = vmatmul.mubr.msk.bf16.gmra.mrb[36].mxu0 %vm553_vm3, %v2395_v25  ;;  %2290 = vmatmul.mubr.msk.bf16.gmra.mrb[36].mxu1 %vm553_vm3, %v2396_v26 }
  0x7c   : > { %2193 = vmatprep.mubr.msk.bf16.mxu0 %vm2469_vm1, %v2468_v0  ;;  %2293 = vmatprep.mubr.msk.bf16.mxu1 %vm2469_vm1, %v2468_v0 }
  0x83   : > { %2194 = vmatmul.mubr.msk.bf16.gmra.mrb[40].mxu0 %vm553_vm3, %v2397_v27  ;;  %2294 = vmatmul.mubr.msk.bf16.gmra.mrb[40].mxu1 %vm553_vm3, %v2398_v28 }
  0x84   : > { %2197 = vmatprep.mubr.msk.bf16.mxu0 %vm2469_vm1, %v2468_v0  ;;  %2297 = vmatprep.mubr.msk.bf16.mxu1 %vm2469_vm1, %v2468_v0 }
  0x8b   : > { %2198 = vmatmul.mubr.msk.bf16.gmra.mrb[44].mxu0 %vm553_vm3, %v2399_v29  ;;  %2298 = vmatmul.mubr.msk.bf16.gmra.mrb[44].mxu1 %vm553_vm3, %v2400_v30 }
  0x8c   : > { %2201 = vmatprep.mubr.msk.bf16.mxu0 %vm2469_vm1, %v2468_v0  ;;  %2301 = vmatprep.mubr.msk.bf16.mxu1 %vm2469_vm1, %v2468_v0 }
  0x93   : > { %2202 = vmatmul.mubr.msk.bf16.gmra.mrb[48].mxu0 %vm553_vm3, %v2401_v31  ;;  %2302 = vmatmul.mubr.msk.bf16.gmra.mrb[48].mxu1 %vm553_vm3, %v2402_v32 }
  0x94   : > { %2205 = vmatprep.mubr.msk.bf16.mxu0 %vm2469_vm1, %v2468_v0  ;;  %2305 = vmatprep.mubr.msk.bf16.mxu1 %vm2469_vm1, %v2468_v0 }
  0x9b   : > { %2206 = vmatmul.mubr.msk.bf16.gmra.mrb[52].mxu0 %vm553_vm3, %v2403_v33  ;;  %2306 = vmatmul.mubr.msk.bf16.gmra.mrb[52].mxu1 %vm553_vm3, %v2404_v34 }
  0x9c   : > { %2209 = vmatprep.mubr.msk.bf16.mxu0 %vm2469_vm1, %v2468_v0  ;;  %2309 = vmatprep.mubr.msk.bf16.mxu1 %vm2469_vm1, %v2468_v0 }
  0xa3   : > { %2210 = vmatmul.mubr.msk.bf16.gmra.mrb[56].mxu0 %vm553_vm3, %v2405_v35  ;;  %2310 = vmatmul.mubr.msk.bf16.gmra.mrb[56].mxu1 %vm553_vm3, %v2406_v36 }
  0xa4   : > { %2213 = vmatprep.mubr.msk.bf16.mxu0 %vm2469_vm1, %v2468_v0  ;;  %2313 = vmatprep.mubr.msk.bf16.mxu1 %vm2469_vm1, %v2468_v0 }
  0xab   : > { %2214 = vmatmul.mubr.msk.bf16.gmra.mrb[60].mxu0 %vm553_vm3, %v2407_v37  ;;  %2314 = vmatmul.mubr.msk.bf16.gmra.mrb[60].mxu1 %vm553_vm3, %v2408_v38 }
  0xac   : > { %2217 = vmatprep.mubr.msk.bf16.mxu0 %vm2469_vm1, %v2468_v0  ;;  %2317 = vmatprep.mubr.msk.bf16.mxu1 %vm2469_vm1, %v2468_v0 }
  0xb3   : > { %2218 = vmatmul.mubr.msk.bf16.gmra.mrb[64].mxu0 %vm553_vm3, %v2409_v39  ;;  %2318 = vmatmul.mubr.msk.bf16.gmra.mrb[64].mxu1 %vm553_vm3, %v2410_v40 }
  0xb4   : > { %2221 = vmatprep.mubr.msk.bf16.mxu0 %vm2469_vm1, %v2468_v0  ;;  %2321 = vmatprep.mubr.msk.bf16.mxu1 %vm2469_vm1, %v2468_v0 }
  0xbb   : > { %2222 = vmatmul.mubr.msk.bf16.gmra.mrb[68].mxu0 %vm553_vm3, %v2411_v41  ;;  %2322 = vmatmul.mubr.msk.bf16.gmra.mrb[68].mxu1 %vm553_vm3, %v2412_v42 }
  0xbc   : > { %2225 = vmatprep.mubr.msk.bf16.mxu0 %vm2469_vm1, %v2468_v0  ;;  %2325 = vmatprep.mubr.msk.bf16.mxu1 %vm2469_vm1, %v2468_v0 }
  0xc3   : > { %2226 = vmatmul.mubr.msk.bf16.gmra.mrb[72].mxu0 %vm553_vm3, %v2413_v43  ;;  %2326 = vmatmul.mubr.msk.bf16.gmra.mrb[72].mxu1 %vm553_vm3, %v2414_v44 }
  0xc4   : > { %2229 = vmatprep.mubr.msk.bf16.mxu0 %vm2469_vm1, %v2468_v0  ;;  %2329 = vmatprep.mubr.msk.bf16.mxu1 %vm2469_vm1, %v2468_v0 }
  0xcb   : > { %2230 = vmatmul.mubr.msk.bf16.gmra.mrb[76].mxu0 %vm553_vm3, %v2415_v45  ;;  %2330 = vmatmul.mubr.msk.bf16.gmra.mrb[76].mxu1 %vm553_vm3, %v2416_v46 }
  0xcc   : > { %2233 = vmatprep.mubr.msk.bf16.mxu0 %vm2469_vm1, %v2468_v0  ;;  %2333 = vmatprep.mubr.msk.bf16.mxu1 %vm2469_vm1, %v2468_v0 }
  0xd3   : > { %2234 = vmatmul.mubr.msk.bf16.gmra.mrb[80].mxu0 %vm553_vm3, %v2417_v47  ;;  %2334 = vmatmul.mubr.msk.bf16.gmra.mrb[80].mxu1 %vm553_vm3, %v2418_v48 }
  0xd4   : > { %2237 = vmatprep.mubr.msk.bf16.mxu0 %vm2469_vm1, %v2468_v0  ;;  %2337 = vmatprep.mubr.msk.bf16.mxu1 %vm2469_vm1, %v2468_v0 }
  0xdb   : > { %2238 = vmatmul.mubr.msk.bf16.gmra.mrb[84].mxu0 %vm553_vm3, %v2419_v49  ;;  %2338 = vmatmul.mubr.msk.bf16.gmra.mrb[84].mxu1 %vm553_vm3, %v2420_v50 }
  0xdc   : > { %2241 = vmatprep.mubr.msk.bf16.mxu0 %vm2469_vm1, %v2468_v0  ;;  %2341 = vmatprep.mubr.msk.bf16.mxu1 %vm2469_vm1, %v2468_v0 }
  0xe3   : > { %2242 = vmatmul.mubr.msk.bf16.gmra.mrb[88].mxu0 %vm553_vm3, %v2421_v51  ;;  %2342 = vmatmul.mubr.msk.bf16.gmra.mrb[88].mxu1 %vm553_vm3, %v2422_v52 }
  0xe4   : > { %2245 = vmatprep.mubr.msk.bf16.mxu0 %vm2469_vm1, %v2468_v0  ;;  %2345 = vmatprep.mubr.msk.bf16.mxu1 %vm2469_vm1, %v2468_v0 }
  0xeb   : > { %2246 = vmatmul.mubr.msk.bf16.gmra.mrb[92].mxu0 %vm553_vm3, %v2423_v53  ;;  %2346 = vmatmul.mubr.msk.bf16.gmra.mrb[92].mxu1 %vm553_vm3, %v2424_v54 }
  0xec   : > { %2249 = vmatprep.mubr.msk.bf16.mxu0 %vm2469_vm1, %v2468_v0 }
  0xf3   : > { %2250 = vmatmul.mubr.msk.bf16.gmra.mrb[96].mxu0 %vm553_vm3, %v2425_v55 }
 0x106   : > { %v742_v57 = vpop.f32.mrb[0].mxu0  ;;  %v942_v58 = vpop.f32.mrb[0].mxu1 }
 0x107   : > { %v743_v59 = vadd.f32 %v2757_v56, %v742_v57  ;;  %v2155_v60 = vpop.f32.mrb[1].mxu0  ;;  %v943_v61 = vadd.f32 %v2757_v56, %v942_v58  ;;  %v2255_v62 = vpop.f32.mrb[1].mxu1 }
 0x108   : > { %v745_v63 = vpop.f32.mrb[2].mxu0  ;;  %v945_v1 = vpop.f32.mrb[2].mxu1 }
 0x109   : > { %v1133_v2 = vmax.f32 %v743_v59, 0.0  ;;  %v746_v3 = vadd.f32 %v2757_v56, %v745_v63  ;;  %v2156_v0 = vpop.f32.mrb[3].mxu0  ;;  %v1183_v4 = vmax.f32 %v943_v61, 0.0  ;;  %v946_v5 = vadd.f32 %v2757_v56, %v945_v1  ;;  %v2256_v6 = vpop.f32.mrb[3].mxu1 }
 0x10b   : > { %v2000_v7 = vpack.c.bf16 %v1133_v2, %v1133_v2  ;;  %v1134_v8 = vmax.f32 %v746_v3, 0.0  ;;  %v2050_v9 = vpack.c.bf16 %v1183_v4, %v1183_v4  ;;  %v1184_v10 = vmax.f32 %v946_v5, 0.0 }
 0x10d   : > { %1624 = vst.msk [vmem:[%s2768_s15] sm:$0xf] %vm1623_vm4, %v2000_v7  ;;  %v2001_v11 = vpack.c.bf16 %v1134_v8, %v1134_v8  ;;  %1674 = vst.msk [vmem:[%s2768_s15 + $0xc8] sm:$0xf] %vm1623_vm4, %v2050_v9  ;;  %v2051_v12 = vpack.c.bf16 %v1184_v10, %v1184_v10 }
 0x10e   : > { %v750_v13 = vpop.f32.mrb[4].mxu0  ;;  %v950_v14 = vpop.f32.mrb[4].mxu1 }
 0x10f   : > { %1625 = vst.msk [vmem:[%s2768_s15 + $0x4] sm:$0xf] %vm1623_vm4, %v2001_v11  ;;  %1675 = vst.msk [vmem:[%s2768_s15 + $0xcc] sm:$0xf] %vm1623_vm4, %v2051_v12  ;;  %v751_v15 = vadd.f32 %v2757_v56, %v750_v13  ;;  %v2159_v16 = vpop.f32.mrb[5].mxu0  ;;  %v951_v17 = vadd.f32 %v2757_v56, %v950_v14  ;;  %v2259_v18 = vpop.f32.mrb[5].mxu1 }
 0x110   : > { %v753_v19 = vpop.f32.mrb[6].mxu0  ;;  %v953_v20 = vpop.f32.mrb[6].mxu1 }
 0x111   : > { %v1135_v21 = vmax.f32 %v751_v15, 0.0  ;;  %v754_v22 = vadd.f32 %v2757_v56, %v753_v19  ;;  %v2160_v23 = vpop.f32.mrb[7].mxu0  ;;  %v1185_v24 = vmax.f32 %v951_v17, 0.0  ;;  %v954_v25 = vadd.f32 %v2757_v56, %v953_v20  ;;  %v2260_v26 = vpop.f32.mrb[7].mxu1 }
 0x113   : > { %v2002_v27 = vpack.c.bf16 %v1135_v21, %v1135_v21  ;;  %v1136_v28 = vmax.f32 %v754_v22, 0.0  ;;  %v2052_v29 = vpack.c.bf16 %v1185_v24, %v1185_v24  ;;  %v1186_v30 = vmax.f32 %v954_v25, 0.0 }
 0x115   : > { %1626 = vst.msk [vmem:[%s2768_s15 + $0x8] sm:$0xf] %vm1623_vm4, %v2002_v27  ;;  %v2003_v31 = vpack.c.bf16 %v1136_v28, %v1136_v28  ;;  %1676 = vst.msk [vmem:[%s2768_s15 + $0xd0] sm:$0xf] %vm1623_vm4, %v2052_v29  ;;  %v2053_v32 = vpack.c.bf16 %v1186_v30, %v1186_v30 }
 0x116   : > { %v758_v33 = vpop.f32.mrb[8].mxu0  ;;  %v958_v34 = vpop.f32.mrb[8].mxu1 }
 0x117   : > { %1627 = vst.msk [vmem:[%s2768_s15 + $0xc] sm:$0xf] %vm1623_vm4, %v2003_v31  ;;  %1677 = vst.msk [vmem:[%s2768_s15 + $0xd4] sm:$0xf] %vm1623_vm4, %v2053_v32  ;;  %v759_v35 = vadd.f32 %v2757_v56, %v758_v33  ;;  %v2163_v36 = vpop.f32.mrb[9].mxu0  ;;  %v959_v37 = vadd.f32 %v2757_v56, %v958_v34  ;;  %v2263_v38 = vpop.f32.mrb[9].mxu1 }
 0x118   : > { %v761_v39 = vpop.f32.mrb[10].mxu0  ;;  %v961_v40 = vpop.f32.mrb[10].mxu1 }
 0x119   : > { %v1137_v41 = vmax.f32 %v759_v35, 0.0  ;;  %v762_v42 = vadd.f32 %v2757_v56, %v761_v39  ;;  %v2164_v43 = vpop.f32.mrb[11].mxu0  ;;  %v1187_v44 = vmax.f32 %v959_v37, 0.0  ;;  %v962_v45 = vadd.f32 %v2757_v56, %v961_v40  ;;  %v2264_v46 = vpop.f32.mrb[11].mxu1 }
 0x11b   : > { %v2004_v47 = vpack.c.bf16 %v1137_v41, %v1137_v41  ;;  %v1138_v48 = vmax.f32 %v762_v42, 0.0  ;;  %v2054_v49 = vpack.c.bf16 %v1187_v44, %v1187_v44  ;;  %v1188_v50 = vmax.f32 %v962_v45, 0.0 }
 0x11d   : > { %1628 = vst.msk [vmem:[%s2768_s15 + $0x10] sm:$0xf] %vm1623_vm4, %v2004_v47  ;;  %v2005_v51 = vpack.c.bf16 %v1138_v48, %v1138_v48  ;;  %1678 = vst.msk [vmem:[%s2768_s15 + $0xd8] sm:$0xf] %vm1623_vm4, %v2054_v49  ;;  %v2055_v52 = vpack.c.bf16 %v1188_v50, %v1188_v50 }
 0x11e   : > { %v766_v53 = vpop.f32.mrb[12].mxu0  ;;  %v966_v54 = vpop.f32.mrb[12].mxu1 }
 0x11f   : > { %1629 = vst.msk [vmem:[%s2768_s15 + $0x14] sm:$0xf] %vm1623_vm4, %v2005_v51  ;;  %1679 = vst.msk [vmem:[%s2768_s15 + $0xdc] sm:$0xf] %vm1623_vm4, %v2055_v52  ;;  %v767_v55 = vadd.f32 %v2757_v56, %v766_v53  ;;  %v2167_v57 = vpop.f32.mrb[13].mxu0  ;;  %v967_v58 = vadd.f32 %v2757_v56, %v966_v54  ;;  %v2267_v59 = vpop.f32.mrb[13].mxu1 }
 0x120   : > { %v769_v60 = vpop.f32.mrb[14].mxu0  ;;  %v969_v61 = vpop.f32.mrb[14].mxu1 }
 0x121   : > { %v1139_v62 = vmax.f32 %v767_v55, 0.0  ;;  %v770_v63 = vadd.f32 %v2757_v56, %v769_v60  ;;  %v2168_v1 = vpop.f32.mrb[15].mxu0  ;;  %v1189_v2 = vmax.f32 %v967_v58, 0.0  ;;  %v970_v3 = vadd.f32 %v2757_v56, %v969_v61  ;;  %v2268_v0 = vpop.f32.mrb[15].mxu1 }
 0x123   : > { %v2006_v4 = vpack.c.bf16 %v1139_v62, %v1139_v62  ;;  %v1140_v5 = vmax.f32 %v770_v63, 0.0  ;;  %v2056_v6 = vpack.c.bf16 %v1189_v2, %v1189_v2  ;;  %v1190_v7 = vmax.f32 %v970_v3, 0.0 }
 0x125   : > { %1630 = vst.msk [vmem:[%s2768_s15 + $0x18] sm:$0xf] %vm1623_vm4, %v2006_v4  ;;  %v2007_v8 = vpack.c.bf16 %v1140_v5, %v1140_v5  ;;  %1680 = vst.msk [vmem:[%s2768_s15 + $0xe0] sm:$0xf] %vm1623_vm4, %v2056_v6  ;;  %v2057_v9 = vpack.c.bf16 %v1190_v7, %v1190_v7 }
 0x126   : > { %v774_v10 = vpop.f32.mrb[16].mxu0  ;;  %v974_v11 = vpop.f32.mrb[16].mxu1 }
 0x127   : > { %1631 = vst.msk [vmem:[%s2768_s15 + $0x1c] sm:$0xf] %vm1623_vm4, %v2007_v8  ;;  %1681 = vst.msk [vmem:[%s2768_s15 + $0xe4] sm:$0xf] %vm1623_vm4, %v2057_v9  ;;  %v775_v12 = vadd.f32 %v2757_v56, %v774_v10  ;;  %v2171_v13 = vpop.f32.mrb[17].mxu0  ;;  %v975_v14 = vadd.f32 %v2757_v56, %v974_v11  ;;  %v2271_v15 = vpop.f32.mrb[17].mxu1 }
 0x128   : > { %v777_v16 = vpop.f32.mrb[18].mxu0  ;;  %v977_v17 = vpop.f32.mrb[18].mxu1 }
 0x129   : > { %v1141_v18 = vmax.f32 %v775_v12, 0.0  ;;  %v778_v19 = vadd.f32 %v2757_v56, %v777_v16  ;;  %v2172_v20 = vpop.f32.mrb[19].mxu0  ;;  %v1191_v21 = vmax.f32 %v975_v14, 0.0  ;;  %v978_v22 = vadd.f32 %v2757_v56, %v977_v17  ;;  %v2272_v23 = vpop.f32.mrb[19].mxu1 }
 0x12b   : > { %v2008_v24 = vpack.c.bf16 %v1141_v18, %v1141_v18  ;;  %v1142_v25 = vmax.f32 %v778_v19, 0.0  ;;  %v2058_v26 = vpack.c.bf16 %v1191_v21, %v1191_v21  ;;  %v1192_v27 = vmax.f32 %v978_v22, 0.0 }
 0x12d   : > { %1632 = vst.msk [vmem:[%s2768_s15 + $0x20] sm:$0xf] %vm1623_vm4, %v2008_v24  ;;  %v2009_v28 = vpack.c.bf16 %v1142_v25, %v1142_v25  ;;  %1682 = vst.msk [vmem:[%s2768_s15 + $0xe8] sm:$0xf] %vm1623_vm4, %v2058_v26  ;;  %v2059_v29 = vpack.c.bf16 %v1192_v27, %v1192_v27 }
 0x12e   : > { %v782_v30 = vpop.f32.mrb[20].mxu0  ;;  %v982_v31 = vpop.f32.mrb[20].mxu1 }
 0x12f   : > { %1633 = vst.msk [vmem:[%s2768_s15 + $0x24] sm:$0xf] %vm1623_vm4, %v2009_v28  ;;  %1683 = vst.msk [vmem:[%s2768_s15 + $0xec] sm:$0xf] %vm1623_vm4, %v2059_v29  ;;  %v783_v32 = vadd.f32 %v2757_v56, %v782_v30  ;;  %v2175_v33 = vpop.f32.mrb[21].mxu0  ;;  %v983_v34 = vadd.f32 %v2757_v56, %v982_v31  ;;  %v2275_v35 = vpop.f32.mrb[21].mxu1 }
 0x130   : > { %v785_v36 = vpop.f32.mrb[22].mxu0  ;;  %v985_v37 = vpop.f32.mrb[22].mxu1 }
 0x131   : > { %v1143_v38 = vmax.f32 %v783_v32, 0.0  ;;  %v786_v39 = vadd.f32 %v2757_v56, %v785_v36  ;;  %v2176_v40 = vpop.f32.mrb[23].mxu0  ;;  %v1193_v41 = vmax.f32 %v983_v34, 0.0  ;;  %v986_v42 = vadd.f32 %v2757_v56, %v985_v37  ;;  %v2276_v43 = vpop.f32.mrb[23].mxu1 }
 0x133   : > { %v2010_v44 = vpack.c.bf16 %v1143_v38, %v1143_v38  ;;  %v1144_v45 = vmax.f32 %v786_v39, 0.0  ;;  %v2060_v46 = vpack.c.bf16 %v1193_v41, %v1193_v41  ;;  %v1194_v47 = vmax.f32 %v986_v42, 0.0 }
 0x135   : > { %1634 = vst.msk [vmem:[%s2768_s15 + $0x28] sm:$0xf] %vm1623_vm4, %v2010_v44  ;;  %v2011_v48 = vpack.c.bf16 %v1144_v45, %v1144_v45  ;;  %1684 = vst.msk [vmem:[%s2768_s15 + $0xf0] sm:$0xf] %vm1623_vm4, %v2060_v46  ;;  %v2061_v49 = vpack.c.bf16 %v1194_v47, %v1194_v47 }
 0x136   : > { %v790_v50 = vpop.f32.mrb[24].mxu0  ;;  %v990_v51 = vpop.f32.mrb[24].mxu1 }
 0x137   : > { %1635 = vst.msk [vmem:[%s2768_s15 + $0x2c] sm:$0xf] %vm1623_vm4, %v2011_v48  ;;  %1685 = vst.msk [vmem:[%s2768_s15 + $0xf4] sm:$0xf] %vm1623_vm4, %v2061_v49  ;;  %v791_v52 = vadd.f32 %v2757_v56, %v790_v50  ;;  %v2179_v53 = vpop.f32.mrb[25].mxu0  ;;  %v991_v54 = vadd.f32 %v2757_v56, %v990_v51  ;;  %v2279_v55 = vpop.f32.mrb[25].mxu1 }
 0x138   : > { %v793_v57 = vpop.f32.mrb[26].mxu0  ;;  %v993_v58 = vpop.f32.mrb[26].mxu1 }
 0x139   : > { %v1145_v59 = vmax.f32 %v791_v52, 0.0  ;;  %v794_v60 = vadd.f32 %v2757_v56, %v793_v57  ;;  %v2180_v61 = vpop.f32.mrb[27].mxu0  ;;  %v1195_v62 = vmax.f32 %v991_v54, 0.0  ;;  %v994_v63 = vadd.f32 %v2757_v56, %v993_v58  ;;  %v2280_v1 = vpop.f32.mrb[27].mxu1 }
 0x13b   : > { %v2012_v2 = vpack.c.bf16 %v1145_v59, %v1145_v59  ;;  %v1146_v3 = vmax.f32 %v794_v60, 0.0  ;;  %v2062_v0 = vpack.c.bf16 %v1195_v62, %v1195_v62  ;;  %v1196_v4 = vmax.f32 %v994_v63, 0.0 }
 0x13d   : > { %1636 = vst.msk [vmem:[%s2768_s15 + $0x30] sm:$0xf] %vm1623_vm4, %v2012_v2  ;;  %v2013_v5 = vpack.c.bf16 %v1146_v3, %v1146_v3  ;;  %1686 = vst.msk [vmem:[%s2768_s15 + $0xf8] sm:$0xf] %vm1623_vm4, %v2062_v0  ;;  %v2063_v6 = vpack.c.bf16 %v1196_v4, %v1196_v4 }
 0x13e   : > { %v798_v7 = vpop.f32.mrb[28].mxu0  ;;  %v998_v8 = vpop.f32.mrb[28].mxu1 }
 0x13f   : > { %1637 = vst.msk [vmem:[%s2768_s15 + $0x34] sm:$0xf] %vm1623_vm4, %v2013_v5  ;;  %1687 = vst.msk [vmem:[%s2768_s15 + $0xfc] sm:$0xf] %vm1623_vm4, %v2063_v6  ;;  %v799_v9 = vadd.f32 %v2757_v56, %v798_v7  ;;  %v2183_v10 = vpop.f32.mrb[29].mxu0  ;;  %v999_v11 = vadd.f32 %v2757_v56, %v998_v8  ;;  %v2283_v12 = vpop.f32.mrb[29].mxu1 }
 0x140   : > { %v801_v13 = vpop.f32.mrb[30].mxu0  ;;  %v1001_v14 = vpop.f32.mrb[30].mxu1 }
 0x141   : > { %v1147_v15 = vmax.f32 %v799_v9, 0.0  ;;  %v802_v16 = vadd.f32 %v2757_v56, %v801_v13  ;;  %v2184_v17 = vpop.f32.mrb[31].mxu0  ;;  %v1197_v18 = vmax.f32 %v999_v11, 0.0  ;;  %v1002_v19 = vadd.f32 %v2757_v56, %v1001_v14  ;;  %v2284_v20 = vpop.f32.mrb[31].mxu1 }
 0x143   : > { %v2014_v21 = vpack.c.bf16 %v1147_v15, %v1147_v15  ;;  %v1148_v22 = vmax.f32 %v802_v16, 0.0  ;;  %v2064_v23 = vpack.c.bf16 %v1197_v18, %v1197_v18  ;;  %v1198_v24 = vmax.f32 %v1002_v19, 0.0 }
 0x145   : > { %1638 = vst.msk [vmem:[%s2768_s15 + $0x38] sm:$0xf] %vm1623_vm4, %v2014_v21  ;;  %v2015_v25 = vpack.c.bf16 %v1148_v22, %v1148_v22  ;;  %1688 = vst.msk [vmem:[%s2768_s15 + $0x100] sm:$0xf] %vm1623_vm4, %v2064_v23  ;;  %v2065_v26 = vpack.c.bf16 %v1198_v24, %v1198_v24 }
 0x146   : > { %v806_v27 = vpop.f32.mrb[32].mxu0  ;;  %v1006_v28 = vpop.f32.mrb[32].mxu1 }
 0x147   : > { %1639 = vst.msk [vmem:[%s2768_s15 + $0x3c] sm:$0xf] %vm1623_vm4, %v2015_v25  ;;  %1689 = vst.msk [vmem:[%s2768_s15 + $0x104] sm:$0xf] %vm1623_vm4, %v2065_v26  ;;  %v807_v29 = vadd.f32 %v2757_v56, %v806_v27  ;;  %v2187_v30 = vpop.f32.mrb[33].mxu0  ;;  %v1007_v31 = vadd.f32 %v2757_v56, %v1006_v28  ;;  %v2287_v32 = vpop.f32.mrb[33].mxu1 }
 0x148   : > { %v809_v33 = vpop.f32.mrb[34].mxu0  ;;  %v1009_v34 = vpop.f32.mrb[34].mxu1 }
 0x149   : > { %v1149_v35 = vmax.f32 %v807_v29, 0.0  ;;  %v810_v36 = vadd.f32 %v2757_v56, %v809_v33  ;;  %v2188_v37 = vpop.f32.mrb[35].mxu0  ;;  %v1199_v38 = vmax.f32 %v1007_v31, 0.0  ;;  %v1010_v39 = vadd.f32 %v2757_v56, %v1009_v34  ;;  %v2288_v40 = vpop.f32.mrb[35].mxu1 }
 0x14b   : > { %v2016_v41 = vpack.c.bf16 %v1149_v35, %v1149_v35  ;;  %v1150_v42 = vmax.f32 %v810_v36, 0.0  ;;  %v2066_v43 = vpack.c.bf16 %v1199_v38, %v1199_v38  ;;  %v1200_v44 = vmax.f32 %v1010_v39, 0.0 }
 0x14d   : > { %1640 = vst.msk [vmem:[%s2768_s15 + $0x40] sm:$0xf] %vm1623_vm4, %v2016_v41  ;;  %v2017_v45 = vpack.c.bf16 %v1150_v42, %v1150_v42  ;;  %1690 = vst.msk [vmem:[%s2768_s15 + $0x108] sm:$0xf] %vm1623_vm4, %v2066_v43  ;;  %v2067_v46 = vpack.c.bf16 %v1200_v44, %v1200_v44 }
 0x14e   : > { %v814_v47 = vpop.f32.mrb[36].mxu0  ;;  %v1014_v48 = vpop.f32.mrb[36].mxu1 }
 0x14f   : > { %1641 = vst.msk [vmem:[%s2768_s15 + $0x44] sm:$0xf] %vm1623_vm4, %v2017_v45  ;;  %1691 = vst.msk [vmem:[%s2768_s15 + $0x10c] sm:$0xf] %vm1623_vm4, %v2067_v46  ;;  %v815_v49 = vadd.f32 %v2757_v56, %v814_v47  ;;  %v2191_v50 = vpop.f32.mrb[37].mxu0  ;;  %v1015_v51 = vadd.f32 %v2757_v56, %v1014_v48  ;;  %v2291_v52 = vpop.f32.mrb[37].mxu1 }
 0x150   : > { %v817_v53 = vpop.f32.mrb[38].mxu0  ;;  %v1017_v54 = vpop.f32.mrb[38].mxu1 }
 0x151   : > { %v1151_v55 = vmax.f32 %v815_v49, 0.0  ;;  %v818_v57 = vadd.f32 %v2757_v56, %v817_v53  ;;  %v2192_v58 = vpop.f32.mrb[39].mxu0  ;;  %v1201_v59 = vmax.f32 %v1015_v51, 0.0  ;;  %v1018_v60 = vadd.f32 %v2757_v56, %v1017_v54  ;;  %v2292_v61 = vpop.f32.mrb[39].mxu1 }
 0x153   : > { %v2018_v62 = vpack.c.bf16 %v1151_v55, %v1151_v55  ;;  %v1152_v63 = vmax.f32 %v818_v57, 0.0  ;;  %v2068_v1 = vpack.c.bf16 %v1201_v59, %v1201_v59  ;;  %v1202_v2 = vmax.f32 %v1018_v60, 0.0 }
 0x155   : > { %1642 = vst.msk [vmem:[%s2768_s15 + $0x48] sm:$0xf] %vm1623_vm4, %v2018_v62  ;;  %v2019_v3 = vpack.c.bf16 %v1152_v63, %v1152_v63  ;;  %1692 = vst.msk [vmem:[%s2768_s15 + $0x110] sm:$0xf] %vm1623_vm4, %v2068_v1  ;;  %v2069_v0 = vpack.c.bf16 %v1202_v2, %v1202_v2 }
 0x156   : > { %v822_v4 = vpop.f32.mrb[40].mxu0  ;;  %v1022_v5 = vpop.f32.mrb[40].mxu1 }
 0x157   : > { %1643 = vst.msk [vmem:[%s2768_s15 + $0x4c] sm:$0xf] %vm1623_vm4, %v2019_v3  ;;  %1693 = vst.msk [vmem:[%s2768_s15 + $0x114] sm:$0xf] %vm1623_vm4, %v2069_v0  ;;  %v823_v6 = vadd.f32 %v2757_v56, %v822_v4  ;;  %v2195_v7 = vpop.f32.mrb[41].mxu0  ;;  %v1023_v8 = vadd.f32 %v2757_v56, %v1022_v5  ;;  %v2295_v9 = vpop.f32.mrb[41].mxu1 }
 0x158   : > { %v825_v10 = vpop.f32.mrb[42].mxu0  ;;  %v1025_v11 = vpop.f32.mrb[42].mxu1 }
 0x159   : > { %v1153_v12 = vmax.f32 %v823_v6, 0.0  ;;  %v826_v13 = vadd.f32 %v2757_v56, %v825_v10  ;;  %v2196_v14 = vpop.f32.mrb[43].mxu0  ;;  %v1203_v15 = vmax.f32 %v1023_v8, 0.0  ;;  %v1026_v16 = vadd.f32 %v2757_v56, %v1025_v11  ;;  %v2296_v17 = vpop.f32.mrb[43].mxu1 }
 0x15b   : > { %v2020_v18 = vpack.c.bf16 %v1153_v12, %v1153_v12  ;;  %v1154_v19 = vmax.f32 %v826_v13, 0.0  ;;  %v2070_v20 = vpack.c.bf16 %v1203_v15, %v1203_v15  ;;  %v1204_v21 = vmax.f32 %v1026_v16, 0.0 }
 0x15d   : > { %1644 = vst.msk [vmem:[%s2768_s15 + $0x50] sm:$0xf] %vm1623_vm4, %v2020_v18  ;;  %v2021_v22 = vpack.c.bf16 %v1154_v19, %v1154_v19  ;;  %1694 = vst.msk [vmem:[%s2768_s15 + $0x118] sm:$0xf] %vm1623_vm4, %v2070_v20  ;;  %v2071_v23 = vpack.c.bf16 %v1204_v21, %v1204_v21 }
 0x15e   : > { %v830_v24 = vpop.f32.mrb[44].mxu0  ;;  %v1030_v25 = vpop.f32.mrb[44].mxu1 }
 0x15f   : > { %1645 = vst.msk [vmem:[%s2768_s15 + $0x54] sm:$0xf] %vm1623_vm4, %v2021_v22  ;;  %1695 = vst.msk [vmem:[%s2768_s15 + $0x11c] sm:$0xf] %vm1623_vm4, %v2071_v23  ;;  %v831_v26 = vadd.f32 %v2757_v56, %v830_v24  ;;  %v2199_v27 = vpop.f32.mrb[45].mxu0  ;;  %v1031_v28 = vadd.f32 %v2757_v56, %v1030_v25  ;;  %v2299_v29 = vpop.f32.mrb[45].mxu1 }
 0x160   : > { %v833_v30 = vpop.f32.mrb[46].mxu0  ;;  %v1033_v31 = vpop.f32.mrb[46].mxu1 }
 0x161   : > { %v1155_v32 = vmax.f32 %v831_v26, 0.0  ;;  %v834_v33 = vadd.f32 %v2757_v56, %v833_v30  ;;  %v2200_v34 = vpop.f32.mrb[47].mxu0  ;;  %v1205_v35 = vmax.f32 %v1031_v28, 0.0  ;;  %v1034_v36 = vadd.f32 %v2757_v56, %v1033_v31  ;;  %v2300_v37 = vpop.f32.mrb[47].mxu1 }
 0x163   : > { %v2022_v38 = vpack.c.bf16 %v1155_v32, %v1155_v32  ;;  %v1156_v39 = vmax.f32 %v834_v33, 0.0  ;;  %v2072_v40 = vpack.c.bf16 %v1205_v35, %v1205_v35  ;;  %v1206_v41 = vmax.f32 %v1034_v36, 0.0 }
 0x165   : > { %1646 = vst.msk [vmem:[%s2768_s15 + $0x58] sm:$0xf] %vm1623_vm4, %v2022_v38  ;;  %v2023_v42 = vpack.c.bf16 %v1156_v39, %v1156_v39  ;;  %1696 = vst.msk [vmem:[%s2768_s15 + $0x120] sm:$0xf] %vm1623_vm4, %v2072_v40  ;;  %v2073_v43 = vpack.c.bf16 %v1206_v41, %v1206_v41 }
 0x166   : > { %v838_v44 = vpop.f32.mrb[48].mxu0  ;;  %v1038_v45 = vpop.f32.mrb[48].mxu1 }
 0x167   : > { %1647 = vst.msk [vmem:[%s2768_s15 + $0x5c] sm:$0xf] %vm1623_vm4, %v2023_v42  ;;  %1697 = vst.msk [vmem:[%s2768_s15 + $0x124] sm:$0xf] %vm1623_vm4, %v2073_v43  ;;  %v839_v46 = vadd.f32 %v2757_v56, %v838_v44  ;;  %v2203_v47 = vpop.f32.mrb[49].mxu0  ;;  %v1039_v48 = vadd.f32 %v2757_v56, %v1038_v45  ;;  %v2303_v49 = vpop.f32.mrb[49].mxu1 }
 0x168   : > { %v841_v50 = vpop.f32.mrb[50].mxu0  ;;  %v1041_v51 = vpop.f32.mrb[50].mxu1 }
 0x169   : > { %v1157_v52 = vmax.f32 %v839_v46, 0.0  ;;  %v842_v53 = vadd.f32 %v2757_v56, %v841_v50  ;;  %v2204_v54 = vpop.f32.mrb[51].mxu0  ;;  %v1207_v55 = vmax.f32 %v1039_v48, 0.0  ;;  %v1042_v57 = vadd.f32 %v2757_v56, %v1041_v51  ;;  %v2304_v58 = vpop.f32.mrb[51].mxu1 }
 0x16b   : > { %v2024_v59 = vpack.c.bf16 %v1157_v52, %v1157_v52  ;;  %v1158_v60 = vmax.f32 %v842_v53, 0.0  ;;  %v2074_v61 = vpack.c.bf16 %v1207_v55, %v1207_v55  ;;  %v1208_v62 = vmax.f32 %v1042_v57, 0.0 }
 0x16d   : > { %1648 = vst.msk [vmem:[%s2768_s15 + $0x60] sm:$0xf] %vm1623_vm4, %v2024_v59  ;;  %v2025_v63 = vpack.c.bf16 %v1158_v60, %v1158_v60  ;;  %1698 = vst.msk [vmem:[%s2768_s15 + $0x128] sm:$0xf] %vm1623_vm4, %v2074_v61  ;;  %v2075_v1 = vpack.c.bf16 %v1208_v62, %v1208_v62 }
 0x16e   : > { %v846_v2 = vpop.f32.mrb[52].mxu0  ;;  %v1046_v3 = vpop.f32.mrb[52].mxu1 }
 0x16f   : > { %1649 = vst.msk [vmem:[%s2768_s15 + $0x64] sm:$0xf] %vm1623_vm4, %v2025_v63  ;;  %1699 = vst.msk [vmem:[%s2768_s15 + $0x12c] sm:$0xf] %vm1623_vm4, %v2075_v1  ;;  %v847_v0 = vadd.f32 %v2757_v56, %v846_v2  ;;  %v2207_v4 = vpop.f32.mrb[53].mxu0  ;;  %v1047_v5 = vadd.f32 %v2757_v56, %v1046_v3  ;;  %v2307_v6 = vpop.f32.mrb[53].mxu1 }
 0x170   : > { %v849_v7 = vpop.f32.mrb[54].mxu0  ;;  %v1049_v8 = vpop.f32.mrb[54].mxu1 }
 0x171   : > { %v1159_v9 = vmax.f32 %v847_v0, 0.0  ;;  %v850_v10 = vadd.f32 %v2757_v56, %v849_v7  ;;  %v2208_v11 = vpop.f32.mrb[55].mxu0  ;;  %v1209_v12 = vmax.f32 %v1047_v5, 0.0  ;;  %v1050_v13 = vadd.f32 %v2757_v56, %v1049_v8  ;;  %v2308_v14 = vpop.f32.mrb[55].mxu1 }
 0x173   : > { %v2026_v15 = vpack.c.bf16 %v1159_v9, %v1159_v9  ;;  %v1160_v16 = vmax.f32 %v850_v10, 0.0  ;;  %v2076_v17 = vpack.c.bf16 %v1209_v12, %v1209_v12  ;;  %v1210_v18 = vmax.f32 %v1050_v13, 0.0 }
 0x175   : > { %1650 = vst.msk [vmem:[%s2768_s15 + $0x68] sm:$0xf] %vm1623_vm4, %v2026_v15  ;;  %v2027_v19 = vpack.c.bf16 %v1160_v16, %v1160_v16  ;;  %1700 = vst.msk [vmem:[%s2768_s15 + $0x130] sm:$0xf] %vm1623_vm4, %v2076_v17  ;;  %v2077_v20 = vpack.c.bf16 %v1210_v18, %v1210_v18 }
 0x176   : > { %v854_v21 = vpop.f32.mrb[56].mxu0  ;;  %v1054_v22 = vpop.f32.mrb[56].mxu1 }
 0x177   : > { %1651 = vst.msk [vmem:[%s2768_s15 + $0x6c] sm:$0xf] %vm1623_vm4, %v2027_v19  ;;  %1701 = vst.msk [vmem:[%s2768_s15 + $0x134] sm:$0xf] %vm1623_vm4, %v2077_v20  ;;  %v855_v23 = vadd.f32 %v2757_v56, %v854_v21  ;;  %v2211_v24 = vpop.f32.mrb[57].mxu0  ;;  %v1055_v25 = vadd.f32 %v2757_v56, %v1054_v22  ;;  %v2311_v26 = vpop.f32.mrb[57].mxu1 }
 0x178   : > { %v857_v27 = vpop.f32.mrb[58].mxu0  ;;  %v1057_v28 = vpop.f32.mrb[58].mxu1 }
 0x179   : > { %v1161_v29 = vmax.f32 %v855_v23, 0.0  ;;  %v858_v30 = vadd.f32 %v2757_v56, %v857_v27  ;;  %v2212_v31 = vpop.f32.mrb[59].mxu0  ;;  %v1211_v32 = vmax.f32 %v1055_v25, 0.0  ;;  %v1058_v33 = vadd.f32 %v2757_v56, %v1057_v28  ;;  %v2312_v34 = vpop.f32.mrb[59].mxu1 }
 0x17b   : > { %v2028_v35 = vpack.c.bf16 %v1161_v29, %v1161_v29  ;;  %v1162_v36 = vmax.f32 %v858_v30, 0.0  ;;  %v2078_v37 = vpack.c.bf16 %v1211_v32, %v1211_v32  ;;  %v1212_v38 = vmax.f32 %v1058_v33, 0.0 }
 0x17d   : > { %1652 = vst.msk [vmem:[%s2768_s15 + $0x70] sm:$0xf] %vm1623_vm4, %v2028_v35  ;;  %v2029_v39 = vpack.c.bf16 %v1162_v36, %v1162_v36  ;;  %1702 = vst.msk [vmem:[%s2768_s15 + $0x138] sm:$0xf] %vm1623_vm4, %v2078_v37  ;;  %v2079_v40 = vpack.c.bf16 %v1212_v38, %v1212_v38 }
 0x17e   : > { %v862_v41 = vpop.f32.mrb[60].mxu0  ;;  %v1062_v42 = vpop.f32.mrb[60].mxu1 }
 0x17f   : > { %1653 = vst.msk [vmem:[%s2768_s15 + $0x74] sm:$0xf] %vm1623_vm4, %v2029_v39  ;;  %1703 = vst.msk [vmem:[%s2768_s15 + $0x13c] sm:$0xf] %vm1623_vm4, %v2079_v40  ;;  %v863_v43 = vadd.f32 %v2757_v56, %v862_v41  ;;  %v2215_v44 = vpop.f32.mrb[61].mxu0  ;;  %v1063_v45 = vadd.f32 %v2757_v56, %v1062_v42  ;;  %v2315_v46 = vpop.f32.mrb[61].mxu1 }
 0x180   : > { %v865_v47 = vpop.f32.mrb[62].mxu0  ;;  %v1065_v48 = vpop.f32.mrb[62].mxu1 }
 0x181   : > { %v1163_v49 = vmax.f32 %v863_v43, 0.0  ;;  %v866_v50 = vadd.f32 %v2757_v56, %v865_v47  ;;  %v2216_v51 = vpop.f32.mrb[63].mxu0  ;;  %v1213_v52 = vmax.f32 %v1063_v45, 0.0  ;;  %v1066_v53 = vadd.f32 %v2757_v56, %v1065_v48  ;;  %v2316_v54 = vpop.f32.mrb[63].mxu1 }
 0x183   : > { %v2030_v55 = vpack.c.bf16 %v1163_v49, %v1163_v49  ;;  %v1164_v57 = vmax.f32 %v866_v50, 0.0  ;;  %v2080_v58 = vpack.c.bf16 %v1213_v52, %v1213_v52  ;;  %v1214_v59 = vmax.f32 %v1066_v53, 0.0 }
 0x185   : > { %1654 = vst.msk [vmem:[%s2768_s15 + $0x78] sm:$0xf] %vm1623_vm4, %v2030_v55  ;;  %v2031_v60 = vpack.c.bf16 %v1164_v57, %v1164_v57  ;;  %1704 = vst.msk [vmem:[%s2768_s15 + $0x140] sm:$0xf] %vm1623_vm4, %v2080_v58  ;;  %v2081_v61 = vpack.c.bf16 %v1214_v59, %v1214_v59 }
 0x186   : > { %v870_v62 = vpop.f32.mrb[64].mxu0  ;;  %v1070_v63 = vpop.f32.mrb[64].mxu1 }
 0x187   : > { %1655 = vst.msk [vmem:[%s2768_s15 + $0x7c] sm:$0xf] %vm1623_vm4, %v2031_v60  ;;  %1705 = vst.msk [vmem:[%s2768_s15 + $0x144] sm:$0xf] %vm1623_vm4, %v2081_v61  ;;  %v871_v1 = vadd.f32 %v2757_v56, %v870_v62  ;;  %v2219_v2 = vpop.f32.mrb[65].mxu0  ;;  %v1071_v3 = vadd.f32 %v2757_v56, %v1070_v63  ;;  %v2319_v0 = vpop.f32.mrb[65].mxu1 }
 0x188   : > { %v873_v4 = vpop.f32.mrb[66].mxu0  ;;  %v1073_v5 = vpop.f32.mrb[66].mxu1 }
 0x189   : > { %v1165_v6 = vmax.f32 %v871_v1, 0.0  ;;  %v874_v7 = vadd.f32 %v2757_v56, %v873_v4  ;;  %v2220_v8 = vpop.f32.mrb[67].mxu0  ;;  %v1215_v9 = vmax.f32 %v1071_v3, 0.0  ;;  %v1074_v10 = vadd.f32 %v2757_v56, %v1073_v5  ;;  %v2320_v11 = vpop.f32.mrb[67].mxu1 }
 0x18b   : > { %v2032_v12 = vpack.c.bf16 %v1165_v6, %v1165_v6  ;;  %v1166_v13 = vmax.f32 %v874_v7, 0.0  ;;  %v2082_v14 = vpack.c.bf16 %v1215_v9, %v1215_v9  ;;  %v1216_v15 = vmax.f32 %v1074_v10, 0.0 }
 0x18d   : > { %1656 = vst.msk [vmem:[%s2768_s15 + $0x80] sm:$0xf] %vm1623_vm4, %v2032_v12  ;;  %v2033_v16 = vpack.c.bf16 %v1166_v13, %v1166_v13  ;;  %1706 = vst.msk [vmem:[%s2768_s15 + $0x148] sm:$0xf] %vm1623_vm4, %v2082_v14  ;;  %v2083_v17 = vpack.c.bf16 %v1216_v15, %v1216_v15 }
 0x18e   : > { %v878_v18 = vpop.f32.mrb[68].mxu0  ;;  %v1078_v19 = vpop.f32.mrb[68].mxu1 }
 0x18f   : > { %1657 = vst.msk [vmem:[%s2768_s15 + $0x84] sm:$0xf] %vm1623_vm4, %v2033_v16  ;;  %1707 = vst.msk [vmem:[%s2768_s15 + $0x14c] sm:$0xf] %vm1623_vm4, %v2083_v17  ;;  %v879_v20 = vadd.f32 %v2757_v56, %v878_v18  ;;  %v2223_v21 = vpop.f32.mrb[69].mxu0  ;;  %v1079_v22 = vadd.f32 %v2757_v56, %v1078_v19  ;;  %v2323_v23 = vpop.f32.mrb[69].mxu1 }
 0x190   : > { %v881_v24 = vpop.f32.mrb[70].mxu0  ;;  %v1081_v25 = vpop.f32.mrb[70].mxu1 }
 0x191   : > { %v1167_v26 = vmax.f32 %v879_v20, 0.0  ;;  %v882_v27 = vadd.f32 %v2757_v56, %v881_v24  ;;  %v2224_v28 = vpop.f32.mrb[71].mxu0  ;;  %v1217_v29 = vmax.f32 %v1079_v22, 0.0  ;;  %v1082_v30 = vadd.f32 %v2757_v56, %v1081_v25  ;;  %v2324_v31 = vpop.f32.mrb[71].mxu1 }
 0x193   : > { %v2034_v32 = vpack.c.bf16 %v1167_v26, %v1167_v26  ;;  %v1168_v33 = vmax.f32 %v882_v27, 0.0  ;;  %v2084_v34 = vpack.c.bf16 %v1217_v29, %v1217_v29  ;;  %v1218_v35 = vmax.f32 %v1082_v30, 0.0 }
 0x195   : > { %1658 = vst.msk [vmem:[%s2768_s15 + $0x88] sm:$0xf] %vm1623_vm4, %v2034_v32  ;;  %v2035_v36 = vpack.c.bf16 %v1168_v33, %v1168_v33  ;;  %1708 = vst.msk [vmem:[%s2768_s15 + $0x150] sm:$0xf] %vm1623_vm4, %v2084_v34  ;;  %v2085_v37 = vpack.c.bf16 %v1218_v35, %v1218_v35 }
 0x196   : > { %v886_v38 = vpop.f32.mrb[72].mxu0  ;;  %v1086_v39 = vpop.f32.mrb[72].mxu1 }
 0x197   : > { %1659 = vst.msk [vmem:[%s2768_s15 + $0x8c] sm:$0xf] %vm1623_vm4, %v2035_v36  ;;  %1709 = vst.msk [vmem:[%s2768_s15 + $0x154] sm:$0xf] %vm1623_vm4, %v2085_v37  ;;  %v887_v40 = vadd.f32 %v2757_v56, %v886_v38  ;;  %v2227_v41 = vpop.f32.mrb[73].mxu0  ;;  %v1087_v42 = vadd.f32 %v2757_v56, %v1086_v39  ;;  %v2327_v43 = vpop.f32.mrb[73].mxu1 }
 0x198   : > { %v889_v44 = vpop.f32.mrb[74].mxu0  ;;  %v1089_v45 = vpop.f32.mrb[74].mxu1 }
 0x199   : > { %v1169_v46 = vmax.f32 %v887_v40, 0.0  ;;  %v890_v47 = vadd.f32 %v2757_v56, %v889_v44  ;;  %v2228_v48 = vpop.f32.mrb[75].mxu0  ;;  %v1219_v49 = vmax.f32 %v1087_v42, 0.0  ;;  %v1090_v50 = vadd.f32 %v2757_v56, %v1089_v45  ;;  %v2328_v51 = vpop.f32.mrb[75].mxu1  ;;  %v3020_v44 = vld [vmem:[#allocation2] ss:$0 sm:$0xff] }
 0x19b   : > { %v2036_v52 = vpack.c.bf16 %v1169_v46, %v1169_v46  ;;  %v1170_v53 = vmax.f32 %v890_v47, 0.0  ;;  %v2086_v54 = vpack.c.bf16 %v1219_v49, %v1219_v49  ;;  %v1220_v55 = vmax.f32 %v1090_v50, 0.0 }
 0x19d   : > { %1660 = vst.msk [vmem:[%s2768_s15 + $0x90] sm:$0xf] %vm1623_vm4, %v2036_v52  ;;  %v2037_v57 = vpack.c.bf16 %v1170_v53, %v1170_v53  ;;  %1710 = vst.msk [vmem:[%s2768_s15 + $0x158] sm:$0xf] %vm1623_vm4, %v2086_v54  ;;  %v2087_v58 = vpack.c.bf16 %v1220_v55, %v1220_v55 }
 0x19e   : > { %v894_v59 = vpop.f32.mrb[76].mxu0  ;;  %v1094_v60 = vpop.f32.mrb[76].mxu1 }
 0x19f   : > { %1661 = vst.msk [vmem:[%s2768_s15 + $0x94] sm:$0xf] %vm1623_vm4, %v2037_v57  ;;  %1711 = vst.msk [vmem:[%s2768_s15 + $0x15c] sm:$0xf] %vm1623_vm4, %v2087_v58  ;;  %v895_v61 = vadd.f32 %v2757_v56, %v894_v59  ;;  %v2231_v62 = vpop.f32.mrb[77].mxu0  ;;  %v1095_v63 = vadd.f32 %v2757_v56, %v1094_v60  ;;  %v2331_v1 = vpop.f32.mrb[77].mxu1 }
 0x1a0   : > { %v897_v2 = vpop.f32.mrb[78].mxu0  ;;  %v1097_v3 = vpop.f32.mrb[78].mxu1 }
 0x1a1   : > { %v1171_v0 = vmax.f32 %v895_v61, 0.0  ;;  %v898_v4 = vadd.f32 %v2757_v56, %v897_v2  ;;  %v2232_v5 = vpop.f32.mrb[79].mxu0  ;;  %v1221_v6 = vmax.f32 %v1095_v63, 0.0  ;;  %v1098_v7 = vadd.f32 %v2757_v56, %v1097_v3  ;;  %v2332_v8 = vpop.f32.mrb[79].mxu1 }
 0x1a3   : > { %v2038_v9 = vpack.c.bf16 %v1171_v0, %v1171_v0  ;;  %v1172_v10 = vmax.f32 %v898_v4, 0.0  ;;  %v2088_v11 = vpack.c.bf16 %v1221_v6, %v1221_v6  ;;  %v1222_v12 = vmax.f32 %v1098_v7, 0.0 }
 0x1a5   : > { %1662 = vst.msk [vmem:[%s2768_s15 + $0x98] sm:$0xf] %vm1623_vm4, %v2038_v9  ;;  %v2039_v13 = vpack.c.bf16 %v1172_v10, %v1172_v10  ;;  %1712 = vst.msk [vmem:[%s2768_s15 + $0x160] sm:$0xf] %vm1623_vm4, %v2088_v11  ;;  %v2089_v14 = vpack.c.bf16 %v1222_v12, %v1222_v12 }
 0x1a6   : > { %v902_v15 = vpop.f32.mrb[80].mxu0  ;;  %v1102_v16 = vpop.f32.mrb[80].mxu1 }
 0x1a7   : > { %1663 = vst.msk [vmem:[%s2768_s15 + $0x9c] sm:$0xf] %vm1623_vm4, %v2039_v13  ;;  %1713 = vst.msk [vmem:[%s2768_s15 + $0x164] sm:$0xf] %vm1623_vm4, %v2089_v14  ;;  %v903_v17 = vadd.f32 %v2757_v56, %v902_v15  ;;  %v2235_v18 = vpop.f32.mrb[81].mxu0  ;;  %v1103_v19 = vadd.f32 %v2757_v56, %v1102_v16  ;;  %v2335_v20 = vpop.f32.mrb[81].mxu1 }
 0x1a8   : > { %v905_v21 = vpop.f32.mrb[82].mxu0  ;;  %v1105_v22 = vpop.f32.mrb[82].mxu1 }
 0x1a9   : > { %v1173_v23 = vmax.f32 %v903_v17, 0.0  ;;  %v906_v24 = vadd.f32 %v2757_v56, %v905_v21  ;;  %v2236_v25 = vpop.f32.mrb[83].mxu0  ;;  %v1223_v26 = vmax.f32 %v1103_v19, 0.0  ;;  %v1106_v27 = vadd.f32 %v2757_v56, %v1105_v22  ;;  %v2336_v28 = vpop.f32.mrb[83].mxu1 }
 0x1ab   : > { %v2040_v29 = vpack.c.bf16 %v1173_v23, %v1173_v23  ;;  %v1174_v30 = vmax.f32 %v906_v24, 0.0  ;;  %v2090_v31 = vpack.c.bf16 %v1223_v26, %v1223_v26  ;;  %v1224_v32 = vmax.f32 %v1106_v27, 0.0 }
 0x1ad   : > { %1664 = vst.msk [vmem:[%s2768_s15 + $0xa0] sm:$0xf] %vm1623_vm4, %v2040_v29  ;;  %v2041_v33 = vpack.c.bf16 %v1174_v30, %v1174_v30  ;;  %1714 = vst.msk [vmem:[%s2768_s15 + $0x168] sm:$0xf] %vm1623_vm4, %v2090_v31  ;;  %v2091_v34 = vpack.c.bf16 %v1224_v32, %v1224_v32 }
 0x1ae   : > { %v910_v35 = vpop.f32.mrb[84].mxu0  ;;  %v1110_v36 = vpop.f32.mrb[84].mxu1 }
 0x1af   : > { %1665 = vst.msk [vmem:[%s2768_s15 + $0xa4] sm:$0xf] %vm1623_vm4, %v2041_v33  ;;  %1715 = vst.msk [vmem:[%s2768_s15 + $0x16c] sm:$0xf] %vm1623_vm4, %v2091_v34  ;;  %v911_v37 = vadd.f32 %v2757_v56, %v910_v35  ;;  %v2239_v38 = vpop.f32.mrb[85].mxu0  ;;  %v1111_v39 = vadd.f32 %v2757_v56, %v1110_v36  ;;  %v2339_v40 = vpop.f32.mrb[85].mxu1 }
 0x1b0   : > { %v913_v41 = vpop.f32.mrb[86].mxu0  ;;  %v1113_v42 = vpop.f32.mrb[86].mxu1 }
 0x1b1   : > { %v1175_v43 = vmax.f32 %v911_v37, 0.0  ;;  %v914_v45 = vadd.f32 %v3020_v44, %v913_v41  ;;  %v2240_v46 = vpop.f32.mrb[87].mxu0  ;;  %v1225_v47 = vmax.f32 %v1111_v39, 0.0  ;;  %v1114_v48 = vadd.f32 %v3020_v44, %v1113_v42  ;;  %v2340_v49 = vpop.f32.mrb[87].mxu1 }
 0x1b3   : > { %v2042_v50 = vpack.c.bf16 %v1175_v43, %v1175_v43  ;;  %v1176_v51 = vmax.f32 %v914_v45, 0.0  ;;  %v2092_v52 = vpack.c.bf16 %v1225_v47, %v1225_v47  ;;  %v1226_v56 = vmax.f32 %v1114_v48, 0.0 }
 0x1b5   : > { %1666 = vst.msk [vmem:[%s2768_s15 + $0xa8] sm:$0xf] %vm1623_vm4, %v2042_v50  ;;  %v2043_v53 = vpack.c.bf16 %v1176_v51, %v1176_v51  ;;  %1716 = vst.msk [vmem:[%s2768_s15 + $0x170] sm:$0xf] %vm1623_vm4, %v2092_v52  ;;  %v2093_v54 = vpack.c.bf16 %v1226_v56, %v1226_v56 }
 0x1b6   : > { %v918_v55 = vpop.f32.mrb[88].mxu0  ;;  %v1118_v57 = vpop.f32.mrb[88].mxu1 }
 0x1b7   : > { %1667 = vst.msk [vmem:[%s2768_s15 + $0xac] sm:$0xf] %vm1623_vm4, %v2043_v53  ;;  %1717 = vst.msk [vmem:[%s2768_s15 + $0x174] sm:$0xf] %vm1623_vm4, %v2093_v54  ;;  %v919_v58 = vadd.f32 %v3020_v44, %v918_v55  ;;  %v2243_v59 = vpop.f32.mrb[89].mxu0  ;;  %v1119_v60 = vadd.f32 %v3020_v44, %v1118_v57  ;;  %v2343_v61 = vpop.f32.mrb[89].mxu1 }
 0x1b8   : > { %v921_v62 = vpop.f32.mrb[90].mxu0  ;;  %v1121_v63 = vpop.f32.mrb[90].mxu1 }
 0x1b9   : > { %v1177_v1 = vmax.f32 %v919_v58, 0.0  ;;  %v922_v2 = vadd.f32 %v3020_v44, %v921_v62  ;;  %v2244_v3 = vpop.f32.mrb[91].mxu0  ;;  %v1227_v0 = vmax.f32 %v1119_v60, 0.0  ;;  %v1122_v4 = vadd.f32 %v3020_v44, %v1121_v63  ;;  %v2344_v5 = vpop.f32.mrb[91].mxu1 }
 0x1bb   : > { %v2044_v6 = vpack.c.bf16 %v1177_v1, %v1177_v1  ;;  %v1178_v7 = vmax.f32 %v922_v2, 0.0  ;;  %v2094_v8 = vpack.c.bf16 %v1227_v0, %v1227_v0  ;;  %v1228_v9 = vmax.f32 %v1122_v4, 0.0 }
 0x1bd   : > { %1668 = vst.msk [vmem:[%s2768_s15 + $0xb0] sm:$0xf] %vm1623_vm4, %v2044_v6  ;;  %v2045_v10 = vpack.c.bf16 %v1178_v7, %v1178_v7  ;;  %1718 = vst.msk [vmem:[%s2768_s15 + $0x178] sm:$0xf] %vm1623_vm4, %v2094_v8  ;;  %v2095_v11 = vpack.c.bf16 %v1228_v9, %v1228_v9 }
 0x1be   : > { %v926_v12 = vpop.f32.mrb[92].mxu0  ;;  %v1126_v13 = vpop.f32.mrb[92].mxu1 }
 0x1bf   : > { %1669 = vst.msk [vmem:[%s2768_s15 + $0xb4] sm:$0xf] %vm1623_vm4, %v2045_v10  ;;  %1719 = vst.msk [vmem:[%s2768_s15 + $0x17c] sm:$0xf] %vm1623_vm4, %v2095_v11  ;;  %v927_v14 = vadd.f32 %v3020_v44, %v926_v12  ;;  %v2247_v15 = vpop.f32.mrb[93].mxu0  ;;  %v1127_v16 = vadd.f32 %v3020_v44, %v1126_v13  ;;  %v2347_v17 = vpop.f32.mrb[93].mxu1 }
 0x1c0   : > { %v929_v18 = vpop.f32.mrb[94].mxu0  ;;  %v1129_v19 = vpop.f32.mrb[94].mxu1 }
 0x1c1   : > { %v1179_v20 = vmax.f32 %v927_v14, 0.0  ;;  %v930_v21 = vadd.f32 %v3020_v44, %v929_v18  ;;  %v2248_v22 = vpop.f32.mrb[95].mxu0  ;;  %v1229_v23 = vmax.f32 %v1127_v16, 0.0  ;;  %v1130_v24 = vadd.f32 %v3020_v44, %v1129_v19  ;;  %v2348_v25 = vpop.f32.mrb[95].mxu1 }
 0x1c3   : > { %v2046_v26 = vpack.c.bf16 %v1179_v20, %v1179_v20  ;;  %v1180_v27 = vmax.f32 %v930_v21, 0.0  ;;  %v2096_v28 = vpack.c.bf16 %v1229_v23, %v1229_v23  ;;  %v1230_v29 = vmax.f32 %v1130_v24, 0.0 }
 0x1c5   : > { %1670 = vst.msk [vmem:[%s2768_s15 + $0xb8] sm:$0xf] %vm1623_vm4, %v2046_v26  ;;  %v2047_v30 = vpack.c.bf16 %v1180_v27, %v1180_v27  ;;  %1720 = vst.msk [vmem:[%s2768_s15 + $0x180] sm:$0xf] %vm1623_vm4, %v2096_v28  ;;  %v2097_v31 = vpack.c.bf16 %v1230_v29, %v1230_v29 }
 0x1c6   : > { %v934_v32 = vpop.f32.mrb[96].mxu0 }
 0x1c7   : > { %1671 = vst.msk [vmem:[%s2768_s15 + $0xbc] sm:$0xf] %vm1623_vm4, %v2047_v30  ;;  %1721 = vst.msk [vmem:[%s2768_s15 + $0x184] sm:$0xf] %vm1623_vm4, %v2097_v31  ;;  %v935_v33 = vadd.f32 %v3020_v44, %v934_v32  ;;  %v2251_v34 = vpop.f32.mrb[97].mxu0 }
 0x1c8   : > { %v937_v35 = vpop.f32.mrb[98].mxu0 }
 0x1c9   : > { %v1181_v36 = vmax.f32 %v935_v33, 0.0  ;;  %v938_v37 = vadd.f32 %v3020_v44, %v937_v35  ;;  %v2252_v38 = vpop.f32.mrb[99].mxu0 }
 0x1cb   : > { %v2048_v39 = vpack.c.bf16 %v1181_v36, %v1181_v36  ;;  %v1182_v40 = vmax.f32 %v938_v37, 0.0 }
 0x1cd   : > { %1672 = vst.msk [vmem:[%s2768_s15 + $0xc0] sm:$0xf] %vm1623_vm4, %v2048_v39  ;;  %v2049_v41 = vpack.c.bf16 %v1182_v40, %v1182_v40 }
 0x1cf   : > { %1673 = vst.msk [vmem:[%s2768_s15 + $0xc4] sm:$0xf] %vm1623_vm4, %v2049_v41 }
 0x1d0 PF: > { %s14_s12 = sadd.s32 1, %s2465_s12  }
 0x1d1   : > { %p11_p3 = scmp.ge.s32.totalorder %s14_s12, 4  }
 0x1d3   :  { %13 = sbr.rel (!%p11_p3) target bundleno = 1 (0x1), region = 67 }
 0x1da   :  { %1744 = vsyncpa [#allocation3], 1 }
 0x1db   :  { %1746 = vsyncpa [#allocation3 + $0x1], 1 }

// kernel: lenet_forward.4
= control target key start
LH: loop header
LB: loop body
LE: loop exit
PB: predicated region body
PF: predicated region fallthrough
CT: control target
= control target key end

     0   :  { %v2220_v0 = vmov 0   ;;  %vm841_vm0 = vcmask 949248   ;;  %vm917_vm1 = vcmask 1041408   ;;  %vm1631_vm2 = vcmask 404480   ;;  %s2938_s1 = inlined_call_operand.vmem [shape: bf16[500,50], index: 1, kind: input, shape index: {}]   ;;  %s2939_s0 = inlined_call_operand.vmem [shape: bf16[392,500], index: 0, kind: input, shape index: {}]   ;;  %s2940_s2 = inlined_call_operand.vmem [shape: f32[1,50], index: 2, kind: input, shape index: {}]   ;;  %s2941_s3 = inlined_call_operand.vmem [shape: bf16[392,50], index: 3, kind: output, shape index: {}]  }
   0x1   :  { %921 = vmatprep.subr.bf16.mxu1 %v2220_v0  ;;  %1153 = vmatprep.subr.bf16.mxu0 %v2220_v0  ;;  %v2040_v1 = vld [vmem:[%s2938_s1] sm:$0xff]   ;;  %v2042_v3 = vld [vmem:[%s2938_s1 + $0x8] sm:$0xff]   ;;  %v2044_v5 = vld [vmem:[%s2938_s1 + $0x10] sm:$0xff]  }
   0x2   :  { %v2041_v2 = vld [vmem:[%s2938_s1 + $0x80] sm:$0xff]   ;;  %922 = vmatpush1.bf16.msra.mxu1 %v2040_v1  ;;  %v2043_v4 = vld [vmem:[%s2938_s1 + $0x88] sm:$0xff]   ;;  %v2045_v6 = vld [vmem:[%s2938_s1 + $0x90] sm:$0xff]  }
   0x3   :  { %1154 = vmatpush1.bf16.msra.mxu0 %v2041_v2  ;;  %923 = vmatprep.subr.bf16.mxu1 %v2220_v0  ;;  %v2046_v7 = vld [vmem:[%s2938_s1 + $0x18] sm:$0xff]   ;;  %v2048_v9 = vld [vmem:[%s2938_s1 + $0x20] sm:$0xff]   ;;  %v2050_v11 = vld [vmem:[%s2938_s1 + $0x28] sm:$0xff]  }
   0x4   :  { %1155 = vmatprep.subr.bf16.mxu0 %v2220_v0  ;;  %v2047_v8 = vld [vmem:[%s2938_s1 + $0x98] sm:$0xff]   ;;  %v2049_v10 = vld [vmem:[%s2938_s1 + $0xa0] sm:$0xff]   ;;  %v2051_v12 = vld [vmem:[%s2938_s1 + $0xa8] sm:$0xff]  }
   0x5   :  { %v2052_v13 = vld [vmem:[%s2938_s1 + $0x30] sm:$0xff]   ;;  %v2054_v15 = vld [vmem:[%s2938_s1 + $0x38] sm:$0xff]   ;;  %v2056_v17 = vld [vmem:[%s2938_s1 + $0x40] sm:$0xff]  }
   0x6   :  { %924 = vmatpush1.bf16.msra.mxu1 %v2042_v3  ;;  %v2053_v14 = vld [vmem:[%s2938_s1 + $0xb0] sm:$0xff]   ;;  %v2055_v16 = vld [vmem:[%s2938_s1 + $0xb8] sm:$0xff]   ;;  %v2057_v18 = vld [vmem:[%s2938_s1 + $0xc0] sm:$0xff]  }
   0x7   :  { %1156 = vmatpush1.bf16.msra.mxu0 %v2043_v4  ;;  %925 = vmatprep.subr.bf16.mxu1 %v2220_v0  ;;  %v2074_v19 = vld [vmem:[%s2939_s0 + $0x4] ss:$16 sps:$4 sm:$0xff]   ;;  %v2058_v20 = vld [vmem:[%s2938_s1 + $0x48] sm:$0xff]   ;;  %v2062_v25 = vld [vmem:[%s2938_s1 + $0x58] sm:$0xff]  }
   0x8   :  { %1157 = vmatprep.subr.bf16.mxu0 %v2220_v0  ;;  %953 = vmatprep.mubr.bf16.mxu1 %v2074_v19  ;;  %v2077_v21 = vld [vmem:[%s2939_s0 + $0xc] ss:$16 sps:$4 sm:$0xff]   ;;  %v2060_v23 = vld [vmem:[%s2938_s1 + $0x50] sm:$0xff]   ;;  %v2064_v27 = vld [vmem:[%s2938_s1 + $0x60] sm:$0xff]  }
   0x9   :  { %v2059_v22 = vld [vmem:[%s2938_s1 + $0xc8] sm:$0xff]   ;;  %1818 = vmatprep.mubr.msk.bf16.mxu0 %vm841_vm0, %v2077_v21  ;;  %v2061_v24 = vld [vmem:[%s2938_s1 + $0xd0] sm:$0xff]   ;;  %v2063_v26 = vld [vmem:[%s2938_s1 + $0xd8] sm:$0xff]  }
   0xa   :  { %926 = vmatpush1.bf16.msra.mxu1 %v2044_v5  ;;  %v2065_v28 = vld [vmem:[%s2938_s1 + $0xe0] sm:$0xff]   ;;  %v2066_v29 = vld [vmem:[%s2938_s1 + $0x68] sm:$0xff]   ;;  %v2068_v31 = vld [vmem:[%s2938_s1 + $0x70] sm:$0xff]  }
   0xb   :  { %1158 = vmatpush1.bf16.msra.mxu0 %v2045_v6  ;;  %927 = vmatprep.subr.bf16.mxu1 %v2220_v0  ;;  %v2067_v30 = vld [vmem:[%s2938_s1 + $0xe8] sm:$0xff]   ;;  %v2069_v32 = vld [vmem:[%s2938_s1 + $0xf0] sm:$0xff]   ;;  %v2071_v33 = vld [vmem:[%s2938_s1 + $0xf8] ss:$0 sps:$4 sm:$0x33]  }
   0xc   :  { %1159 = vmatprep.subr.bf16.mxu0 %v2220_v0  ;;  %v2070_v34 = vld [vmem:[%s2938_s1 + $0x78] sm:$0xff]   ;;  %v919_v35 = vsel %vm917_vm1, %v2071_v33, 0  ;;  %v2072_v36 = vld [vmem:[%s2939_s0] ss:$16 sps:$4 sm:$0xff]   ;;  %v2078_v38 = vld [vmem:[%s2939_s0 + $0x24] ss:$16 sps:$4 sm:$0xff]  }
   0xd   :  { %v2075_v37 = vld [vmem:[%s2939_s0 + $0x8] ss:$16 sps:$4 sm:$0xff]   ;;  %v2080_v39 = vld [vmem:[%s2939_s0 + $0x2c] ss:$16 sps:$4 sm:$0xff]   ;;  %v2082_v40 = vld [vmem:[%s2939_s0 + $0x20] ss:$16 sps:$4 sm:$0xff]  }
   0xe   :  { %928 = vmatpush1.bf16.msra.mxu1 %v2046_v7  ;;  %v2083_v41 = vld [vmem:[%s2939_s0 + $0x28] ss:$16 sps:$4 sm:$0xff]   ;;  %v2084_v42 = vld [vmem:[%s2939_s0 + $0x44] ss:$16 sps:$4 sm:$0xff]   ;;  %v2086_v43 = vld [vmem:[%s2939_s0 + $0x4c] ss:$16 sps:$4 sm:$0xff]  }
   0xf   :  { %1160 = vmatpush1.bf16.msra.mxu0 %v2047_v8  ;;  %929 = vmatprep.subr.bf16.mxu1 %v2220_v0  ;;  %v2088_v44 = vld [vmem:[%s2939_s0 + $0x40] ss:$16 sps:$4 sm:$0xff]   ;;  %v2089_v45 = vld [vmem:[%s2939_s0 + $0x48] ss:$16 sps:$4 sm:$0xff]   ;;  %v2090_v46 = vld [vmem:[%s2939_s0 + $0x64] ss:$16 sps:$4 sm:$0xff]  }
  0x10   :  { %1161 = vmatprep.subr.bf16.mxu0 %v2220_v0  ;;  %v2092_v47 = vld [vmem:[%s2939_s0 + $0x6c] ss:$16 sps:$4 sm:$0xff]   ;;  %v2094_v48 = vld [vmem:[%s2939_s0 + $0x60] ss:$16 sps:$4 sm:$0xff]   ;;  %v2095_v49 = vld [vmem:[%s2939_s0 + $0x68] ss:$16 sps:$4 sm:$0xff]  }
  0x11   :  { %v2096_v50 = vld [vmem:[%s2939_s0 + $0x84] ss:$16 sps:$4 sm:$0xff]   ;;  %v2098_v51 = vld [vmem:[%s2939_s0 + $0x8c] ss:$16 sps:$4 sm:$0xff]   ;;  %v2100_v52 = vld [vmem:[%s2939_s0 + $0x80] ss:$16 sps:$4 sm:$0xff]  }
  0x12   :  { %930 = vmatpush1.bf16.msra.mxu1 %v2048_v9  ;;  %v2101_v53 = vld [vmem:[%s2939_s0 + $0x88] ss:$16 sps:$4 sm:$0xff]   ;;  %v2102_v54 = vld [vmem:[%s2939_s0 + $0xa4] ss:$16 sps:$4 sm:$0xff]   ;;  %v2104_v55 = vld [vmem:[%s2939_s0 + $0xac] ss:$16 sps:$4 sm:$0xff]  }
  0x13   :  { %1162 = vmatpush1.bf16.msra.mxu0 %v2049_v10  ;;  %931 = vmatprep.subr.bf16.mxu1 %v2220_v0  ;;  %v2106_v56 = vld [vmem:[%s2939_s0 + $0xa0] ss:$16 sps:$4 sm:$0xff]   ;;  %v2107_v57 = vld [vmem:[%s2939_s0 + $0xa8] ss:$16 sps:$4 sm:$0xff]   ;;  %v2108_v58 = vld [vmem:[%s2939_s0 + $0xc4] ss:$16 sps:$4 sm:$0xff]  }
  0x14   :  { %1163 = vmatprep.subr.bf16.mxu0 %v2220_v0  ;;  %v2110_v59 = vld [vmem:[%s2939_s0 + $0xcc] ss:$16 sps:$4 sm:$0xff]   ;;  %v2112_v60 = vld [vmem:[%s2939_s0 + $0xc0] ss:$16 sps:$4 sm:$0xff]   ;;  %v2113_v61 = vld [vmem:[%s2939_s0 + $0xc8] ss:$16 sps:$4 sm:$0xff]  }
  0x15   :  { %v2114_v62 = vld [vmem:[%s2939_s0 + $0xe4] ss:$16 sps:$4 sm:$0xff]   ;;  %v2116_v63 = vld [vmem:[%s2939_s0 + $0xec] ss:$16 sps:$4 sm:$0xff]   ;;  %v2119_v1 = vld [vmem:[%s2939_s0 + $0xe8] ss:$16 sps:$4 sm:$0xff]  }
  0x16   :  { %932 = vmatpush1.bf16.msra.mxu1 %v2050_v11  ;;  %v2120_v2 = vld [vmem:[%s2939_s0 + $0x104] ss:$16 sps:$4 sm:$0xff]   ;;  %v2122_v3 = vld [vmem:[%s2939_s0 + $0x10c] ss:$16 sps:$4 sm:$0xff]   ;;  %v2124_v4 = vld [vmem:[%s2939_s0 + $0x100] ss:$16 sps:$4 sm:$0xff]  }
  0x17   :  { %1164 = vmatpush1.bf16.msra.mxu0 %v2051_v12  ;;  %933 = vmatprep.subr.bf16.mxu1 %v2220_v0  ;;  %v2125_v5 = vld [vmem:[%s2939_s0 + $0x108] ss:$16 sps:$4 sm:$0xff]   ;;  %v2126_v6 = vld [vmem:[%s2939_s0 + $0x124] ss:$16 sps:$4 sm:$0xff]   ;;  %v2128_v7 = vld [vmem:[%s2939_s0 + $0x12c] ss:$16 sps:$4 sm:$0xff]  }
  0x18   :  { %1165 = vmatprep.subr.bf16.mxu0 %v2220_v0  ;;  %v2130_v8 = vld [vmem:[%s2939_s0 + $0x120] ss:$16 sps:$4 sm:$0xff]   ;;  %v2131_v9 = vld [vmem:[%s2939_s0 + $0x128] ss:$16 sps:$4 sm:$0xff]   ;;  %v2132_v10 = vld [vmem:[%s2939_s0 + $0x144] ss:$16 sps:$4 sm:$0xff]  }
  0x19   :  { %v2134_v11 = vld [vmem:[%s2939_s0 + $0x14c] ss:$16 sps:$4 sm:$0xff]   ;;  %v2136_v12 = vld [vmem:[%s2939_s0 + $0x140] ss:$16 sps:$4 sm:$0xff]   ;;  %v2149_v21 = vld [vmem:[%s2939_s0 + $0x188] ss:$16 sps:$4 sm:$0xff]  }
  0x1a   :  { %934 = vmatpush1.bf16.msra.mxu1 %v2052_v13  ;;  %v2137_v13 = vld [vmem:[%s2939_s0 + $0x148] ss:$16 sps:$4 sm:$0xff]   ;;  %v2146_v19 = vld [vmem:[%s2939_s0 + $0x18c] ss:$16 sps:$4 sm:$0xff]  }
  0x1b   :  { %1166 = vmatpush1.bf16.msra.mxu0 %v2053_v14  ;;  %935 = vmatprep.subr.bf16.mxu1 %v2220_v0  ;;  %v2138_v14 = vld [vmem:[%s2939_s0 + $0x164] ss:$16 sps:$4 sm:$0xff]   ;;  %v2167_v33 = vld [vmem:[%s2939_s0 + $0x1e8] ss:$16 sps:$4 sm:$0xff]  }
  0x1c   :  { %1167 = vmatprep.subr.bf16.mxu0 %v2220_v0 }
  0x1e   :  { %936 = vmatpush1.bf16.msra.mxu1 %v2054_v15  ;;  %v2140_v15 = vld [vmem:[%s2939_s0 + $0x16c] ss:$16 sps:$4 sm:$0xff]  }
  0x1f   :  { %1168 = vmatpush1.bf16.msra.mxu0 %v2055_v16  ;;  %937 = vmatprep.subr.bf16.mxu1 %v2220_v0  ;;  %v2142_v16 = vld [vmem:[%s2939_s0 + $0x160] ss:$16 sps:$4 sm:$0xff]  }
  0x20   :  { %1169 = vmatprep.subr.bf16.mxu0 %v2220_v0 }
  0x22   :  { %938 = vmatpush1.bf16.msra.mxu1 %v2056_v17  ;;  %v2143_v17 = vld [vmem:[%s2939_s0 + $0x168] ss:$16 sps:$4 sm:$0xff]  }
  0x23   :  { %1170 = vmatpush1.bf16.msra.mxu0 %v2057_v18  ;;  %939 = vmatprep.subr.bf16.mxu1 %v2220_v0  ;;  %v2144_v18 = vld [vmem:[%s2939_s0 + $0x184] ss:$16 sps:$4 sm:$0xff]  }
  0x24   :  { %1171 = vmatprep.subr.bf16.mxu0 %v2220_v0 }
  0x26   :  { %940 = vmatpush1.bf16.msra.mxu1 %v2058_v20  ;;  %v2148_v20 = vld [vmem:[%s2939_s0 + $0x180] ss:$16 sps:$4 sm:$0xff]  }
  0x27   :  { %1172 = vmatpush1.bf16.msra.mxu0 %v2059_v22  ;;  %941 = vmatprep.subr.bf16.mxu1 %v2220_v0  ;;  %v2150_v22 = vld [vmem:[%s2939_s0 + $0x1a4] ss:$16 sps:$4 sm:$0xff]  }
  0x28   :  { %1173 = vmatprep.subr.bf16.mxu0 %v2220_v0 }
  0x2a   :  { %942 = vmatpush1.bf16.msra.mxu1 %v2060_v23  ;;  %v2152_v23 = vld [vmem:[%s2939_s0 + $0x1ac] ss:$16 sps:$4 sm:$0xff]  }
  0x2b   :  { %1174 = vmatpush1.bf16.msra.mxu0 %v2061_v24  ;;  %943 = vmatprep.subr.bf16.mxu1 %v2220_v0  ;;  %v2154_v24 = vld [vmem:[%s2939_s0 + $0x1a0] ss:$16 sps:$4 sm:$0xff]  }
  0x2c   :  { %1175 = vmatprep.subr.bf16.mxu0 %v2220_v0 }
  0x2e   :  { %944 = vmatpush1.bf16.msra.mxu1 %v2062_v25  ;;  %v2155_v25 = vld [vmem:[%s2939_s0 + $0x1a8] ss:$16 sps:$4 sm:$0xff]  }
  0x2f   :  { %1176 = vmatpush1.bf16.msra.mxu0 %v2063_v26  ;;  %945 = vmatprep.subr.bf16.mxu1 %v2220_v0  ;;  %v2156_v26 = vld [vmem:[%s2939_s0 + $0x1c4] ss:$16 sps:$4 sm:$0xff]  }
  0x30   :  { %1177 = vmatprep.subr.bf16.mxu0 %v2220_v0 }
  0x32   :  { %946 = vmatpush1.bf16.msra.mxu1 %v2064_v27  ;;  %v2158_v27 = vld [vmem:[%s2939_s0 + $0x1cc] ss:$16 sps:$4 sm:$0xff]  }
  0x33   :  { %1178 = vmatpush1.bf16.msra.mxu0 %v2065_v28  ;;  %947 = vmatprep.subr.bf16.mxu1 %v2220_v0  ;;  %v2160_v28 = vld [vmem:[%s2939_s0 + $0x1c0] ss:$16 sps:$4 sm:$0xff]  }
  0x34   :  { %1179 = vmatprep.subr.bf16.mxu0 %v2220_v0 }
  0x36   :  { %948 = vmatpush1.bf16.msra.mxu1 %v2066_v29  ;;  %v2161_v29 = vld [vmem:[%s2939_s0 + $0x1c8] ss:$16 sps:$4 sm:$0xff]  }
  0x37   :  { %1180 = vmatpush1.bf16.msra.mxu0 %v2067_v30  ;;  %949 = vmatprep.subr.bf16.mxu1 %v2220_v0  ;;  %v2162_v30 = vld [vmem:[%s2939_s0 + $0x1e4] ss:$16 sps:$4 sm:$0xff]  }
  0x38   :  { %1181 = vmatprep.subr.bf16.mxu0 %v2220_v0 }
  0x3a   :  { %950 = vmatpush1.bf16.msra.mxu1 %v2068_v31  ;;  %v2164_v31 = vld [vmem:[%s2939_s0 + $0x1ec] ss:$16 sps:$4 sm:$0xff]  }
  0x3b   :  { %1182 = vmatpush1.bf16.msra.mxu0 %v2069_v32  ;;  %951 = vmatprep.subr.bf16.mxu1 %v2220_v0  ;;  %v2166_v32 = vld [vmem:[%s2939_s0 + $0x1e0] ss:$16 sps:$4 sm:$0xff]  }
  0x3c   :  { %1183 = vmatprep.subr.bf16.mxu0 %v2220_v0  ;;  %v2118_v0 = vld [vmem:[%s2939_s0 + $0xe0] ss:$16 sps:$4 sm:$0xff]  }
  0x3e   :  { %952 = vmatpush1.bf16.msra.mxu1 %v2070_v34  ;;  %v2168_v34 = vld [vmem:[%s2939_s0 + $0x204] ss:$16 sps:$4 sm:$0xff]  }
  0x3f   :  { %1184 = vmatpush1.bf16.msra.mxu0 %v919_v35  ;;  %v2170_v35 = vld [vmem:[%s2939_s0 + $0x20c] ss:$16 sps:$4 sm:$0xff]  }
  0x41   :  { %954 = vmatmul.mubr.bf16.vlgmr.msra.gmra.mrb[0].mxu1 %v2072_v36  ;;  %v2172_v36 = vld [vmem:[%s2939_s0 + $0x200] ss:$16 sps:$4 sm:$0xff]  }
  0x42   :  { %1186 = vmatmul.mubr.bf16.vlgmr.msra.gmra.mrb[0].mxu0 %v2075_v37  ;;  %961 = vmatprep.mubr.bf16.mxu1 %v2078_v38  ;;  %v2173_v37 = vld [vmem:[%s2939_s0 + $0x208] ss:$16 sps:$4 sm:$0xff]   ;;  %v2174_v38 = vld [vmem:[%s2939_s0 + $0x224] ss:$16 sps:$4 sm:$0xff]  }
  0x43   :  { %1819 = vmatprep.mubr.msk.bf16.mxu0 %vm841_vm0, %v2080_v39  ;;  %v2176_v39 = vld [vmem:[%s2939_s0 + $0x22c] ss:$16 sps:$4 sm:$0xff]  }
  0x49   :  { %962 = vmatmul.mubr.bf16.gmra.mrb[4].mxu1 %v2082_v40  ;;  %v2178_v40 = vld [vmem:[%s2939_s0 + $0x220] ss:$16 sps:$4 sm:$0xff]  }
  0x4a   :  { %1194 = vmatmul.mubr.bf16.gmra.mrb[4].mxu0 %v2083_v41  ;;  %969 = vmatprep.mubr.bf16.mxu1 %v2084_v42  ;;  %v2179_v41 = vld [vmem:[%s2939_s0 + $0x228] ss:$16 sps:$4 sm:$0xff]   ;;  %v2180_v42 = vld [vmem:[%s2939_s0 + $0x244] ss:$16 sps:$4 sm:$0xff]  }
  0x4b   :  { %1820 = vmatprep.mubr.msk.bf16.mxu0 %vm841_vm0, %v2086_v43  ;;  %v2182_v43 = vld [vmem:[%s2939_s0 + $0x24c] ss:$16 sps:$4 sm:$0xff]  }
  0x51   :  { %970 = vmatmul.mubr.bf16.gmra.mrb[8].mxu1 %v2088_v44  ;;  %v2184_v44 = vld [vmem:[%s2939_s0 + $0x240] ss:$16 sps:$4 sm:$0xff]  }
  0x52   :  { %1202 = vmatmul.mubr.bf16.gmra.mrb[8].mxu0 %v2089_v45  ;;  %977 = vmatprep.mubr.bf16.mxu1 %v2090_v46  ;;  %v2185_v45 = vld [vmem:[%s2939_s0 + $0x248] ss:$16 sps:$4 sm:$0xff]   ;;  %v2186_v46 = vld [vmem:[%s2939_s0 + $0x264] ss:$16 sps:$4 sm:$0xff]  }
  0x53   :  { %1821 = vmatprep.mubr.msk.bf16.mxu0 %vm841_vm0, %v2092_v47  ;;  %v2188_v47 = vld [vmem:[%s2939_s0 + $0x26c] ss:$16 sps:$4 sm:$0xff]  }
  0x59   :  { %978 = vmatmul.mubr.bf16.gmra.mrb[12].mxu1 %v2094_v48  ;;  %v2190_v48 = vld [vmem:[%s2939_s0 + $0x260] ss:$16 sps:$4 sm:$0xff]  }
  0x5a   :  { %1210 = vmatmul.mubr.bf16.gmra.mrb[12].mxu0 %v2095_v49  ;;  %985 = vmatprep.mubr.bf16.mxu1 %v2096_v50  ;;  %v2191_v49 = vld [vmem:[%s2939_s0 + $0x268] ss:$16 sps:$4 sm:$0xff]   ;;  %v2192_v50 = vld [vmem:[%s2939_s0 + $0x284] ss:$16 sps:$4 sm:$0xff]  }
  0x5b   :  { %1822 = vmatprep.mubr.msk.bf16.mxu0 %vm841_vm0, %v2098_v51  ;;  %v2194_v51 = vld [vmem:[%s2939_s0 + $0x28c] ss:$16 sps:$4 sm:$0xff]  }
  0x61   :  { %986 = vmatmul.mubr.bf16.gmra.mrb[16].mxu1 %v2100_v52  ;;  %v2196_v52 = vld [vmem:[%s2939_s0 + $0x280] ss:$16 sps:$4 sm:$0xff]  }
  0x62   :  { %1218 = vmatmul.mubr.bf16.gmra.mrb[16].mxu0 %v2101_v53  ;;  %993 = vmatprep.mubr.bf16.mxu1 %v2102_v54  ;;  %v2197_v53 = vld [vmem:[%s2939_s0 + $0x288] ss:$16 sps:$4 sm:$0xff]   ;;  %v2198_v54 = vld [vmem:[%s2939_s0 + $0x2a4] ss:$16 sps:$4 sm:$0xff]  }
  0x63   :  { %1823 = vmatprep.mubr.msk.bf16.mxu0 %vm841_vm0, %v2104_v55  ;;  %v2200_v55 = vld [vmem:[%s2939_s0 + $0x2ac] ss:$16 sps:$4 sm:$0xff]  }
  0x69   :  { %994 = vmatmul.mubr.bf16.gmra.mrb[20].mxu1 %v2106_v56  ;;  %v2202_v56 = vld [vmem:[%s2939_s0 + $0x2a0] ss:$16 sps:$4 sm:$0xff]  }
  0x6a   :  { %1226 = vmatmul.mubr.bf16.gmra.mrb[20].mxu0 %v2107_v57  ;;  %1001 = vmatprep.mubr.bf16.mxu1 %v2108_v58  ;;  %v2203_v57 = vld [vmem:[%s2939_s0 + $0x2a8] ss:$16 sps:$4 sm:$0xff]   ;;  %v2204_v58 = vld [vmem:[%s2939_s0 + $0x2c4] ss:$16 sps:$4 sm:$0xff]  }
  0x6b   :  { %1824 = vmatprep.mubr.msk.bf16.mxu0 %vm841_vm0, %v2110_v59  ;;  %v2206_v59 = vld [vmem:[%s2939_s0 + $0x2cc] ss:$16 sps:$4 sm:$0xff]  }
  0x71   :  { %1002 = vmatmul.mubr.bf16.gmra.mrb[24].mxu1 %v2112_v60  ;;  %v2208_v60 = vld [vmem:[%s2939_s0 + $0x2c0] ss:$16 sps:$4 sm:$0xff]  }
  0x72   :  { %1234 = vmatmul.mubr.bf16.gmra.mrb[24].mxu0 %v2113_v61  ;;  %1009 = vmatprep.mubr.bf16.mxu1 %v2114_v62  ;;  %v2209_v61 = vld [vmem:[%s2939_s0 + $0x2c8] ss:$16 sps:$4 sm:$0xff]   ;;  %v2210_v62 = vld [vmem:[%s2939_s0 + $0x2e4] ss:$16 sps:$4 sm:$0xff]  }
  0x73   :  { %1825 = vmatprep.mubr.msk.bf16.mxu0 %vm841_vm0, %v2116_v63  ;;  %v2212_v63 = vld [vmem:[%s2939_s0 + $0x2ec] ss:$16 sps:$4 sm:$0xff]  }
  0x79   :  { %1010 = vmatmul.mubr.bf16.gmra.mrb[28].mxu1 %v2118_v0  ;;  %v111_v0 = vld [vmem:[%s2939_s0 + $0x300] sm:$0xff] }
  0x7a   :  { %1242 = vmatmul.mubr.bf16.gmra.mrb[28].mxu0 %v2119_v1  ;;  %1017 = vmatprep.mubr.bf16.mxu1 %v2120_v2  ;;  %v112_v1 = vld [vmem:[%s2939_s0 + $0x308] sm:$0xff]  ;;  %v2214_v2 = vld [vmem:[%s2939_s0 + $0x2e0] ss:$16 sps:$4 sm:$0xff]  }
  0x7b   :  { %1826 = vmatprep.mubr.msk.bf16.mxu0 %vm841_vm0, %v2122_v3  ;;  %v2215_v3 = vld [vmem:[%s2939_s0 + $0x2e8] ss:$16 sps:$4 sm:$0xff]  }
  0x81   :  { %1018 = vmatmul.mubr.bf16.gmra.mrb[32].mxu1 %v2124_v4  ;;  %v1783_v4 = vcombine.high %v111_v0, %v111_v0 }
  0x82   :  { %1250 = vmatmul.mubr.bf16.gmra.mrb[32].mxu0 %v2125_v5  ;;  %1025 = vmatprep.mubr.bf16.mxu1 %v2126_v6  ;;  %v1785_v5 = vcombine.high %v112_v1, %v112_v1  ;;  %v1782_v6 = vcombine.low %v111_v0, %v111_v0 }
  0x83   :  { %1827 = vmatprep.mubr.msk.bf16.mxu0 %vm841_vm0, %v2128_v7  ;;  %v1784_v7 = vcombine.low %v112_v1, %v112_v1 }
  0x89   :  { %1026 = vmatmul.mubr.bf16.gmra.mrb[36].mxu1 %v2130_v8  ;;  %v2691_v8 = vld [vmem:[%s2940_s2] ss:$0 sm:$0xff] }
  0x8a   :  { %1258 = vmatmul.mubr.bf16.gmra.mrb[36].mxu0 %v2131_v9  ;;  %1033 = vmatprep.mubr.bf16.mxu1 %v2132_v10 }
  0x8b   :  { %1828 = vmatprep.mubr.msk.bf16.mxu0 %vm841_vm0, %v2134_v11 }
  0x91   :  { %1034 = vmatmul.mubr.bf16.gmra.mrb[40].mxu1 %v2136_v12 }
  0x92   :  { %1266 = vmatmul.mubr.bf16.gmra.mrb[40].mxu0 %v2137_v13  ;;  %1041 = vmatprep.mubr.bf16.mxu1 %v2138_v14 }
  0x93   :  { %1829 = vmatprep.mubr.msk.bf16.mxu0 %vm841_vm0, %v2140_v15 }
  0x99   :  { %1042 = vmatmul.mubr.bf16.gmra.mrb[44].mxu1 %v2142_v16 }
  0x9a   :  { %1274 = vmatmul.mubr.bf16.gmra.mrb[44].mxu0 %v2143_v17  ;;  %1049 = vmatprep.mubr.bf16.mxu1 %v2144_v18 }
  0x9b   :  { %1830 = vmatprep.mubr.msk.bf16.mxu0 %vm841_vm0, %v2146_v19 }
  0xa1   :  { %1050 = vmatmul.mubr.bf16.gmra.mrb[48].mxu1 %v2148_v20 }
  0xa2   :  { %1282 = vmatmul.mubr.bf16.gmra.mrb[48].mxu0 %v2149_v21  ;;  %1057 = vmatprep.mubr.bf16.mxu1 %v2150_v22 }
  0xa3   :  { %1831 = vmatprep.mubr.msk.bf16.mxu0 %vm841_vm0, %v2152_v23 }
  0xa9   :  { %1058 = vmatmul.mubr.bf16.gmra.mrb[52].mxu1 %v2154_v24 }
  0xaa   :  { %1290 = vmatmul.mubr.bf16.gmra.mrb[52].mxu0 %v2155_v25  ;;  %1065 = vmatprep.mubr.bf16.mxu1 %v2156_v26 }
  0xab   :  { %1832 = vmatprep.mubr.msk.bf16.mxu0 %vm841_vm0, %v2158_v27 }
  0xb1   :  { %1066 = vmatmul.mubr.bf16.gmra.mrb[56].mxu1 %v2160_v28 }
  0xb2   :  { %1298 = vmatmul.mubr.bf16.gmra.mrb[56].mxu0 %v2161_v29  ;;  %1073 = vmatprep.mubr.bf16.mxu1 %v2162_v30 }
  0xb3   :  { %1833 = vmatprep.mubr.msk.bf16.mxu0 %vm841_vm0, %v2164_v31 }
  0xb9   :  { %1074 = vmatmul.mubr.bf16.gmra.mrb[60].mxu1 %v2166_v32 }
  0xba   :  { %1306 = vmatmul.mubr.bf16.gmra.mrb[60].mxu0 %v2167_v33  ;;  %1081 = vmatprep.mubr.bf16.mxu1 %v2168_v34 }
  0xbb   :  { %1834 = vmatprep.mubr.msk.bf16.mxu0 %vm841_vm0, %v2170_v35 }
  0xc1   :  { %1082 = vmatmul.mubr.bf16.gmra.mrb[64].mxu1 %v2172_v36 }
  0xc2   :  { %1314 = vmatmul.mubr.bf16.gmra.mrb[64].mxu0 %v2173_v37  ;;  %1089 = vmatprep.mubr.bf16.mxu1 %v2174_v38 }
  0xc3   :  { %1835 = vmatprep.mubr.msk.bf16.mxu0 %vm841_vm0, %v2176_v39 }
  0xc9   :  { %1090 = vmatmul.mubr.bf16.gmra.mrb[68].mxu1 %v2178_v40 }
  0xca   :  { %1322 = vmatmul.mubr.bf16.gmra.mrb[68].mxu0 %v2179_v41  ;;  %1097 = vmatprep.mubr.bf16.mxu1 %v2180_v42 }
  0xcb   :  { %1836 = vmatprep.mubr.msk.bf16.mxu0 %vm841_vm0, %v2182_v43 }
  0xd1   :  { %1098 = vmatmul.mubr.bf16.gmra.mrb[72].mxu1 %v2184_v44 }
  0xd2   :  { %1330 = vmatmul.mubr.bf16.gmra.mrb[72].mxu0 %v2185_v45  ;;  %1105 = vmatprep.mubr.bf16.mxu1 %v2186_v46 }
  0xd3   :  { %1837 = vmatprep.mubr.msk.bf16.mxu0 %vm841_vm0, %v2188_v47 }
  0xd9   :  { %1106 = vmatmul.mubr.bf16.gmra.mrb[76].mxu1 %v2190_v48 }
  0xda   :  { %1338 = vmatmul.mubr.bf16.gmra.mrb[76].mxu0 %v2191_v49  ;;  %1113 = vmatprep.mubr.bf16.mxu1 %v2192_v50 }
  0xdb   :  { %1838 = vmatprep.mubr.msk.bf16.mxu0 %vm841_vm0, %v2194_v51 }
  0xe1   :  { %1114 = vmatmul.mubr.bf16.gmra.mrb[80].mxu1 %v2196_v52 }
  0xe2   :  { %1346 = vmatmul.mubr.bf16.gmra.mrb[80].mxu0 %v2197_v53  ;;  %1121 = vmatprep.mubr.bf16.mxu1 %v2198_v54 }
  0xe3   :  { %1839 = vmatprep.mubr.msk.bf16.mxu0 %vm841_vm0, %v2200_v55 }
  0xe9   :  { %1122 = vmatmul.mubr.bf16.gmra.mrb[84].mxu1 %v2202_v56 }
  0xea   :  { %1354 = vmatmul.mubr.bf16.gmra.mrb[84].mxu0 %v2203_v57  ;;  %1129 = vmatprep.mubr.bf16.mxu1 %v2204_v58 }
  0xeb   :  { %1840 = vmatprep.mubr.msk.bf16.mxu0 %vm841_vm0, %v2206_v59 }
  0xf1   :  { %1130 = vmatmul.mubr.bf16.gmra.mrb[88].mxu1 %v2208_v60 }
  0xf2   :  { %1362 = vmatmul.mubr.bf16.gmra.mrb[88].mxu0 %v2209_v61  ;;  %1137 = vmatprep.mubr.bf16.mxu1 %v2210_v62 }
  0xf3   :  { %1841 = vmatprep.mubr.msk.bf16.mxu0 %vm841_vm0, %v2212_v63 }
  0xf9   :  { %1138 = vmatmul.mubr.bf16.gmra.mrb[92].mxu1 %v2214_v2 }
  0xfa   :  { %1370 = vmatmul.mubr.bf16.gmra.mrb[92].mxu0 %v2215_v3  ;;  %1145 = vmatprep.mubr.bf16.mxu1 %v1783_v4 }
  0xfb   :  { %1842 = vmatprep.mubr.msk.bf16.mxu0 %vm841_vm0, %v1785_v5 }
 0x101   :  { %1146 = vmatmul.mubr.bf16.gmra.mrb[96].mxu1 %v1782_v6 }
 0x102   :  { %1378 = vmatmul.mubr.bf16.gmra.mrb[96].mxu0 %v1784_v7 }
 0x114   :  { %v955_v9 = vpop.f32.mrb[0].mxu1 }
 0x115   :  { %v956_v10 = vadd.f32 %v2691_v8, %v955_v9  ;;  %v1187_v11 = vpop.f32.mrb[0].mxu0  ;;  %v957_v12 = vpop.f32.mrb[1].mxu1 }
 0x116   :  { %v1189_v13 = vpop.f32.mrb[1].mxu0  ;;  %v958_v14 = vpop.f32.mrb[2].mxu1 }
 0x117   :  { %v1188_v15 = vadd.f32 %v1187_v11, %v956_v10  ;;  %v959_v16 = vadd.f32 %v2691_v8, %v958_v14  ;;  %v1190_v17 = vpop.f32.mrb[2].mxu0  ;;  %v960_v18 = vpop.f32.mrb[3].mxu1 }
 0x118   :  { %v1192_v19 = vpop.f32.mrb[3].mxu0 }
 0x119   :  { %v1385_v20 = vmax.f32 %v1188_v15, 0.0  ;;  %v1191_v21 = vadd.f32 %v1190_v17, %v959_v16 }
 0x11b   :  { %v1892_v22 = vpack.c.bf16 %v1385_v20, %v1385_v20  ;;  %v1386_v23 = vmax.f32 %v1191_v21, 0.0 }
 0x11c   :  { %v963_v24 = vpop.f32.mrb[4].mxu1 }
 0x11d   :  { %1632 = vst.msk [vmem:[%s2941_s3] sm:$0xf] %vm1631_vm2, %v1892_v22  ;;  %v1893_v25 = vpack.c.bf16 %v1386_v23, %v1386_v23  ;;  %v964_v26 = vadd.f32 %v2691_v8, %v963_v24  ;;  %v1195_v27 = vpop.f32.mrb[4].mxu0  ;;  %v965_v28 = vpop.f32.mrb[5].mxu1 }
 0x11e   :  { %v1197_v29 = vpop.f32.mrb[5].mxu0  ;;  %v966_v30 = vpop.f32.mrb[6].mxu1 }
 0x11f   :  { %1633 = vst.msk [vmem:[%s2941_s3 + $0x4] sm:$0xf] %vm1631_vm2, %v1893_v25  ;;  %v1196_v31 = vadd.f32 %v1195_v27, %v964_v26  ;;  %v967_v32 = vadd.f32 %v2691_v8, %v966_v30  ;;  %v1198_v33 = vpop.f32.mrb[6].mxu0  ;;  %v968_v34 = vpop.f32.mrb[7].mxu1 }
 0x120   :  { %v1200_v35 = vpop.f32.mrb[7].mxu0 }
 0x121   :  { %v1387_v36 = vmax.f32 %v1196_v31, 0.0  ;;  %v1199_v37 = vadd.f32 %v1198_v33, %v967_v32 }
 0x123   :  { %v1894_v38 = vpack.c.bf16 %v1387_v36, %v1387_v36  ;;  %v1388_v39 = vmax.f32 %v1199_v37, 0.0 }
 0x124   :  { %v971_v40 = vpop.f32.mrb[8].mxu1 }
 0x125   :  { %1634 = vst.msk [vmem:[%s2941_s3 + $0x8] sm:$0xf] %vm1631_vm2, %v1894_v38  ;;  %v1895_v41 = vpack.c.bf16 %v1388_v39, %v1388_v39  ;;  %v972_v42 = vadd.f32 %v2691_v8, %v971_v40  ;;  %v1203_v43 = vpop.f32.mrb[8].mxu0  ;;  %v973_v44 = vpop.f32.mrb[9].mxu1 }
 0x126   :  { %v1205_v45 = vpop.f32.mrb[9].mxu0  ;;  %v974_v46 = vpop.f32.mrb[10].mxu1 }
 0x127   :  { %1635 = vst.msk [vmem:[%s2941_s3 + $0xc] sm:$0xf] %vm1631_vm2, %v1895_v41  ;;  %v1204_v47 = vadd.f32 %v1203_v43, %v972_v42  ;;  %v975_v48 = vadd.f32 %v2691_v8, %v974_v46  ;;  %v1206_v49 = vpop.f32.mrb[10].mxu0  ;;  %v976_v50 = vpop.f32.mrb[11].mxu1 }
 0x128   :  { %v1208_v51 = vpop.f32.mrb[11].mxu0 }
 0x129   :  { %v1389_v52 = vmax.f32 %v1204_v47, 0.0  ;;  %v1207_v53 = vadd.f32 %v1206_v49, %v975_v48 }
 0x12b   :  { %v1896_v54 = vpack.c.bf16 %v1389_v52, %v1389_v52  ;;  %v1390_v55 = vmax.f32 %v1207_v53, 0.0 }
 0x12c   :  { %v979_v56 = vpop.f32.mrb[12].mxu1 }
 0x12d   :  { %1636 = vst.msk [vmem:[%s2941_s3 + $0x10] sm:$0xf] %vm1631_vm2, %v1896_v54  ;;  %v1897_v57 = vpack.c.bf16 %v1390_v55, %v1390_v55  ;;  %v980_v58 = vadd.f32 %v2691_v8, %v979_v56  ;;  %v1211_v59 = vpop.f32.mrb[12].mxu0  ;;  %v981_v60 = vpop.f32.mrb[13].mxu1 }
 0x12e   :  { %v1213_v61 = vpop.f32.mrb[13].mxu0  ;;  %v982_v62 = vpop.f32.mrb[14].mxu1 }
 0x12f   :  { %1637 = vst.msk [vmem:[%s2941_s3 + $0x14] sm:$0xf] %vm1631_vm2, %v1897_v57  ;;  %v1212_v63 = vadd.f32 %v1211_v59, %v980_v58  ;;  %v983_v0 = vadd.f32 %v2691_v8, %v982_v62  ;;  %v1214_v1 = vpop.f32.mrb[14].mxu0  ;;  %v984_v2 = vpop.f32.mrb[15].mxu1 }
 0x130   :  { %v1216_v3 = vpop.f32.mrb[15].mxu0 }
 0x131   :  { %v1391_v4 = vmax.f32 %v1212_v63, 0.0  ;;  %v1215_v5 = vadd.f32 %v1214_v1, %v983_v0 }
 0x133   :  { %v1898_v6 = vpack.c.bf16 %v1391_v4, %v1391_v4  ;;  %v1392_v7 = vmax.f32 %v1215_v5, 0.0 }
 0x134   :  { %v987_v9 = vpop.f32.mrb[16].mxu1 }
 0x135   :  { %1638 = vst.msk [vmem:[%s2941_s3 + $0x18] sm:$0xf] %vm1631_vm2, %v1898_v6  ;;  %v1899_v10 = vpack.c.bf16 %v1392_v7, %v1392_v7  ;;  %v988_v11 = vadd.f32 %v2691_v8, %v987_v9  ;;  %v1219_v12 = vpop.f32.mrb[16].mxu0  ;;  %v989_v13 = vpop.f32.mrb[17].mxu1 }
 0x136   :  { %v1221_v14 = vpop.f32.mrb[17].mxu0  ;;  %v990_v15 = vpop.f32.mrb[18].mxu1 }
 0x137   :  { %1639 = vst.msk [vmem:[%s2941_s3 + $0x1c] sm:$0xf] %vm1631_vm2, %v1899_v10  ;;  %v1220_v16 = vadd.f32 %v1219_v12, %v988_v11  ;;  %v991_v17 = vadd.f32 %v2691_v8, %v990_v15  ;;  %v1222_v18 = vpop.f32.mrb[18].mxu0  ;;  %v992_v19 = vpop.f32.mrb[19].mxu1 }
 0x138   :  { %v1224_v20 = vpop.f32.mrb[19].mxu0 }
 0x139   :  { %v1393_v21 = vmax.f32 %v1220_v16, 0.0  ;;  %v1223_v22 = vadd.f32 %v1222_v18, %v991_v17 }
 0x13b   :  { %v1900_v23 = vpack.c.bf16 %v1393_v21, %v1393_v21  ;;  %v1394_v24 = vmax.f32 %v1223_v22, 0.0 }
 0x13c   :  { %v995_v25 = vpop.f32.mrb[20].mxu1 }
 0x13d   :  { %1640 = vst.msk [vmem:[%s2941_s3 + $0x20] sm:$0xf] %vm1631_vm2, %v1900_v23  ;;  %v1901_v26 = vpack.c.bf16 %v1394_v24, %v1394_v24  ;;  %v996_v27 = vadd.f32 %v2691_v8, %v995_v25  ;;  %v1227_v28 = vpop.f32.mrb[20].mxu0  ;;  %v997_v29 = vpop.f32.mrb[21].mxu1 }
 0x13e   :  { %v1229_v30 = vpop.f32.mrb[21].mxu0  ;;  %v998_v31 = vpop.f32.mrb[22].mxu1 }
 0x13f   :  { %1641 = vst.msk [vmem:[%s2941_s3 + $0x24] sm:$0xf] %vm1631_vm2, %v1901_v26  ;;  %v1228_v32 = vadd.f32 %v1227_v28, %v996_v27  ;;  %v999_v33 = vadd.f32 %v2691_v8, %v998_v31  ;;  %v1230_v34 = vpop.f32.mrb[22].mxu0  ;;  %v1000_v35 = vpop.f32.mrb[23].mxu1 }
 0x140   :  { %v1232_v36 = vpop.f32.mrb[23].mxu0 }
 0x141   :  { %v1395_v37 = vmax.f32 %v1228_v32, 0.0  ;;  %v1231_v38 = vadd.f32 %v1230_v34, %v999_v33 }
 0x143   :  { %v1902_v39 = vpack.c.bf16 %v1395_v37, %v1395_v37  ;;  %v1396_v40 = vmax.f32 %v1231_v38, 0.0 }
 0x144   :  { %v1003_v41 = vpop.f32.mrb[24].mxu1 }
 0x145   :  { %1642 = vst.msk [vmem:[%s2941_s3 + $0x28] sm:$0xf] %vm1631_vm2, %v1902_v39  ;;  %v1903_v42 = vpack.c.bf16 %v1396_v40, %v1396_v40  ;;  %v1004_v43 = vadd.f32 %v2691_v8, %v1003_v41  ;;  %v1235_v44 = vpop.f32.mrb[24].mxu0  ;;  %v1005_v45 = vpop.f32.mrb[25].mxu1 }
 0x146   :  { %v1237_v46 = vpop.f32.mrb[25].mxu0  ;;  %v1006_v47 = vpop.f32.mrb[26].mxu1 }
 0x147   :  { %1643 = vst.msk [vmem:[%s2941_s3 + $0x2c] sm:$0xf] %vm1631_vm2, %v1903_v42  ;;  %v1236_v48 = vadd.f32 %v1235_v44, %v1004_v43  ;;  %v1007_v49 = vadd.f32 %v2691_v8, %v1006_v47  ;;  %v1238_v50 = vpop.f32.mrb[26].mxu0  ;;  %v1008_v51 = vpop.f32.mrb[27].mxu1 }
 0x148   :  { %v1240_v52 = vpop.f32.mrb[27].mxu0 }
 0x149   :  { %v1397_v53 = vmax.f32 %v1236_v48, 0.0  ;;  %v1239_v54 = vadd.f32 %v1238_v50, %v1007_v49 }
 0x14b   :  { %v1904_v55 = vpack.c.bf16 %v1397_v53, %v1397_v53  ;;  %v1398_v56 = vmax.f32 %v1239_v54, 0.0 }
 0x14c   :  { %v1011_v57 = vpop.f32.mrb[28].mxu1 }
 0x14d   :  { %1644 = vst.msk [vmem:[%s2941_s3 + $0x30] sm:$0xf] %vm1631_vm2, %v1904_v55  ;;  %v1905_v58 = vpack.c.bf16 %v1398_v56, %v1398_v56  ;;  %v1012_v59 = vadd.f32 %v2691_v8, %v1011_v57  ;;  %v1243_v60 = vpop.f32.mrb[28].mxu0  ;;  %v1013_v61 = vpop.f32.mrb[29].mxu1 }
 0x14e   :  { %v1245_v62 = vpop.f32.mrb[29].mxu0  ;;  %v1014_v63 = vpop.f32.mrb[30].mxu1 }
 0x14f   :  { %1645 = vst.msk [vmem:[%s2941_s3 + $0x34] sm:$0xf] %vm1631_vm2, %v1905_v58  ;;  %v1244_v0 = vadd.f32 %v1243_v60, %v1012_v59  ;;  %v1015_v1 = vadd.f32 %v2691_v8, %v1014_v63  ;;  %v1246_v2 = vpop.f32.mrb[30].mxu0  ;;  %v1016_v3 = vpop.f32.mrb[31].mxu1 }
 0x150   :  { %v1248_v4 = vpop.f32.mrb[31].mxu0 }
 0x151   :  { %v1399_v5 = vmax.f32 %v1244_v0, 0.0  ;;  %v1247_v6 = vadd.f32 %v1246_v2, %v1015_v1 }
 0x153   :  { %v1906_v7 = vpack.c.bf16 %v1399_v5, %v1399_v5  ;;  %v1400_v9 = vmax.f32 %v1247_v6, 0.0 }
 0x154   :  { %v1019_v10 = vpop.f32.mrb[32].mxu1 }
 0x155   :  { %1646 = vst.msk [vmem:[%s2941_s3 + $0x38] sm:$0xf] %vm1631_vm2, %v1906_v7  ;;  %v1907_v11 = vpack.c.bf16 %v1400_v9, %v1400_v9  ;;  %v1020_v12 = vadd.f32 %v2691_v8, %v1019_v10  ;;  %v1251_v13 = vpop.f32.mrb[32].mxu0  ;;  %v1021_v14 = vpop.f32.mrb[33].mxu1 }
 0x156   :  { %v1253_v15 = vpop.f32.mrb[33].mxu0  ;;  %v1022_v16 = vpop.f32.mrb[34].mxu1 }
 0x157   :  { %1647 = vst.msk [vmem:[%s2941_s3 + $0x3c] sm:$0xf] %vm1631_vm2, %v1907_v11  ;;  %v1252_v17 = vadd.f32 %v1251_v13, %v1020_v12  ;;  %v1023_v18 = vadd.f32 %v2691_v8, %v1022_v16  ;;  %v1254_v19 = vpop.f32.mrb[34].mxu0  ;;  %v1024_v20 = vpop.f32.mrb[35].mxu1 }
 0x158   :  { %v1256_v21 = vpop.f32.mrb[35].mxu0 }
 0x159   :  { %v1401_v22 = vmax.f32 %v1252_v17, 0.0  ;;  %v1255_v23 = vadd.f32 %v1254_v19, %v1023_v18 }
 0x15b   :  { %v1908_v24 = vpack.c.bf16 %v1401_v22, %v1401_v22  ;;  %v1402_v25 = vmax.f32 %v1255_v23, 0.0 }
 0x15c   :  { %v1027_v26 = vpop.f32.mrb[36].mxu1 }
 0x15d   :  { %1648 = vst.msk [vmem:[%s2941_s3 + $0x40] sm:$0xf] %vm1631_vm2, %v1908_v24  ;;  %v1909_v27 = vpack.c.bf16 %v1402_v25, %v1402_v25  ;;  %v1028_v28 = vadd.f32 %v2691_v8, %v1027_v26  ;;  %v1259_v29 = vpop.f32.mrb[36].mxu0  ;;  %v1029_v30 = vpop.f32.mrb[37].mxu1 }
 0x15e   :  { %v1261_v31 = vpop.f32.mrb[37].mxu0  ;;  %v1030_v32 = vpop.f32.mrb[38].mxu1 }
 0x15f   :  { %1649 = vst.msk [vmem:[%s2941_s3 + $0x44] sm:$0xf] %vm1631_vm2, %v1909_v27  ;;  %v1260_v33 = vadd.f32 %v1259_v29, %v1028_v28  ;;  %v1031_v34 = vadd.f32 %v2691_v8, %v1030_v32  ;;  %v1262_v35 = vpop.f32.mrb[38].mxu0  ;;  %v1032_v36 = vpop.f32.mrb[39].mxu1 }
 0x160   :  { %v1264_v37 = vpop.f32.mrb[39].mxu0 }
 0x161   :  { %v1403_v38 = vmax.f32 %v1260_v33, 0.0  ;;  %v1263_v39 = vadd.f32 %v1262_v35, %v1031_v34 }
 0x163   :  { %v1910_v40 = vpack.c.bf16 %v1403_v38, %v1403_v38  ;;  %v1404_v41 = vmax.f32 %v1263_v39, 0.0 }
 0x164   :  { %v1035_v42 = vpop.f32.mrb[40].mxu1 }
 0x165   :  { %1650 = vst.msk [vmem:[%s2941_s3 + $0x48] sm:$0xf] %vm1631_vm2, %v1910_v40  ;;  %v1911_v43 = vpack.c.bf16 %v1404_v41, %v1404_v41  ;;  %v1036_v44 = vadd.f32 %v2691_v8, %v1035_v42  ;;  %v1267_v45 = vpop.f32.mrb[40].mxu0  ;;  %v1037_v46 = vpop.f32.mrb[41].mxu1 }
 0x166   :  { %v1269_v47 = vpop.f32.mrb[41].mxu0  ;;  %v1038_v48 = vpop.f32.mrb[42].mxu1 }
 0x167   :  { %1651 = vst.msk [vmem:[%s2941_s3 + $0x4c] sm:$0xf] %vm1631_vm2, %v1911_v43  ;;  %v1268_v49 = vadd.f32 %v1267_v45, %v1036_v44  ;;  %v1039_v50 = vadd.f32 %v2691_v8, %v1038_v48  ;;  %v1270_v51 = vpop.f32.mrb[42].mxu0  ;;  %v1040_v52 = vpop.f32.mrb[43].mxu1 }
 0x168   :  { %v1272_v53 = vpop.f32.mrb[43].mxu0 }
 0x169   :  { %v1405_v54 = vmax.f32 %v1268_v49, 0.0  ;;  %v1271_v55 = vadd.f32 %v1270_v51, %v1039_v50 }
 0x16b   :  { %v1912_v56 = vpack.c.bf16 %v1405_v54, %v1405_v54  ;;  %v1406_v57 = vmax.f32 %v1271_v55, 0.0 }
 0x16c   :  { %v1043_v58 = vpop.f32.mrb[44].mxu1 }
 0x16d   :  { %1652 = vst.msk [vmem:[%s2941_s3 + $0x50] sm:$0xf] %vm1631_vm2, %v1912_v56  ;;  %v1913_v59 = vpack.c.bf16 %v1406_v57, %v1406_v57  ;;  %v1044_v60 = vadd.f32 %v2691_v8, %v1043_v58  ;;  %v1275_v61 = vpop.f32.mrb[44].mxu0  ;;  %v1045_v62 = vpop.f32.mrb[45].mxu1 }
 0x16e   :  { %v1277_v63 = vpop.f32.mrb[45].mxu0  ;;  %v1046_v0 = vpop.f32.mrb[46].mxu1 }
 0x16f   :  { %1653 = vst.msk [vmem:[%s2941_s3 + $0x54] sm:$0xf] %vm1631_vm2, %v1913_v59  ;;  %v1276_v1 = vadd.f32 %v1275_v61, %v1044_v60  ;;  %v1047_v2 = vadd.f32 %v2691_v8, %v1046_v0  ;;  %v1278_v3 = vpop.f32.mrb[46].mxu0  ;;  %v1048_v4 = vpop.f32.mrb[47].mxu1 }
 0x170   :  { %v1280_v5 = vpop.f32.mrb[47].mxu0 }
 0x171   :  { %v1407_v6 = vmax.f32 %v1276_v1, 0.0  ;;  %v1279_v7 = vadd.f32 %v1278_v3, %v1047_v2 }
 0x173   :  { %v1914_v9 = vpack.c.bf16 %v1407_v6, %v1407_v6  ;;  %v1408_v10 = vmax.f32 %v1279_v7, 0.0 }
 0x174   :  { %v1051_v11 = vpop.f32.mrb[48].mxu1 }
 0x175   :  { %1654 = vst.msk [vmem:[%s2941_s3 + $0x58] sm:$0xf] %vm1631_vm2, %v1914_v9  ;;  %v1915_v12 = vpack.c.bf16 %v1408_v10, %v1408_v10  ;;  %v1052_v13 = vadd.f32 %v2691_v8, %v1051_v11  ;;  %v1283_v14 = vpop.f32.mrb[48].mxu0  ;;  %v1053_v15 = vpop.f32.mrb[49].mxu1 }
 0x176   :  { %v1285_v16 = vpop.f32.mrb[49].mxu0  ;;  %v1054_v17 = vpop.f32.mrb[50].mxu1 }
 0x177   :  { %1655 = vst.msk [vmem:[%s2941_s3 + $0x5c] sm:$0xf] %vm1631_vm2, %v1915_v12  ;;  %v1284_v18 = vadd.f32 %v1283_v14, %v1052_v13  ;;  %v1055_v19 = vadd.f32 %v2691_v8, %v1054_v17  ;;  %v1286_v20 = vpop.f32.mrb[50].mxu0  ;;  %v1056_v21 = vpop.f32.mrb[51].mxu1 }
 0x178   :  { %v1288_v22 = vpop.f32.mrb[51].mxu0 }
 0x179   :  { %v1409_v23 = vmax.f32 %v1284_v18, 0.0  ;;  %v1287_v24 = vadd.f32 %v1286_v20, %v1055_v19 }
 0x17b   :  { %v1916_v25 = vpack.c.bf16 %v1409_v23, %v1409_v23  ;;  %v1410_v26 = vmax.f32 %v1287_v24, 0.0 }
 0x17c   :  { %v1059_v27 = vpop.f32.mrb[52].mxu1 }
 0x17d   :  { %1656 = vst.msk [vmem:[%s2941_s3 + $0x60] sm:$0xf] %vm1631_vm2, %v1916_v25  ;;  %v1917_v28 = vpack.c.bf16 %v1410_v26, %v1410_v26  ;;  %v1060_v29 = vadd.f32 %v2691_v8, %v1059_v27  ;;  %v1291_v30 = vpop.f32.mrb[52].mxu0  ;;  %v1061_v31 = vpop.f32.mrb[53].mxu1 }
 0x17e   :  { %v1293_v32 = vpop.f32.mrb[53].mxu0  ;;  %v1062_v33 = vpop.f32.mrb[54].mxu1 }
 0x17f   :  { %1657 = vst.msk [vmem:[%s2941_s3 + $0x64] sm:$0xf] %vm1631_vm2, %v1917_v28  ;;  %v1292_v34 = vadd.f32 %v1291_v30, %v1060_v29  ;;  %v1063_v35 = vadd.f32 %v2691_v8, %v1062_v33  ;;  %v1294_v36 = vpop.f32.mrb[54].mxu0  ;;  %v1064_v37 = vpop.f32.mrb[55].mxu1 }
 0x180   :  { %v1296_v38 = vpop.f32.mrb[55].mxu0 }
 0x181   :  { %v1411_v39 = vmax.f32 %v1292_v34, 0.0  ;;  %v1295_v40 = vadd.f32 %v1294_v36, %v1063_v35 }
 0x183   :  { %v1918_v41 = vpack.c.bf16 %v1411_v39, %v1411_v39  ;;  %v1412_v42 = vmax.f32 %v1295_v40, 0.0 }
 0x184   :  { %v1067_v43 = vpop.f32.mrb[56].mxu1 }
 0x185   :  { %1658 = vst.msk [vmem:[%s2941_s3 + $0x68] sm:$0xf] %vm1631_vm2, %v1918_v41  ;;  %v1919_v44 = vpack.c.bf16 %v1412_v42, %v1412_v42  ;;  %v1068_v45 = vadd.f32 %v2691_v8, %v1067_v43  ;;  %v1299_v46 = vpop.f32.mrb[56].mxu0  ;;  %v1069_v47 = vpop.f32.mrb[57].mxu1 }
 0x186   :  { %v1301_v48 = vpop.f32.mrb[57].mxu0  ;;  %v1070_v49 = vpop.f32.mrb[58].mxu1 }
 0x187   :  { %1659 = vst.msk [vmem:[%s2941_s3 + $0x6c] sm:$0xf] %vm1631_vm2, %v1919_v44  ;;  %v1300_v50 = vadd.f32 %v1299_v46, %v1068_v45  ;;  %v1071_v51 = vadd.f32 %v2691_v8, %v1070_v49  ;;  %v1302_v52 = vpop.f32.mrb[58].mxu0  ;;  %v1072_v53 = vpop.f32.mrb[59].mxu1 }
 0x188   :  { %v1304_v54 = vpop.f32.mrb[59].mxu0 }
 0x189   :  { %v1413_v55 = vmax.f32 %v1300_v50, 0.0  ;;  %v1303_v56 = vadd.f32 %v1302_v52, %v1071_v51 }
 0x18b   :  { %v1920_v57 = vpack.c.bf16 %v1413_v55, %v1413_v55  ;;  %v1414_v58 = vmax.f32 %v1303_v56, 0.0 }
 0x18c   :  { %v1075_v59 = vpop.f32.mrb[60].mxu1 }
 0x18d   :  { %1660 = vst.msk [vmem:[%s2941_s3 + $0x70] sm:$0xf] %vm1631_vm2, %v1920_v57  ;;  %v1921_v60 = vpack.c.bf16 %v1414_v58, %v1414_v58  ;;  %v1076_v61 = vadd.f32 %v2691_v8, %v1075_v59  ;;  %v1307_v62 = vpop.f32.mrb[60].mxu0  ;;  %v1077_v63 = vpop.f32.mrb[61].mxu1 }
 0x18e   :  { %v1309_v0 = vpop.f32.mrb[61].mxu0  ;;  %v1078_v1 = vpop.f32.mrb[62].mxu1 }
 0x18f   :  { %1661 = vst.msk [vmem:[%s2941_s3 + $0x74] sm:$0xf] %vm1631_vm2, %v1921_v60  ;;  %v1308_v2 = vadd.f32 %v1307_v62, %v1076_v61  ;;  %v1079_v3 = vadd.f32 %v2691_v8, %v1078_v1  ;;  %v1310_v4 = vpop.f32.mrb[62].mxu0  ;;  %v1080_v5 = vpop.f32.mrb[63].mxu1 }
 0x190   :  { %v1312_v6 = vpop.f32.mrb[63].mxu0 }
 0x191   :  { %v1415_v7 = vmax.f32 %v1308_v2, 0.0  ;;  %v1311_v9 = vadd.f32 %v1310_v4, %v1079_v3 }
 0x193   :  { %v1922_v10 = vpack.c.bf16 %v1415_v7, %v1415_v7  ;;  %v1416_v11 = vmax.f32 %v1311_v9, 0.0 }
 0x194   :  { %v1083_v12 = vpop.f32.mrb[64].mxu1 }
 0x195   :  { %1662 = vst.msk [vmem:[%s2941_s3 + $0x78] sm:$0xf] %vm1631_vm2, %v1922_v10  ;;  %v1923_v13 = vpack.c.bf16 %v1416_v11, %v1416_v11  ;;  %v1084_v14 = vadd.f32 %v2691_v8, %v1083_v12  ;;  %v1315_v15 = vpop.f32.mrb[64].mxu0  ;;  %v1085_v16 = vpop.f32.mrb[65].mxu1 }
 0x196   :  { %v1317_v17 = vpop.f32.mrb[65].mxu0  ;;  %v1086_v18 = vpop.f32.mrb[66].mxu1 }
 0x197   :  { %1663 = vst.msk [vmem:[%s2941_s3 + $0x7c] sm:$0xf] %vm1631_vm2, %v1923_v13  ;;  %v1316_v19 = vadd.f32 %v1315_v15, %v1084_v14  ;;  %v1087_v20 = vadd.f32 %v2691_v8, %v1086_v18  ;;  %v1318_v21 = vpop.f32.mrb[66].mxu0  ;;  %v1088_v22 = vpop.f32.mrb[67].mxu1 }
 0x198   :  { %v1320_v23 = vpop.f32.mrb[67].mxu0 }
 0x199   :  { %v1417_v24 = vmax.f32 %v1316_v19, 0.0  ;;  %v1319_v25 = vadd.f32 %v1318_v21, %v1087_v20 }
 0x19b   :  { %v1924_v26 = vpack.c.bf16 %v1417_v24, %v1417_v24  ;;  %v1418_v27 = vmax.f32 %v1319_v25, 0.0 }
 0x19c   :  { %v1091_v28 = vpop.f32.mrb[68].mxu1 }
 0x19d   :  { %1664 = vst.msk [vmem:[%s2941_s3 + $0x80] sm:$0xf] %vm1631_vm2, %v1924_v26  ;;  %v1925_v29 = vpack.c.bf16 %v1418_v27, %v1418_v27  ;;  %v1092_v30 = vadd.f32 %v2691_v8, %v1091_v28  ;;  %v1323_v31 = vpop.f32.mrb[68].mxu0  ;;  %v1093_v32 = vpop.f32.mrb[69].mxu1 }
 0x19e   :  { %v1325_v33 = vpop.f32.mrb[69].mxu0  ;;  %v1094_v34 = vpop.f32.mrb[70].mxu1 }
 0x19f   :  { %1665 = vst.msk [vmem:[%s2941_s3 + $0x84] sm:$0xf] %vm1631_vm2, %v1925_v29  ;;  %v1324_v35 = vadd.f32 %v1323_v31, %v1092_v30  ;;  %v1095_v36 = vadd.f32 %v2691_v8, %v1094_v34  ;;  %v1326_v37 = vpop.f32.mrb[70].mxu0  ;;  %v1096_v38 = vpop.f32.mrb[71].mxu1 }
 0x1a0   :  { %v1328_v39 = vpop.f32.mrb[71].mxu0 }
 0x1a1   :  { %v1419_v40 = vmax.f32 %v1324_v35, 0.0  ;;  %v1327_v41 = vadd.f32 %v1326_v37, %v1095_v36 }
 0x1a3   :  { %v1926_v42 = vpack.c.bf16 %v1419_v40, %v1419_v40  ;;  %v1420_v43 = vmax.f32 %v1327_v41, 0.0 }
 0x1a4   :  { %v1099_v44 = vpop.f32.mrb[72].mxu1 }
 0x1a5   :  { %1666 = vst.msk [vmem:[%s2941_s3 + $0x88] sm:$0xf] %vm1631_vm2, %v1926_v42  ;;  %v1927_v45 = vpack.c.bf16 %v1420_v43, %v1420_v43  ;;  %v1100_v46 = vadd.f32 %v2691_v8, %v1099_v44  ;;  %v1331_v47 = vpop.f32.mrb[72].mxu0  ;;  %v1101_v48 = vpop.f32.mrb[73].mxu1 }
 0x1a6   :  { %v1333_v49 = vpop.f32.mrb[73].mxu0  ;;  %v1102_v50 = vpop.f32.mrb[74].mxu1 }
 0x1a7   :  { %1667 = vst.msk [vmem:[%s2941_s3 + $0x8c] sm:$0xf] %vm1631_vm2, %v1927_v45  ;;  %v1332_v51 = vadd.f32 %v1331_v47, %v1100_v46  ;;  %v1103_v52 = vadd.f32 %v2691_v8, %v1102_v50  ;;  %v1334_v53 = vpop.f32.mrb[74].mxu0  ;;  %v1104_v54 = vpop.f32.mrb[75].mxu1 }
 0x1a8   :  { %v1336_v55 = vpop.f32.mrb[75].mxu0 }
 0x1a9   :  { %v1421_v56 = vmax.f32 %v1332_v51, 0.0  ;;  %v1335_v57 = vadd.f32 %v1334_v53, %v1103_v52 }
 0x1ab   :  { %v1928_v58 = vpack.c.bf16 %v1421_v56, %v1421_v56  ;;  %v1422_v59 = vmax.f32 %v1335_v57, 0.0 }
 0x1ac   :  { %v1107_v60 = vpop.f32.mrb[76].mxu1 }
 0x1ad   :  { %1668 = vst.msk [vmem:[%s2941_s3 + $0x90] sm:$0xf] %vm1631_vm2, %v1928_v58  ;;  %v1929_v61 = vpack.c.bf16 %v1422_v59, %v1422_v59  ;;  %v1108_v62 = vadd.f32 %v2691_v8, %v1107_v60  ;;  %v1339_v63 = vpop.f32.mrb[76].mxu0  ;;  %v1109_v0 = vpop.f32.mrb[77].mxu1 }
 0x1ae   :  { %v1341_v1 = vpop.f32.mrb[77].mxu0  ;;  %v1110_v2 = vpop.f32.mrb[78].mxu1 }
 0x1af   :  { %1669 = vst.msk [vmem:[%s2941_s3 + $0x94] sm:$0xf] %vm1631_vm2, %v1929_v61  ;;  %v1340_v3 = vadd.f32 %v1339_v63, %v1108_v62  ;;  %v1111_v4 = vadd.f32 %v2691_v8, %v1110_v2  ;;  %v1342_v5 = vpop.f32.mrb[78].mxu0  ;;  %v1112_v6 = vpop.f32.mrb[79].mxu1 }
 0x1b0   :  { %v1344_v7 = vpop.f32.mrb[79].mxu0 }
 0x1b1   :  { %v1423_v9 = vmax.f32 %v1340_v3, 0.0  ;;  %v1343_v10 = vadd.f32 %v1342_v5, %v1111_v4 }
 0x1b3   :  { %v1930_v11 = vpack.c.bf16 %v1423_v9, %v1423_v9  ;;  %v1424_v12 = vmax.f32 %v1343_v10, 0.0 }
 0x1b4   :  { %v1115_v13 = vpop.f32.mrb[80].mxu1 }
 0x1b5   :  { %1670 = vst.msk [vmem:[%s2941_s3 + $0x98] sm:$0xf] %vm1631_vm2, %v1930_v11  ;;  %v1931_v14 = vpack.c.bf16 %v1424_v12, %v1424_v12  ;;  %v1116_v15 = vadd.f32 %v2691_v8, %v1115_v13  ;;  %v1347_v16 = vpop.f32.mrb[80].mxu0  ;;  %v1117_v17 = vpop.f32.mrb[81].mxu1 }
 0x1b6   :  { %v1349_v18 = vpop.f32.mrb[81].mxu0  ;;  %v1118_v19 = vpop.f32.mrb[82].mxu1 }
 0x1b7   :  { %1671 = vst.msk [vmem:[%s2941_s3 + $0x9c] sm:$0xf] %vm1631_vm2, %v1931_v14  ;;  %v1348_v20 = vadd.f32 %v1347_v16, %v1116_v15  ;;  %v1119_v21 = vadd.f32 %v2691_v8, %v1118_v19  ;;  %v1350_v22 = vpop.f32.mrb[82].mxu0  ;;  %v1120_v23 = vpop.f32.mrb[83].mxu1 }
 0x1b8   :  { %v1352_v24 = vpop.f32.mrb[83].mxu0 }
 0x1b9   :  { %v1425_v25 = vmax.f32 %v1348_v20, 0.0  ;;  %v1351_v26 = vadd.f32 %v1350_v22, %v1119_v21 }
 0x1bb   :  { %v1932_v27 = vpack.c.bf16 %v1425_v25, %v1425_v25  ;;  %v1426_v28 = vmax.f32 %v1351_v26, 0.0 }
 0x1bc   :  { %v1123_v29 = vpop.f32.mrb[84].mxu1 }
 0x1bd   :  { %1672 = vst.msk [vmem:[%s2941_s3 + $0xa0] sm:$0xf] %vm1631_vm2, %v1932_v27  ;;  %v1933_v30 = vpack.c.bf16 %v1426_v28, %v1426_v28  ;;  %v1124_v31 = vadd.f32 %v2691_v8, %v1123_v29  ;;  %v1355_v32 = vpop.f32.mrb[84].mxu0  ;;  %v1125_v33 = vpop.f32.mrb[85].mxu1 }
 0x1be   :  { %v1357_v34 = vpop.f32.mrb[85].mxu0  ;;  %v1126_v35 = vpop.f32.mrb[86].mxu1 }
 0x1bf   :  { %1673 = vst.msk [vmem:[%s2941_s3 + $0xa4] sm:$0xf] %vm1631_vm2, %v1933_v30  ;;  %v1356_v36 = vadd.f32 %v1355_v32, %v1124_v31  ;;  %v1127_v37 = vadd.f32 %v2691_v8, %v1126_v35  ;;  %v1358_v38 = vpop.f32.mrb[86].mxu0  ;;  %v1128_v39 = vpop.f32.mrb[87].mxu1 }
 0x1c0   :  { %v1360_v40 = vpop.f32.mrb[87].mxu0 }
 0x1c1   :  { %v1427_v41 = vmax.f32 %v1356_v36, 0.0  ;;  %v1359_v42 = vadd.f32 %v1358_v38, %v1127_v37 }
 0x1c3   :  { %v1934_v43 = vpack.c.bf16 %v1427_v41, %v1427_v41  ;;  %v1428_v44 = vmax.f32 %v1359_v42, 0.0 }
 0x1c4   :  { %v1131_v45 = vpop.f32.mrb[88].mxu1 }
 0x1c5   :  { %1674 = vst.msk [vmem:[%s2941_s3 + $0xa8] sm:$0xf] %vm1631_vm2, %v1934_v43  ;;  %v1935_v46 = vpack.c.bf16 %v1428_v44, %v1428_v44  ;;  %v1132_v47 = vadd.f32 %v2691_v8, %v1131_v45  ;;  %v1363_v48 = vpop.f32.mrb[88].mxu0  ;;  %v1133_v49 = vpop.f32.mrb[89].mxu1 }
 0x1c6   :  { %v1365_v50 = vpop.f32.mrb[89].mxu0  ;;  %v1134_v51 = vpop.f32.mrb[90].mxu1 }
 0x1c7   :  { %1675 = vst.msk [vmem:[%s2941_s3 + $0xac] sm:$0xf] %vm1631_vm2, %v1935_v46  ;;  %v1364_v52 = vadd.f32 %v1363_v48, %v1132_v47  ;;  %v1135_v53 = vadd.f32 %v2691_v8, %v1134_v51  ;;  %v1366_v54 = vpop.f32.mrb[90].mxu0  ;;  %v1136_v55 = vpop.f32.mrb[91].mxu1 }
 0x1c8   :  { %v1368_v56 = vpop.f32.mrb[91].mxu0 }
 0x1c9   :  { %v1429_v57 = vmax.f32 %v1364_v52, 0.0  ;;  %v1367_v58 = vadd.f32 %v1366_v54, %v1135_v53 }
 0x1cb   :  { %v1936_v59 = vpack.c.bf16 %v1429_v57, %v1429_v57  ;;  %v1430_v60 = vmax.f32 %v1367_v58, 0.0 }
 0x1cc   :  { %v1139_v61 = vpop.f32.mrb[92].mxu1 }
 0x1cd   :  { %1676 = vst.msk [vmem:[%s2941_s3 + $0xb0] sm:$0xf] %vm1631_vm2, %v1936_v59  ;;  %v1937_v62 = vpack.c.bf16 %v1430_v60, %v1430_v60  ;;  %v1140_v63 = vadd.f32 %v2691_v8, %v1139_v61  ;;  %v1371_v0 = vpop.f32.mrb[92].mxu0  ;;  %v1141_v1 = vpop.f32.mrb[93].mxu1 }
 0x1ce   :  { %v1373_v2 = vpop.f32.mrb[93].mxu0  ;;  %v1142_v3 = vpop.f32.mrb[94].mxu1 }
 0x1cf   :  { %1677 = vst.msk [vmem:[%s2941_s3 + $0xb4] sm:$0xf] %vm1631_vm2, %v1937_v62  ;;  %v1372_v4 = vadd.f32 %v1371_v0, %v1140_v63  ;;  %v1143_v5 = vadd.f32 %v2691_v8, %v1142_v3  ;;  %v1374_v6 = vpop.f32.mrb[94].mxu0  ;;  %v1144_v7 = vpop.f32.mrb[95].mxu1 }
 0x1d0   :  { %v1376_v9 = vpop.f32.mrb[95].mxu0 }
 0x1d1   :  { %v1431_v10 = vmax.f32 %v1372_v4, 0.0  ;;  %v1375_v11 = vadd.f32 %v1374_v6, %v1143_v5 }
 0x1d3   :  { %v1938_v12 = vpack.c.bf16 %v1431_v10, %v1431_v10  ;;  %v1432_v13 = vmax.f32 %v1375_v11, 0.0 }
 0x1d4   :  { %v1147_v14 = vpop.f32.mrb[96].mxu1 }
 0x1d5   :  { %1678 = vst.msk [vmem:[%s2941_s3 + $0xb8] sm:$0xf] %vm1631_vm2, %v1938_v12  ;;  %v1939_v15 = vpack.c.bf16 %v1432_v13, %v1432_v13  ;;  %v1148_v16 = vadd.f32 %v2691_v8, %v1147_v14  ;;  %v1379_v17 = vpop.f32.mrb[96].mxu0  ;;  %v1149_v18 = vpop.f32.mrb[97].mxu1 }
 0x1d6   :  { %v1381_v19 = vpop.f32.mrb[97].mxu0  ;;  %v1150_v20 = vpop.f32.mrb[98].mxu1 }
 0x1d7   :  { %1679 = vst.msk [vmem:[%s2941_s3 + $0xbc] sm:$0xf] %vm1631_vm2, %v1939_v15  ;;  %v1380_v21 = vadd.f32 %v1379_v17, %v1148_v16  ;;  %v1382_v22 = vpop.f32.mrb[98].mxu0  ;;  %v1151_v23 = vpop.f32.mrb[99].mxu1 }
 0x1d8   :  { %v1383_v24 = vpop.f32.mrb[99].mxu0 }
 0x1d9   :  { %v1433_v25 = vmax.f32 %v1380_v21, 0.0 }
 0x1db   :  { %v1940_v26 = vpack.c.bf16 %v1433_v25, %v1433_v25 }
 0x1dd   :  { %1680 = vst.msk [vmem:[%s2941_s3 + $0xc0] sm:$0xf] %vm1631_vm2, %v1940_v26 }

// kernel: lenet_forward.5
= control target key start
LH: loop header
LB: loop body
LE: loop exit
PB: predicated region body
PF: predicated region fallthrough
CT: control target
= control target key end

     0   :  { %v647_v36 = vlaneseq  ;;  %v8148_v37 = vmov 1966171168   ;;  %s10673_s0 = inlined_call_operand.vmem [shape: bf16[2,2450], index: 0, kind: input, shape index: {}]   ;;  %s10674_s1 = inlined_call_operand.vmem [shape: bf16[2450,500], index: 1, kind: input, shape index: {}]   ;;  %s10675_s2 = inlined_call_operand.vmem [shape: f32[1,500], index: 2, kind: input, shape index: {}]   ;;  %s10676_s3 = inlined_call_operand.vmem [shape: bf16[500,500], index: 3, kind: input, shape index: {}]   ;;  %s10677_s4 = inlined_call_operand.vmem [shape: f32[1,500], index: 4, kind: input, shape index: {}]   ;;  %s10678_s5 = inlined_call_operand.vmem [shape: bf16[500,10], index: 5, kind: input, shape index: {}]   ;;  %s10679_s6 = inlined_call_operand.vmem [shape: f32[1,10], index: 6, kind: input, shape index: {}]   ;;  %s10680_s7 = inlined_call_operand.hbm [shape: f32[2,10], index: 7, kind: output, shape index: {}]  }
   0x1   :  { %v6976_v0 = vld [vmem:[%s10674_s1 + $0x4] ss:$16 sps:$4 sm:$0xff]   ;;  %v6978_v1 = vld [vmem:[%s10674_s1 + $0xc] ss:$16 sps:$4 sm:$0xff]   ;;  %v6980_v2 = vld [vmem:[%s10674_s1] ss:$16 sps:$4 sm:$0xff]   ;;  %v672_v38 = vunpack.c.l.s4 %v8148_v37 }
   0x2   :  { %3898 = vmatprep.subr.bf16.mxu0 %v6976_v0  ;;  %v6981_v3 = vld [vmem:[%s10674_s1 + $0x8] ss:$16 sps:$4 sm:$0xff]   ;;  %4308 = vmatprep.subr.bf16.mxu1 %v6978_v1  ;;  %v6982_v4 = vld [vmem:[%s10674_s1 + $0x24] ss:$16 sps:$4 sm:$0xff]   ;;  %v6984_v5 = vld [vmem:[%s10674_s1 + $0x2c] ss:$16 sps:$4 sm:$0xff]  }
   0x3   :  { %3899 = vmatpush1.bf16.msra.mxu0 %v6980_v2  ;;  %4309 = vmatpush1.bf16.msra.mxu1 %v6981_v3  ;;  %v6986_v6 = vld [vmem:[%s10674_s1 + $0x20] ss:$16 sps:$4 sm:$0xff]   ;;  %v6987_v7 = vld [vmem:[%s10674_s1 + $0x28] ss:$16 sps:$4 sm:$0xff]   ;;  %v6988_v8 = vld [vmem:[%s10674_s1 + $0x44] ss:$16 sps:$4 sm:$0xff]   ;;  %v673_v43 = vunpack.c.0.s8 %v672_v38 }
   0x4   :  { %3900 = vmatprep.subr.bf16.mxu0 %v6982_v4  ;;  %4310 = vmatprep.subr.bf16.mxu1 %v6984_v5  ;;  %v6990_v9 = vld [vmem:[%s10674_s1 + $0x4c] ss:$16 sps:$4 sm:$0xff]   ;;  %v6992_v10 = vld [vmem:[%s10674_s1 + $0x40] ss:$16 sps:$4 sm:$0xff]   ;;  %v6993_v11 = vld [vmem:[%s10674_s1 + $0x48] ss:$16 sps:$4 sm:$0xff]  }
   0x5   :  { %v6994_v12 = vld [vmem:[%s10674_s1 + $0x64] ss:$16 sps:$4 sm:$0xff]   ;;  %v6996_v13 = vld [vmem:[%s10674_s1 + $0x6c] ss:$16 sps:$4 sm:$0xff]   ;;  %v6998_v14 = vld [vmem:[%s10674_s1 + $0x60] ss:$16 sps:$4 sm:$0xff]  }
   0x6   :  { %v6999_v15 = vld [vmem:[%s10674_s1 + $0x68] ss:$16 sps:$4 sm:$0xff]   ;;  %v7000_v16 = vld [vmem:[%s10674_s1 + $0x84] ss:$16 sps:$4 sm:$0xff]   ;;  %v7002_v17 = vld [vmem:[%s10674_s1 + $0x8c] ss:$16 sps:$4 sm:$0xff]  }
   0x7   :  { %3901 = vmatpush1.bf16.msra.mxu0 %v6986_v6  ;;  %4311 = vmatpush1.bf16.msra.mxu1 %v6987_v7  ;;  %v7004_v18 = vld [vmem:[%s10674_s1 + $0x80] ss:$16 sps:$4 sm:$0xff]   ;;  %v7005_v19 = vld [vmem:[%s10674_s1 + $0x88] ss:$16 sps:$4 sm:$0xff]   ;;  %v7006_v20 = vld [vmem:[%s10674_s1 + $0xa4] ss:$16 sps:$4 sm:$0xff]  }
   0x8   :  { %3902 = vmatprep.subr.bf16.mxu0 %v6988_v8  ;;  %4312 = vmatprep.subr.bf16.mxu1 %v6990_v9  ;;  %v7008_v21 = vld [vmem:[%s10674_s1 + $0xac] ss:$16 sps:$4 sm:$0xff]   ;;  %v7010_v22 = vld [vmem:[%s10674_s1 + $0xa0] ss:$16 sps:$4 sm:$0xff]   ;;  %v7011_v23 = vld [vmem:[%s10674_s1 + $0xa8] ss:$16 sps:$4 sm:$0xff]  }
   0x9   :  { %v7012_v24 = vld [vmem:[%s10674_s1 + $0xc4] ss:$16 sps:$4 sm:$0xff]   ;;  %v7014_v25 = vld [vmem:[%s10674_s1 + $0xcc] ss:$16 sps:$4 sm:$0xff]   ;;  %v7016_v26 = vld [vmem:[%s10674_s1 + $0xc0] ss:$16 sps:$4 sm:$0xff]  }
   0xa   :  { %v7017_v27 = vld [vmem:[%s10674_s1 + $0xc8] ss:$16 sps:$4 sm:$0xff]   ;;  %v7018_v28 = vld [vmem:[%s10674_s1 + $0xe4] ss:$16 sps:$4 sm:$0xff]   ;;  %v7020_v29 = vld [vmem:[%s10674_s1 + $0xec] ss:$16 sps:$4 sm:$0xff]  }
   0xb   :  { %3903 = vmatpush1.bf16.msra.mxu0 %v6992_v10  ;;  %4313 = vmatpush1.bf16.msra.mxu1 %v6993_v11  ;;  %v7022_v30 = vld [vmem:[%s10674_s1 + $0xe0] ss:$16 sps:$4 sm:$0xff]   ;;  %v7023_v31 = vld [vmem:[%s10674_s1 + $0xe8] ss:$16 sps:$4 sm:$0xff]   ;;  %v7024_v32 = vld [vmem:[%s10674_s1 + $0x104] ss:$16 sps:$4 sm:$0xff]  }
   0xc   :  { %3904 = vmatprep.subr.bf16.mxu0 %v6994_v12  ;;  %4314 = vmatprep.subr.bf16.mxu1 %v6996_v13  ;;  %v7026_v33 = vld [vmem:[%s10674_s1 + $0x10c] ss:$16 sps:$4 sm:$0xff]   ;;  %v7028_v34 = vld [vmem:[%s10674_s1 + $0x100] ss:$16 sps:$4 sm:$0xff]   ;;  %v7029_v35 = vld [vmem:[%s10674_s1 + $0x108] ss:$16 sps:$4 sm:$0xff]  }
   0xd   :  { %v7030_v39 = vld [vmem:[%s10674_s1 + $0x124] ss:$16 sps:$4 sm:$0xff]   ;;  %v7032_v40 = vld [vmem:[%s10674_s1 + $0x12c] ss:$16 sps:$4 sm:$0xff]   ;;  %v7034_v41 = vld [vmem:[%s10674_s1 + $0x120] ss:$16 sps:$4 sm:$0xff]  }
   0xe   :  { %v8307_v42 = vshrl.u32 %v647_v36, 7  ;;  %v7035_v44 = vld [vmem:[%s10674_s1 + $0x128] ss:$16 sps:$4 sm:$0xff]   ;;  %v7036_v45 = vld [vmem:[%s10674_s1 + $0x144] ss:$16 sps:$4 sm:$0xff]  }
   0xf   :  { %3905 = vmatpush1.bf16.msra.mxu0 %v6998_v14  ;;  %4315 = vmatpush1.bf16.msra.mxu1 %v6999_v15  ;;  %v7038_v46 = vld [vmem:[%s10674_s1 + $0x14c] ss:$16 sps:$4 sm:$0xff]   ;;  %v7040_v47 = vld [vmem:[%s10674_s1 + $0x140] ss:$16 sps:$4 sm:$0xff]   ;;  %v7041_v48 = vld [vmem:[%s10674_s1 + $0x148] ss:$16 sps:$4 sm:$0xff]  }
  0x10   :  { %3906 = vmatprep.subr.bf16.mxu0 %v7000_v16  ;;  %4316 = vmatprep.subr.bf16.mxu1 %v7002_v17  ;;  %v8325_v49 = vsub.s32 %v673_v43, %v8307_v42  ;;  %v7042_v50 = vld [vmem:[%s10674_s1 + $0x164] ss:$16 sps:$4 sm:$0xff]   ;;  %v7044_v51 = vld [vmem:[%s10674_s1 + $0x16c] ss:$16 sps:$4 sm:$0xff]   ;;  %v7046_v53 = vld [vmem:[%s10674_s1 + $0x160] ss:$16 sps:$4 sm:$0xff]  }
  0x11   :  { %v8336_v52 = vld [vmem:[%s10673_s0] sm:$0xff]  ;;  %v7047_v55 = vld [vmem:[%s10674_s1 + $0x168] ss:$16 sps:$4 sm:$0xff]   ;;  %v7050_v57 = vld [vmem:[%s10674_s1 + $0x18c] ss:$16 sps:$4 sm:$0xff]  }
  0x12   :  { %v677_v54 = vrot.slane %v8336_v52, %v8325_v49  ;;  %v7048_v56 = vld [vmem:[%s10674_s1 + $0x184] ss:$16 sps:$4 sm:$0xff]   ;;  %v7052_v59 = vld [vmem:[%s10674_s1 + $0x180] ss:$16 sps:$4 sm:$0xff]   ;;  %v7053_v61 = vld [vmem:[%s10674_s1 + $0x188] ss:$16 sps:$4 sm:$0xff]  }
  0x13   :  { %3907 = vmatpush1.bf16.msra.mxu0 %v7004_v18  ;;  %4317 = vmatpush1.bf16.msra.mxu1 %v7005_v19  ;;  %v7054_v62 = vld [vmem:[%s10674_s1 + $0x1a4] ss:$16 sps:$4 sm:$0xff]   ;;  %v7056_v63 = vld [vmem:[%s10674_s1 + $0x1ac] ss:$16 sps:$4 sm:$0xff]   ;;  %v7058_v0 = vld [vmem:[%s10674_s1 + $0x1a0] ss:$16 sps:$4 sm:$0xff]  }
  0x14   :  { %3908 = vmatprep.subr.bf16.mxu0 %v7006_v20  ;;  %4318 = vmatprep.subr.bf16.mxu1 %v7008_v21  ;;  %v685_v58 = vcombine.high %v677_v54, %v677_v54  ;;  %v7059_v1 = vld [vmem:[%s10674_s1 + $0x1a8] ss:$16 sps:$4 sm:$0xff]   ;;  %v7060_v2 = vld [vmem:[%s10674_s1 + $0x1c4] ss:$16 sps:$4 sm:$0xff]   ;;  %v7062_v3 = vld [vmem:[%s10674_s1 + $0x1cc] ss:$16 sps:$4 sm:$0xff]   ;;  %v8405_v13 = vrot.slane %v677_v54, %v8325_v49 }
  0x15   :  { %v7064_v4 = vld [vmem:[%s10674_s1 + $0x1c0] ss:$16 sps:$4 sm:$0xff]   ;;  %v7065_v5 = vld [vmem:[%s10674_s1 + $0x1c8] ss:$16 sps:$4 sm:$0xff]   ;;  %v7066_v6 = vld [vmem:[%s10674_s1 + $0x1e4] ss:$16 sps:$4 sm:$0xff]  }
  0x16   :  { %v707_v60 = vrot.slane %v685_v58, %v8325_v49  ;;  %v7068_v7 = vld [vmem:[%s10674_s1 + $0x1ec] ss:$16 sps:$4 sm:$0xff]   ;;  %v7070_v8 = vld [vmem:[%s10674_s1 + $0x1e0] ss:$16 sps:$4 sm:$0xff]   ;;  %v7071_v9 = vld [vmem:[%s10674_s1 + $0x1e8] ss:$16 sps:$4 sm:$0xff]  }
  0x17   :  { %3909 = vmatpush1.bf16.msra.mxu0 %v7010_v22  ;;  %4319 = vmatpush1.bf16.msra.mxu1 %v7011_v23  ;;  %v7074_v10 = vld [vmem:[%s10674_s1 + $0x204] ss:$16 sps:$4 sm:$0xff]   ;;  %v7077_v11 = vld [vmem:[%s10674_s1 + $0x20c] ss:$16 sps:$4 sm:$0xff]   ;;  %v7072_v12 = vld [vmem:[%s10674_s1 + $0x200] ss:$16 sps:$4 sm:$0xff]  }
  0x18   :  { %3910 = vmatprep.subr.bf16.mxu0 %v7012_v24  ;;  %4320 = vmatprep.subr.bf16.mxu1 %v7014_v25  ;;  %v7075_v14 = vld [vmem:[%s10674_s1 + $0x208] ss:$16 sps:$4 sm:$0xff]   ;;  %v7080_v15 = vld [vmem:[%s10674_s1 + $0x224] ss:$16 sps:$4 sm:$0xff]   ;;  %v7083_v16 = vld [vmem:[%s10674_s1 + $0x22c] ss:$16 sps:$4 sm:$0xff]   ;;  %v717_v17 = vcombine.high %v707_v60, %v707_v60 }
  0x19   :  { %3930 = vmatprep.mubr.bf16.mxu0 %v707_v60  ;;  %4340 = vmatprep.mubr.bf16.mxu1 %v707_v60  ;;  %v7078_v18 = vld [vmem:[%s10674_s1 + $0x220] ss:$16 sps:$4 sm:$0xff]   ;;  %v7081_v19 = vld [vmem:[%s10674_s1 + $0x228] ss:$16 sps:$4 sm:$0xff]   ;;  %v7086_v20 = vld [vmem:[%s10674_s1 + $0x244] ss:$16 sps:$4 sm:$0xff]  }
  0x1a   :  { %v7089_v21 = vld [vmem:[%s10674_s1 + $0x24c] ss:$16 sps:$4 sm:$0xff]   ;;  %v7084_v22 = vld [vmem:[%s10674_s1 + $0x240] ss:$16 sps:$4 sm:$0xff]   ;;  %v7087_v23 = vld [vmem:[%s10674_s1 + $0x248] ss:$16 sps:$4 sm:$0xff]  }
  0x1b   :  { %3911 = vmatpush1.bf16.msra.mxu0 %v7016_v26  ;;  %4321 = vmatpush1.bf16.msra.mxu1 %v7017_v27  ;;  %v7092_v24 = vld [vmem:[%s10674_s1 + $0x264] ss:$16 sps:$4 sm:$0xff]   ;;  %v7095_v25 = vld [vmem:[%s10674_s1 + $0x26c] ss:$16 sps:$4 sm:$0xff]   ;;  %v7090_v26 = vld [vmem:[%s10674_s1 + $0x260] ss:$16 sps:$4 sm:$0xff]  }
  0x1c   :  { %3912 = vmatprep.subr.bf16.mxu0 %v7018_v28  ;;  %4322 = vmatprep.subr.bf16.mxu1 %v7020_v29  ;;  %v7093_v27 = vld [vmem:[%s10674_s1 + $0x268] ss:$16 sps:$4 sm:$0xff]   ;;  %v7098_v28 = vld [vmem:[%s10674_s1 + $0x284] ss:$16 sps:$4 sm:$0xff]   ;;  %v7101_v29 = vld [vmem:[%s10674_s1 + $0x28c] ss:$16 sps:$4 sm:$0xff]  }
  0x1d   :  { %v7110_v36 = vld [vmem:[%s10674_s1 + $0x2c4] ss:$16 sps:$4 sm:$0xff]   ;;  %v7113_v37 = vld [vmem:[%s10674_s1 + $0x2cc] ss:$16 sps:$4 sm:$0xff]   ;;  %v7108_v38 = vld [vmem:[%s10674_s1 + $0x2c0] ss:$16 sps:$4 sm:$0xff]  }
  0x1e   :  { %v7114_v43 = vld [vmem:[%s10674_s1 + $0x2e0] ss:$16 sps:$4 sm:$0xff]   ;;  %v7129_v54 = vld [vmem:[%s10674_s1 + $0x328] ss:$16 sps:$4 sm:$0xff]   ;;  %v7143_v60 = vld [vmem:[%s10674_s1 + $0x36c] ss:$16 sps:$4 sm:$0xff]  }
  0x1f   :  { %3913 = vmatpush1.bf16.msra.mxu0 %v7022_v30  ;;  %4323 = vmatpush1.bf16.msra.mxu1 %v7023_v31  ;;  %v7096_v30 = vld [vmem:[%s10674_s1 + $0x280] ss:$16 sps:$4 sm:$0xff]   ;;  %v7099_v31 = vld [vmem:[%s10674_s1 + $0x288] ss:$16 sps:$4 sm:$0xff]  }
  0x20   :  { %3914 = vmatprep.subr.bf16.mxu0 %v7024_v32  ;;  %4324 = vmatprep.subr.bf16.mxu1 %v7026_v33  ;;  %v7104_v32 = vld [vmem:[%s10674_s1 + $0x2a4] ss:$16 sps:$4 sm:$0xff]   ;;  %v7107_v33 = vld [vmem:[%s10674_s1 + $0x2ac] ss:$16 sps:$4 sm:$0xff]   ;;  %v7135_v58 = vld [vmem:[%s10674_s1 + $0x348] ss:$16 sps:$4 sm:$0xff]  }
  0x23   :  { %3915 = vmatpush1.bf16.msra.mxu0 %v7028_v34  ;;  %4325 = vmatpush1.bf16.msra.mxu1 %v7029_v35  ;;  %v7102_v34 = vld [vmem:[%s10674_s1 + $0x2a0] ss:$16 sps:$4 sm:$0xff]   ;;  %v7105_v35 = vld [vmem:[%s10674_s1 + $0x2a8] ss:$16 sps:$4 sm:$0xff]  }
  0x24   :  { %3916 = vmatprep.subr.bf16.mxu0 %v7030_v39  ;;  %4326 = vmatprep.subr.bf16.mxu1 %v7032_v40  ;;  %v7111_v39 = vld [vmem:[%s10674_s1 + $0x2c8] ss:$16 sps:$4 sm:$0xff]   ;;  %v7116_v40 = vld [vmem:[%s10674_s1 + $0x2e4] ss:$16 sps:$4 sm:$0xff]  }
  0x27   :  { %3917 = vmatpush1.bf16.msra.mxu0 %v7034_v41  ;;  %4327 = vmatpush1.bf16.msra.mxu1 %v7035_v44  ;;  %v7119_v41 = vld [vmem:[%s10674_s1 + $0x2ec] ss:$16 sps:$4 sm:$0xff]   ;;  %v7117_v44 = vld [vmem:[%s10674_s1 + $0x2e8] ss:$16 sps:$4 sm:$0xff]  }
  0x28   :  { %3918 = vmatprep.subr.bf16.mxu0 %v7036_v45  ;;  %4328 = vmatprep.subr.bf16.mxu1 %v7038_v46  ;;  %v7122_v45 = vld [vmem:[%s10674_s1 + $0x304] ss:$16 sps:$4 sm:$0xff]   ;;  %v7125_v46 = vld [vmem:[%s10674_s1 + $0x30c] ss:$16 sps:$4 sm:$0xff]  }
  0x2b   :  { %3919 = vmatpush1.bf16.msra.mxu0 %v7040_v47  ;;  %4329 = vmatpush1.bf16.msra.mxu1 %v7041_v48  ;;  %v7120_v47 = vld [vmem:[%s10674_s1 + $0x300] ss:$16 sps:$4 sm:$0xff]   ;;  %v7123_v48 = vld [vmem:[%s10674_s1 + $0x308] ss:$16 sps:$4 sm:$0xff]  }
  0x2c   :  { %3920 = vmatprep.subr.bf16.mxu0 %v7042_v50  ;;  %4330 = vmatprep.subr.bf16.mxu1 %v7044_v51  ;;  %v7128_v50 = vld [vmem:[%s10674_s1 + $0x324] ss:$16 sps:$4 sm:$0xff]   ;;  %v7131_v51 = vld [vmem:[%s10674_s1 + $0x32c] ss:$16 sps:$4 sm:$0xff]  }
  0x2f   :  { %3921 = vmatpush1.bf16.msra.mxu0 %v7046_v53  ;;  %4331 = vmatpush1.bf16.msra.mxu1 %v7047_v55  ;;  %v7126_v53 = vld [vmem:[%s10674_s1 + $0x320] ss:$16 sps:$4 sm:$0xff]   ;;  %v7134_v55 = vld [vmem:[%s10674_s1 + $0x344] ss:$16 sps:$4 sm:$0xff]  }
  0x30   :  { %3922 = vmatprep.subr.bf16.mxu0 %v7048_v56  ;;  %4332 = vmatprep.subr.bf16.mxu1 %v7050_v57  ;;  %v7137_v56 = vld [vmem:[%s10674_s1 + $0x34c] ss:$16 sps:$4 sm:$0xff]   ;;  %v7132_v57 = vld [vmem:[%s10674_s1 + $0x340] ss:$16 sps:$4 sm:$0xff]  }
  0x33   :  { %3923 = vmatpush1.bf16.msra.mxu0 %v7052_v59  ;;  %4333 = vmatpush1.bf16.msra.mxu1 %v7053_v61  ;;  %v7140_v59 = vld [vmem:[%s10674_s1 + $0x364] ss:$16 sps:$4 sm:$0xff]   ;;  %v7138_v61 = vld [vmem:[%s10674_s1 + $0x360] ss:$16 sps:$4 sm:$0xff]  }
  0x34   :  { %3924 = vmatprep.subr.bf16.mxu0 %v7054_v62  ;;  %4334 = vmatprep.subr.bf16.mxu1 %v7056_v63  ;;  %v7141_v62 = vld [vmem:[%s10674_s1 + $0x368] ss:$16 sps:$4 sm:$0xff]   ;;  %v7146_v63 = vld [vmem:[%s10674_s1 + $0x384] ss:$16 sps:$4 sm:$0xff]  }
  0x37   :  { %3925 = vmatpush1.bf16.msra.mxu0 %v7058_v0  ;;  %4335 = vmatpush1.bf16.msra.mxu1 %v7059_v1  ;;  %v7149_v0 = vld [vmem:[%s10674_s1 + $0x38c] ss:$16 sps:$4 sm:$0xff]   ;;  %v7144_v1 = vld [vmem:[%s10674_s1 + $0x380] ss:$16 sps:$4 sm:$0xff]  }
  0x38   :  { %3926 = vmatprep.subr.bf16.mxu0 %v7060_v2  ;;  %4336 = vmatprep.subr.bf16.mxu1 %v7062_v3  ;;  %v7147_v2 = vld [vmem:[%s10674_s1 + $0x388] ss:$16 sps:$4 sm:$0xff]   ;;  %v7152_v3 = vld [vmem:[%s10674_s1 + $0x3a4] ss:$16 sps:$4 sm:$0xff]  }
  0x3b   :  { %3927 = vmatpush1.bf16.msra.mxu0 %v7064_v4  ;;  %4337 = vmatpush1.bf16.msra.mxu1 %v7065_v5  ;;  %v7155_v4 = vld [vmem:[%s10674_s1 + $0x3ac] ss:$16 sps:$4 sm:$0xff]   ;;  %v7150_v5 = vld [vmem:[%s10674_s1 + $0x3a0] ss:$16 sps:$4 sm:$0xff]  }
  0x3c   :  { %3928 = vmatprep.subr.bf16.mxu0 %v7066_v6  ;;  %4338 = vmatprep.subr.bf16.mxu1 %v7068_v7  ;;  %v7153_v6 = vld [vmem:[%s10674_s1 + $0x3a8] ss:$16 sps:$4 sm:$0xff]   ;;  %v7158_v7 = vld [vmem:[%s10674_s1 + $0x3c4] ss:$16 sps:$4 sm:$0xff]  }
  0x3f   :  { %3929 = vmatpush1.bf16.msra.mxu0 %v7070_v8  ;;  %4339 = vmatpush1.bf16.msra.mxu1 %v7071_v9  ;;  %v7161_v8 = vld [vmem:[%s10674_s1 + $0x3cc] ss:$16 sps:$4 sm:$0xff]   ;;  %v670_v9 = vcombine.high %v8336_v52, %v8336_v52 }
  0x40   :  { %3939 = vmatprep.subr.bf16.mxu0 %v7074_v10  ;;  %4349 = vmatprep.subr.bf16.mxu1 %v7077_v11  ;;  %v7156_v10 = vld [vmem:[%s10674_s1 + $0x3c0] ss:$16 sps:$4 sm:$0xff]   ;;  %v7159_v11 = vld [vmem:[%s10674_s1 + $0x3c8] ss:$16 sps:$4 sm:$0xff]   ;;  %v7167_v52 = vld [vmem:[%s10674_s1 + $0x3ec] ss:$16 sps:$4 sm:$0xff]  }
  0x42   :  { %3931 = vmatmul.mubr.bf16.vlgmr.msra.gmra.mrb[0].mxu0 %v8405_v13  ;;  %4341 = vmatmul.mubr.bf16.vlgmr.msra.gmra.mrb[0].mxu1 %v8405_v13 }
  0x43   :  { %3940 = vmatpush1.bf16.msra.mxu0 %v7072_v12  ;;  %4350 = vmatpush1.bf16.msra.mxu1 %v7075_v14  ;;  %v7164_v12 = vld [vmem:[%s10674_s1 + $0x3e4] ss:$16 sps:$4 sm:$0xff]   ;;  %v8589_v14 = vrot.slane %v670_v9, %v8325_v49  ;;  %v7243_v9 = vld [vmem:[%s10674_s1 + $0x588] ss:$16 sps:$4 sm:$0xff]  }
  0x44   :  { %3941 = vmatprep.subr.bf16.mxu0 %v7080_v15  ;;  %4351 = vmatprep.subr.bf16.mxu1 %v7083_v16  ;;  %v7162_v15 = vld [vmem:[%s10674_s1 + $0x3e0] ss:$16 sps:$4 sm:$0xff]   ;;  %v7165_v16 = vld [vmem:[%s10674_s1 + $0x3e8] ss:$16 sps:$4 sm:$0xff]  }
  0x45   :  { %3971 = vmatprep.mubr.bf16.mxu0 %v717_v17  ;;  %4381 = vmatprep.mubr.bf16.mxu1 %v717_v17  ;;  %v7170_v17 = vld [vmem:[%s10674_s1 + $0x404] ss:$16 sps:$4 sm:$0xff]  }
  0x47   :  { %3942 = vmatpush1.bf16.msra.mxu0 %v7078_v18  ;;  %4352 = vmatpush1.bf16.msra.mxu1 %v7081_v19  ;;  %v7173_v18 = vld [vmem:[%s10674_s1 + $0x40c] ss:$16 sps:$4 sm:$0xff]   ;;  %v686_v19 = vcombine.high %v8589_v14, %v8589_v14 }
  0x48   :  { %3943 = vmatprep.subr.bf16.mxu0 %v7086_v20  ;;  %4353 = vmatprep.subr.bf16.mxu1 %v7089_v21  ;;  %v7168_v20 = vld [vmem:[%s10674_s1 + $0x400] ss:$16 sps:$4 sm:$0xff]   ;;  %v715_v21 = vcombine.high %v8405_v13, %v8405_v13 }
  0x49   :  { %v7174_v13 = vld [vmem:[%s10674_s1 + $0x420] ss:$16 sps:$4 sm:$0xff]  }
  0x4b   :  { %3944 = vmatpush1.bf16.msra.mxu0 %v7084_v22  ;;  %4354 = vmatpush1.bf16.msra.mxu1 %v7087_v23  ;;  %v7171_v22 = vld [vmem:[%s10674_s1 + $0x408] ss:$16 sps:$4 sm:$0xff]   ;;  %v7176_v23 = vld [vmem:[%s10674_s1 + $0x424] ss:$16 sps:$4 sm:$0xff]  }
  0x4c   :  { %3945 = vmatprep.subr.bf16.mxu0 %v7092_v24  ;;  %4355 = vmatprep.subr.bf16.mxu1 %v7095_v25  ;;  %v7179_v24 = vld [vmem:[%s10674_s1 + $0x42c] ss:$16 sps:$4 sm:$0xff]   ;;  %v8620_v25 = vrot.slane %v686_v19, %v8325_v49  ;;  %v7260_v19 = vld [vmem:[%s10674_s1 + $0x5e4] ss:$16 sps:$4 sm:$0xff]  }
  0x4f   :  { %3946 = vmatpush1.bf16.msra.mxu0 %v7090_v26  ;;  %4356 = vmatpush1.bf16.msra.mxu1 %v7093_v27  ;;  %v7177_v26 = vld [vmem:[%s10674_s1 + $0x428] ss:$16 sps:$4 sm:$0xff]   ;;  %v7182_v27 = vld [vmem:[%s10674_s1 + $0x444] ss:$16 sps:$4 sm:$0xff]  }
  0x50   :  { %3947 = vmatprep.subr.bf16.mxu0 %v7098_v28  ;;  %4357 = vmatprep.subr.bf16.mxu1 %v7101_v29  ;;  %v7185_v28 = vld [vmem:[%s10674_s1 + $0x44c] ss:$16 sps:$4 sm:$0xff]   ;;  %v7180_v29 = vld [vmem:[%s10674_s1 + $0x440] ss:$16 sps:$4 sm:$0xff]  }
  0x53   :  { %3948 = vmatpush1.bf16.msra.mxu0 %v7096_v30  ;;  %4358 = vmatpush1.bf16.msra.mxu1 %v7099_v31  ;;  %v7183_v30 = vld [vmem:[%s10674_s1 + $0x448] ss:$16 sps:$4 sm:$0xff]   ;;  %v7188_v31 = vld [vmem:[%s10674_s1 + $0x464] ss:$16 sps:$4 sm:$0xff]  }
  0x54   :  { %3949 = vmatprep.subr.bf16.mxu0 %v7104_v32  ;;  %4359 = vmatprep.subr.bf16.mxu1 %v7107_v33  ;;  %v7191_v32 = vld [vmem:[%s10674_s1 + $0x46c] ss:$16 sps:$4 sm:$0xff]   ;;  %v7186_v33 = vld [vmem:[%s10674_s1 + $0x460] ss:$16 sps:$4 sm:$0xff]  }
  0x57   :  { %3950 = vmatpush1.bf16.msra.mxu0 %v7102_v34  ;;  %4360 = vmatpush1.bf16.msra.mxu1 %v7105_v35  ;;  %v7189_v34 = vld [vmem:[%s10674_s1 + $0x468] ss:$16 sps:$4 sm:$0xff]   ;;  %v7194_v35 = vld [vmem:[%s10674_s1 + $0x484] ss:$16 sps:$4 sm:$0xff]  }
  0x58   :  { %3951 = vmatprep.subr.bf16.mxu0 %v7110_v36  ;;  %4361 = vmatprep.subr.bf16.mxu1 %v7113_v37  ;;  %v7197_v36 = vld [vmem:[%s10674_s1 + $0x48c] ss:$16 sps:$4 sm:$0xff]   ;;  %v7192_v37 = vld [vmem:[%s10674_s1 + $0x480] ss:$16 sps:$4 sm:$0xff]  }
  0x5b   :  { %3952 = vmatpush1.bf16.msra.mxu0 %v7108_v38  ;;  %4362 = vmatpush1.bf16.msra.mxu1 %v7111_v39  ;;  %v7195_v38 = vld [vmem:[%s10674_s1 + $0x488] ss:$16 sps:$4 sm:$0xff]   ;;  %v7200_v39 = vld [vmem:[%s10674_s1 + $0x4a4] ss:$16 sps:$4 sm:$0xff]  }
  0x5c   :  { %3953 = vmatprep.subr.bf16.mxu0 %v7116_v40  ;;  %4363 = vmatprep.subr.bf16.mxu1 %v7119_v41  ;;  %v7203_v40 = vld [vmem:[%s10674_s1 + $0x4ac] ss:$16 sps:$4 sm:$0xff]   ;;  %v7198_v41 = vld [vmem:[%s10674_s1 + $0x4a0] ss:$16 sps:$4 sm:$0xff]  }
  0x5f   :  { %3954 = vmatpush1.bf16.msra.mxu0 %v7114_v43  ;;  %4364 = vmatpush1.bf16.msra.mxu1 %v7117_v44  ;;  %v7201_v43 = vld [vmem:[%s10674_s1 + $0x4a8] ss:$16 sps:$4 sm:$0xff]   ;;  %v7206_v44 = vld [vmem:[%s10674_s1 + $0x4c4] ss:$16 sps:$4 sm:$0xff]  }
  0x60   :  { %3955 = vmatprep.subr.bf16.mxu0 %v7122_v45  ;;  %4365 = vmatprep.subr.bf16.mxu1 %v7125_v46  ;;  %v7209_v45 = vld [vmem:[%s10674_s1 + $0x4cc] ss:$16 sps:$4 sm:$0xff]   ;;  %v7204_v46 = vld [vmem:[%s10674_s1 + $0x4c0] ss:$16 sps:$4 sm:$0xff]  }
  0x63   :  { %3956 = vmatpush1.bf16.msra.mxu0 %v7120_v47  ;;  %4366 = vmatpush1.bf16.msra.mxu1 %v7123_v48  ;;  %v7207_v47 = vld [vmem:[%s10674_s1 + $0x4c8] ss:$16 sps:$4 sm:$0xff]   ;;  %v7212_v48 = vld [vmem:[%s10674_s1 + $0x4e4] ss:$16 sps:$4 sm:$0xff]  }
  0x64   :  { %3957 = vmatprep.subr.bf16.mxu0 %v7128_v50  ;;  %4367 = vmatprep.subr.bf16.mxu1 %v7131_v51  ;;  %v7215_v50 = vld [vmem:[%s10674_s1 + $0x4ec] ss:$16 sps:$4 sm:$0xff]   ;;  %v7210_v51 = vld [vmem:[%s10674_s1 + $0x4e0] ss:$16 sps:$4 sm:$0xff]  }
  0x67   :  { %3958 = vmatpush1.bf16.msra.mxu0 %v7126_v53  ;;  %4368 = vmatpush1.bf16.msra.mxu1 %v7129_v54  ;;  %v7213_v53 = vld [vmem:[%s10674_s1 + $0x4e8] ss:$16 sps:$4 sm:$0xff]   ;;  %v7218_v54 = vld [vmem:[%s10674_s1 + $0x504] ss:$16 sps:$4 sm:$0xff]  }
  0x68   :  { %3959 = vmatprep.subr.bf16.mxu0 %v7134_v55  ;;  %4369 = vmatprep.subr.bf16.mxu1 %v7137_v56  ;;  %v7221_v55 = vld [vmem:[%s10674_s1 + $0x50c] ss:$16 sps:$4 sm:$0xff]   ;;  %v7216_v56 = vld [vmem:[%s10674_s1 + $0x500] ss:$16 sps:$4 sm:$0xff]  }
  0x6b   :  { %3960 = vmatpush1.bf16.msra.mxu0 %v7132_v57  ;;  %4370 = vmatpush1.bf16.msra.mxu1 %v7135_v58  ;;  %v7219_v57 = vld [vmem:[%s10674_s1 + $0x508] ss:$16 sps:$4 sm:$0xff]   ;;  %v7224_v58 = vld [vmem:[%s10674_s1 + $0x524] ss:$16 sps:$4 sm:$0xff]  }
  0x6c   :  { %3961 = vmatprep.subr.bf16.mxu0 %v7140_v59  ;;  %4371 = vmatprep.subr.bf16.mxu1 %v7143_v60  ;;  %v7227_v59 = vld [vmem:[%s10674_s1 + $0x52c] ss:$16 sps:$4 sm:$0xff]   ;;  %v7222_v60 = vld [vmem:[%s10674_s1 + $0x520] ss:$16 sps:$4 sm:$0xff]  }
  0x6f   :  { %3962 = vmatpush1.bf16.msra.mxu0 %v7138_v61  ;;  %4372 = vmatpush1.bf16.msra.mxu1 %v7141_v62  ;;  %v7225_v61 = vld [vmem:[%s10674_s1 + $0x528] ss:$16 sps:$4 sm:$0xff]   ;;  %v7230_v62 = vld [vmem:[%s10674_s1 + $0x544] ss:$16 sps:$4 sm:$0xff]  }
  0x70   :  { %3963 = vmatprep.subr.bf16.mxu0 %v7146_v63  ;;  %4373 = vmatprep.subr.bf16.mxu1 %v7149_v0  ;;  %v7233_v63 = vld [vmem:[%s10674_s1 + $0x54c] ss:$16 sps:$4 sm:$0xff]   ;;  %v7228_v0 = vld [vmem:[%s10674_s1 + $0x540] ss:$16 sps:$4 sm:$0xff]  }
  0x73   :  { %3964 = vmatpush1.bf16.msra.mxu0 %v7144_v1  ;;  %4374 = vmatpush1.bf16.msra.mxu1 %v7147_v2  ;;  %v7231_v1 = vld [vmem:[%s10674_s1 + $0x548] ss:$16 sps:$4 sm:$0xff]   ;;  %v7236_v2 = vld [vmem:[%s10674_s1 + $0x564] ss:$16 sps:$4 sm:$0xff]  }
  0x74   :  { %3965 = vmatprep.subr.bf16.mxu0 %v7152_v3  ;;  %4375 = vmatprep.subr.bf16.mxu1 %v7155_v4  ;;  %v7239_v3 = vld [vmem:[%s10674_s1 + $0x56c] ss:$16 sps:$4 sm:$0xff]   ;;  %v7234_v4 = vld [vmem:[%s10674_s1 + $0x560] ss:$16 sps:$4 sm:$0xff]  }
  0x77   :  { %3966 = vmatpush1.bf16.msra.mxu0 %v7150_v5  ;;  %4376 = vmatpush1.bf16.msra.mxu1 %v7153_v6  ;;  %v7237_v5 = vld [vmem:[%s10674_s1 + $0x568] ss:$16 sps:$4 sm:$0xff]   ;;  %v7242_v6 = vld [vmem:[%s10674_s1 + $0x584] ss:$16 sps:$4 sm:$0xff]  }
  0x78   :  { %3967 = vmatprep.subr.bf16.mxu0 %v7158_v7  ;;  %4377 = vmatprep.subr.bf16.mxu1 %v7161_v8  ;;  %v7245_v7 = vld [vmem:[%s10674_s1 + $0x58c] ss:$16 sps:$4 sm:$0xff]   ;;  %v7240_v8 = vld [vmem:[%s10674_s1 + $0x580] ss:$16 sps:$4 sm:$0xff]  }
  0x7b   :  { %3968 = vmatpush1.bf16.msra.mxu0 %v7156_v10  ;;  %4378 = vmatpush1.bf16.msra.mxu1 %v7159_v11  ;;  %v7248_v10 = vld [vmem:[%s10674_s1 + $0x5a4] ss:$16 sps:$4 sm:$0xff]   ;;  %v7251_v11 = vld [vmem:[%s10674_s1 + $0x5ac] ss:$16 sps:$4 sm:$0xff]  }
  0x7c   :  { %3969 = vmatprep.subr.bf16.mxu0 %v7164_v12  ;;  %4379 = vmatprep.subr.bf16.mxu1 %v7167_v52  ;;  %v7246_v12 = vld [vmem:[%s10674_s1 + $0x5a0] ss:$16 sps:$4 sm:$0xff]   ;;  %v7249_v52 = vld [vmem:[%s10674_s1 + $0x5a8] ss:$16 sps:$4 sm:$0xff]  }
  0x7f   :  { %3970 = vmatpush1.bf16.msra.mxu0 %v7162_v15  ;;  %4380 = vmatpush1.bf16.msra.mxu1 %v7165_v16  ;;  %v7254_v15 = vld [vmem:[%s10674_s1 + $0x5c4] ss:$16 sps:$4 sm:$0xff]   ;;  %v7257_v16 = vld [vmem:[%s10674_s1 + $0x5cc] ss:$16 sps:$4 sm:$0xff]  }
  0x80   :  { %3980 = vmatprep.subr.bf16.mxu0 %v7170_v17  ;;  %4390 = vmatprep.subr.bf16.mxu1 %v7173_v18  ;;  %v7252_v17 = vld [vmem:[%s10674_s1 + $0x5c0] ss:$16 sps:$4 sm:$0xff]   ;;  %v7255_v18 = vld [vmem:[%s10674_s1 + $0x5c8] ss:$16 sps:$4 sm:$0xff]  }
  0x82   :  { %3972 = vmatmul.mubr.bf16.vlgmr.msra.gmra.mrb[0].mxu0 %v715_v21  ;;  %4382 = vmatmul.mubr.bf16.vlgmr.msra.gmra.mrb[0].mxu1 %v715_v21  ;;  %v7258_v21 = vld [vmem:[%s10674_s1 + $0x5e0] ss:$16 sps:$4 sm:$0xff]  }
  0x83   :  { %3981 = vmatpush1.bf16.msra.mxu0 %v7168_v20  ;;  %4391 = vmatpush1.bf16.msra.mxu1 %v7171_v22  ;;  %v7263_v20 = vld [vmem:[%s10674_s1 + $0x5ec] ss:$16 sps:$4 sm:$0xff]   ;;  %v7261_v22 = vld [vmem:[%s10674_s1 + $0x5e8] ss:$16 sps:$4 sm:$0xff]  }
  0x84   :  { %3982 = vmatprep.subr.bf16.mxu0 %v7176_v23  ;;  %4392 = vmatprep.subr.bf16.mxu1 %v7179_v24  ;;  %v7267_v23 = vld [vmem:[%s10674_s1 + $0x604] ss:$16 sps:$4 sm:$0xff]   ;;  %v7270_v24 = vld [vmem:[%s10674_s1 + $0x60c] ss:$16 sps:$4 sm:$0xff]  }
  0x85   :  { %4012 = vmatprep.mubr.bf16.mxu0 %v8620_v25  ;;  %4422 = vmatprep.mubr.bf16.mxu1 %v8620_v25 }
  0x87   :  { %3983 = vmatpush1.bf16.msra.mxu0 %v7174_v13  ;;  %4393 = vmatpush1.bf16.msra.mxu1 %v7177_v26  ;;  %v7265_v13 = vld [vmem:[%s10674_s1 + $0x600] ss:$16 sps:$4 sm:$0xff]   ;;  %v8809_v26 = vrot.slane %v8589_v14, %v8325_v49  ;;  %v718_v14 = vcombine.high %v8620_v25, %v8620_v25  ;;  %v7279_v25 = vld [vmem:[%s10674_s1 + $0x644] ss:$16 sps:$4 sm:$0xff]  }
  0x88   :  { %3984 = vmatprep.subr.bf16.mxu0 %v7182_v27  ;;  %4394 = vmatprep.subr.bf16.mxu1 %v7185_v28  ;;  %v7268_v27 = vld [vmem:[%s10674_s1 + $0x608] ss:$16 sps:$4 sm:$0xff]   ;;  %v7273_v28 = vld [vmem:[%s10674_s1 + $0x624] ss:$16 sps:$4 sm:$0xff]  }
  0x8b   :  { %3985 = vmatpush1.bf16.msra.mxu0 %v7180_v29  ;;  %4395 = vmatpush1.bf16.msra.mxu1 %v7183_v30  ;;  %v7276_v29 = vld [vmem:[%s10674_s1 + $0x62c] ss:$16 sps:$4 sm:$0xff]   ;;  %v7271_v30 = vld [vmem:[%s10674_s1 + $0x620] ss:$16 sps:$4 sm:$0xff]  }
  0x8c   :  { %3986 = vmatprep.subr.bf16.mxu0 %v7188_v31  ;;  %4396 = vmatprep.subr.bf16.mxu1 %v7191_v32  ;;  %v7274_v31 = vld [vmem:[%s10674_s1 + $0x628] ss:$16 sps:$4 sm:$0xff]   ;;  %v7282_v32 = vld [vmem:[%s10674_s1 + $0x64c] ss:$16 sps:$4 sm:$0xff]  }
  0x8f   :  { %3987 = vmatpush1.bf16.msra.mxu0 %v7186_v33  ;;  %4397 = vmatpush1.bf16.msra.mxu1 %v7189_v34  ;;  %v7277_v33 = vld [vmem:[%s10674_s1 + $0x640] ss:$16 sps:$4 sm:$0xff]   ;;  %v7280_v34 = vld [vmem:[%s10674_s1 + $0x648] ss:$16 sps:$4 sm:$0xff]  }
  0x90   :  { %3988 = vmatprep.subr.bf16.mxu0 %v7194_v35  ;;  %4398 = vmatprep.subr.bf16.mxu1 %v7197_v36  ;;  %v7285_v35 = vld [vmem:[%s10674_s1 + $0x664] ss:$16 sps:$4 sm:$0xff]   ;;  %v7288_v36 = vld [vmem:[%s10674_s1 + $0x66c] ss:$16 sps:$4 sm:$0xff]  }
  0x93   :  { %3989 = vmatpush1.bf16.msra.mxu0 %v7192_v37  ;;  %4399 = vmatpush1.bf16.msra.mxu1 %v7195_v38  ;;  %v7283_v37 = vld [vmem:[%s10674_s1 + $0x660] ss:$16 sps:$4 sm:$0xff]   ;;  %v7286_v38 = vld [vmem:[%s10674_s1 + $0x668] ss:$16 sps:$4 sm:$0xff]  }
  0x94   :  { %3990 = vmatprep.subr.bf16.mxu0 %v7200_v39  ;;  %4400 = vmatprep.subr.bf16.mxu1 %v7203_v40  ;;  %v7291_v39 = vld [vmem:[%s10674_s1 + $0x684] ss:$16 sps:$4 sm:$0xff]   ;;  %v7294_v40 = vld [vmem:[%s10674_s1 + $0x68c] ss:$16 sps:$4 sm:$0xff]  }
  0x97   :  { %3991 = vmatpush1.bf16.msra.mxu0 %v7198_v41  ;;  %4401 = vmatpush1.bf16.msra.mxu1 %v7201_v43  ;;  %v7289_v41 = vld [vmem:[%s10674_s1 + $0x680] ss:$16 sps:$4 sm:$0xff]   ;;  %v7292_v43 = vld [vmem:[%s10674_s1 + $0x688] ss:$16 sps:$4 sm:$0xff]  }
  0x98   :  { %3992 = vmatprep.subr.bf16.mxu0 %v7206_v44  ;;  %4402 = vmatprep.subr.bf16.mxu1 %v7209_v45  ;;  %v7297_v44 = vld [vmem:[%s10674_s1 + $0x6a4] ss:$16 sps:$4 sm:$0xff]   ;;  %v7300_v45 = vld [vmem:[%s10674_s1 + $0x6ac] ss:$16 sps:$4 sm:$0xff]  }
  0x9b   :  { %3993 = vmatpush1.bf16.msra.mxu0 %v7204_v46  ;;  %4403 = vmatpush1.bf16.msra.mxu1 %v7207_v47  ;;  %v7295_v46 = vld [vmem:[%s10674_s1 + $0x6a0] ss:$16 sps:$4 sm:$0xff]   ;;  %v7298_v47 = vld [vmem:[%s10674_s1 + $0x6a8] ss:$16 sps:$4 sm:$0xff]  }
  0x9c   :  { %3994 = vmatprep.subr.bf16.mxu0 %v7212_v48  ;;  %4404 = vmatprep.subr.bf16.mxu1 %v7215_v50  ;;  %v7303_v48 = vld [vmem:[%s10674_s1 + $0x6c4] ss:$16 sps:$4 sm:$0xff]   ;;  %v7306_v50 = vld [vmem:[%s10674_s1 + $0x6cc] ss:$16 sps:$4 sm:$0xff]  }
  0x9f   :  { %3995 = vmatpush1.bf16.msra.mxu0 %v7210_v51  ;;  %4405 = vmatpush1.bf16.msra.mxu1 %v7213_v53  ;;  %v7301_v51 = vld [vmem:[%s10674_s1 + $0x6c0] ss:$16 sps:$4 sm:$0xff]   ;;  %v7304_v53 = vld [vmem:[%s10674_s1 + $0x6c8] ss:$16 sps:$4 sm:$0xff]  }
  0xa0   :  { %3996 = vmatprep.subr.bf16.mxu0 %v7218_v54  ;;  %4406 = vmatprep.subr.bf16.mxu1 %v7221_v55  ;;  %v7309_v54 = vld [vmem:[%s10674_s1 + $0x6e4] ss:$16 sps:$4 sm:$0xff]   ;;  %v7312_v55 = vld [vmem:[%s10674_s1 + $0x6ec] ss:$16 sps:$4 sm:$0xff]  }
  0xa3   :  { %3997 = vmatpush1.bf16.msra.mxu0 %v7216_v56  ;;  %4407 = vmatpush1.bf16.msra.mxu1 %v7219_v57  ;;  %v7307_v56 = vld [vmem:[%s10674_s1 + $0x6e0] ss:$16 sps:$4 sm:$0xff]   ;;  %v7310_v57 = vld [vmem:[%s10674_s1 + $0x6e8] ss:$16 sps:$4 sm:$0xff]  }
  0xa4   :  { %3998 = vmatprep.subr.bf16.mxu0 %v7224_v58  ;;  %4408 = vmatprep.subr.bf16.mxu1 %v7227_v59  ;;  %v7315_v58 = vld [vmem:[%s10674_s1 + $0x704] ss:$16 sps:$4 sm:$0xff]   ;;  %v7318_v59 = vld [vmem:[%s10674_s1 + $0x70c] ss:$16 sps:$4 sm:$0xff]  }
  0xa7   :  { %3999 = vmatpush1.bf16.msra.mxu0 %v7222_v60  ;;  %4409 = vmatpush1.bf16.msra.mxu1 %v7225_v61  ;;  %v7313_v60 = vld [vmem:[%s10674_s1 + $0x700] ss:$16 sps:$4 sm:$0xff]   ;;  %v7316_v61 = vld [vmem:[%s10674_s1 + $0x708] ss:$16 sps:$4 sm:$0xff]  }
  0xa8   :  { %4000 = vmatprep.subr.bf16.mxu0 %v7230_v62  ;;  %4410 = vmatprep.subr.bf16.mxu1 %v7233_v63  ;;  %v7321_v62 = vld [vmem:[%s10674_s1 + $0x724] ss:$16 sps:$4 sm:$0xff]   ;;  %v7324_v63 = vld [vmem:[%s10674_s1 + $0x72c] ss:$16 sps:$4 sm:$0xff]  }
  0xab   :  { %4001 = vmatpush1.bf16.msra.mxu0 %v7228_v0  ;;  %4411 = vmatpush1.bf16.msra.mxu1 %v7231_v1  ;;  %v7319_v0 = vld [vmem:[%s10674_s1 + $0x720] ss:$16 sps:$4 sm:$0xff]   ;;  %v7322_v1 = vld [vmem:[%s10674_s1 + $0x728] ss:$16 sps:$4 sm:$0xff]  }
  0xac   :  { %4002 = vmatprep.subr.bf16.mxu0 %v7236_v2  ;;  %4412 = vmatprep.subr.bf16.mxu1 %v7239_v3  ;;  %v7327_v2 = vld [vmem:[%s10674_s1 + $0x744] ss:$16 sps:$4 sm:$0xff]   ;;  %v7330_v3 = vld [vmem:[%s10674_s1 + $0x74c] ss:$16 sps:$4 sm:$0xff]  }
  0xaf   :  { %4003 = vmatpush1.bf16.msra.mxu0 %v7234_v4  ;;  %4413 = vmatpush1.bf16.msra.mxu1 %v7237_v5  ;;  %v7325_v4 = vld [vmem:[%s10674_s1 + $0x740] ss:$16 sps:$4 sm:$0xff]   ;;  %v7328_v5 = vld [vmem:[%s10674_s1 + $0x748] ss:$16 sps:$4 sm:$0xff]  }
  0xb0   :  { %4004 = vmatprep.subr.bf16.mxu0 %v7242_v6  ;;  %4414 = vmatprep.subr.bf16.mxu1 %v7245_v7  ;;  %v7333_v6 = vld [vmem:[%s10674_s1 + $0x764] ss:$16 sps:$4 sm:$0xff]   ;;  %v7336_v7 = vld [vmem:[%s10674_s1 + $0x76c] ss:$16 sps:$4 sm:$0xff]  }
  0xb3   :  { %4005 = vmatpush1.bf16.msra.mxu0 %v7240_v8  ;;  %4415 = vmatpush1.bf16.msra.mxu1 %v7243_v9  ;;  %v7331_v8 = vld [vmem:[%s10674_s1 + $0x760] ss:$16 sps:$4 sm:$0xff]   ;;  %v7334_v9 = vld [vmem:[%s10674_s1 + $0x768] ss:$16 sps:$4 sm:$0xff]  }
  0xb4   :  { %4006 = vmatprep.subr.bf16.mxu0 %v7248_v10  ;;  %4416 = vmatprep.subr.bf16.mxu1 %v7251_v11  ;;  %v7339_v10 = vld [vmem:[%s10674_s1 + $0x784] ss:$16 sps:$4 sm:$0xff]   ;;  %v7342_v11 = vld [vmem:[%s10674_s1 + $0x78c] ss:$16 sps:$4 sm:$0xff]  }
  0xb7   :  { %4007 = vmatpush1.bf16.msra.mxu0 %v7246_v12  ;;  %4417 = vmatpush1.bf16.msra.mxu1 %v7249_v52  ;;  %v7337_v12 = vld [vmem:[%s10674_s1 + $0x780] ss:$16 sps:$4 sm:$0xff]   ;;  %v7340_v52 = vld [vmem:[%s10674_s1 + $0x788] ss:$16 sps:$4 sm:$0xff]  }
  0xb8   :  { %4008 = vmatprep.subr.bf16.mxu0 %v7254_v15  ;;  %4418 = vmatprep.subr.bf16.mxu1 %v7257_v16  ;;  %v7345_v15 = vld [vmem:[%s10674_s1 + $0x7a4] ss:$16 sps:$4 sm:$0xff]   ;;  %v7348_v16 = vld [vmem:[%s10674_s1 + $0x7ac] ss:$16 sps:$4 sm:$0xff]  }
  0xbb   :  { %4009 = vmatpush1.bf16.msra.mxu0 %v7252_v17  ;;  %4419 = vmatpush1.bf16.msra.mxu1 %v7255_v18  ;;  %v7343_v17 = vld [vmem:[%s10674_s1 + $0x7a0] ss:$16 sps:$4 sm:$0xff]   ;;  %v7346_v18 = vld [vmem:[%s10674_s1 + $0x7a8] ss:$16 sps:$4 sm:$0xff]  }
  0xbc   :  { %4010 = vmatprep.subr.bf16.mxu0 %v7260_v19  ;;  %4420 = vmatprep.subr.bf16.mxu1 %v7263_v20  ;;  %v7351_v19 = vld [vmem:[%s10674_s1 + $0x7c4] ss:$16 sps:$4 sm:$0xff]   ;;  %v7354_v20 = vld [vmem:[%s10674_s1 + $0x7cc] ss:$16 sps:$4 sm:$0xff]  }
  0xbf   :  { %4011 = vmatpush1.bf16.msra.mxu0 %v7258_v21  ;;  %4421 = vmatpush1.bf16.msra.mxu1 %v7261_v22  ;;  %v8983_v21 = vld.sshfl [vmem:[%s10673_s0 + $0x8] sm:$0xff pattern:$0x75316420]  ;;  %v7349_v22 = vld [vmem:[%s10674_s1 + $0x7c0] ss:$16 sps:$4 sm:$0xff]  }
  0xc0   :  { %4021 = vmatprep.subr.bf16.mxu0 %v7267_v23  ;;  %4431 = vmatprep.subr.bf16.mxu1 %v7270_v24  ;;  %v7352_v23 = vld [vmem:[%s10674_s1 + $0x7c8] ss:$16 sps:$4 sm:$0xff]   ;;  %v7357_v24 = vld [vmem:[%s10674_s1 + $0x7e4] ss:$16 sps:$4 sm:$0xff]  }
  0xc2   :  { %4013 = vmatmul.mubr.bf16.vlgmr.msra.gmra.mrb[0].mxu0 %v8809_v26  ;;  %4423 = vmatmul.mubr.bf16.vlgmr.msra.gmra.mrb[0].mxu1 %v8809_v26 }
  0xc3   :  { %4022 = vmatpush1.bf16.msra.mxu0 %v7265_v13  ;;  %4432 = vmatpush1.bf16.msra.mxu1 %v7268_v27  ;;  %v7360_v13 = vld [vmem:[%s10674_s1 + $0x7ec] ss:$16 sps:$4 sm:$0xff]   ;;  %v7355_v27 = vld [vmem:[%s10674_s1 + $0x7e0] ss:$16 sps:$4 sm:$0xff]  }
  0xc4   :  { %4023 = vmatprep.subr.bf16.mxu0 %v7273_v28  ;;  %4433 = vmatprep.subr.bf16.mxu1 %v7276_v29  ;;  %v7358_v28 = vld [vmem:[%s10674_s1 + $0x7e8] ss:$16 sps:$4 sm:$0xff]   ;;  %v7363_v29 = vld [vmem:[%s10674_s1 + $0x804] ss:$16 sps:$4 sm:$0xff]  }
  0xc5   :  { %4053 = vmatprep.mubr.bf16.mxu0 %v718_v14  ;;  %4463 = vmatprep.mubr.bf16.mxu1 %v718_v14  ;;  %v7366_v14 = vld [vmem:[%s10674_s1 + $0x80c] ss:$16 sps:$4 sm:$0xff]  }
  0xc7   :  { %4024 = vmatpush1.bf16.msra.mxu0 %v7271_v30  ;;  %4434 = vmatpush1.bf16.msra.mxu1 %v7274_v31  ;;  %v734_v30 = vcombine.high %v8983_v21, %v8983_v21  ;;  %v716_v31 = vcombine.high %v8809_v26, %v8809_v26  ;;  %v7372_v26 = vld [vmem:[%s10674_s1 + $0x82c] ss:$16 sps:$4 sm:$0xff]  }
  0xc8   :  { %4025 = vmatprep.subr.bf16.mxu0 %v7279_v25  ;;  %4435 = vmatprep.subr.bf16.mxu1 %v7282_v32  ;;  %v7361_v25 = vld [vmem:[%s10674_s1 + $0x800] ss:$16 sps:$4 sm:$0xff]   ;;  %v7364_v32 = vld [vmem:[%s10674_s1 + $0x808] ss:$16 sps:$4 sm:$0xff]  }
  0xcb   :  { %4026 = vmatpush1.bf16.msra.mxu0 %v7277_v33  ;;  %4436 = vmatpush1.bf16.msra.mxu1 %v7280_v34  ;;  %v7369_v33 = vld [vmem:[%s10674_s1 + $0x824] ss:$16 sps:$4 sm:$0xff]   ;;  %v9026_v34 = vrot.slane %v734_v30, %v8325_v49 }
  0xcc   :  { %4027 = vmatprep.subr.bf16.mxu0 %v7285_v35  ;;  %4437 = vmatprep.subr.bf16.mxu1 %v7288_v36  ;;  %v7367_v35 = vld [vmem:[%s10674_s1 + $0x820] ss:$16 sps:$4 sm:$0xff]   ;;  %v7370_v36 = vld [vmem:[%s10674_s1 + $0x828] ss:$16 sps:$4 sm:$0xff]   ;;  %v7453_v30 = vld [vmem:[%s10674_s1 + $0x9e4] ss:$16 sps:$4 sm:$0xff]  }
  0xcf   :  { %4028 = vmatpush1.bf16.msra.mxu0 %v7283_v37  ;;  %4438 = vmatpush1.bf16.msra.mxu1 %v7286_v38  ;;  %v7375_v37 = vld [vmem:[%s10674_s1 + $0x844] ss:$16 sps:$4 sm:$0xff]   ;;  %v7378_v38 = vld [vmem:[%s10674_s1 + $0x84c] ss:$16 sps:$4 sm:$0xff]  }
  0xd0   :  { %4029 = vmatprep.subr.bf16.mxu0 %v7291_v39  ;;  %4439 = vmatprep.subr.bf16.mxu1 %v7294_v40  ;;  %v7373_v39 = vld [vmem:[%s10674_s1 + $0x840] ss:$16 sps:$4 sm:$0xff]   ;;  %v7376_v40 = vld [vmem:[%s10674_s1 + $0x848] ss:$16 sps:$4 sm:$0xff]  }
  0xd3   :  { %4030 = vmatpush1.bf16.msra.mxu0 %v7289_v41  ;;  %4440 = vmatpush1.bf16.msra.mxu1 %v7292_v43  ;;  %v7381_v41 = vld [vmem:[%s10674_s1 + $0x864] ss:$16 sps:$4 sm:$0xff]   ;;  %v7384_v43 = vld [vmem:[%s10674_s1 + $0x86c] ss:$16 sps:$4 sm:$0xff]  }
  0xd4   :  { %4031 = vmatprep.subr.bf16.mxu0 %v7297_v44  ;;  %4441 = vmatprep.subr.bf16.mxu1 %v7300_v45  ;;  %v7379_v44 = vld [vmem:[%s10674_s1 + $0x860] ss:$16 sps:$4 sm:$0xff]   ;;  %v7382_v45 = vld [vmem:[%s10674_s1 + $0x868] ss:$16 sps:$4 sm:$0xff]  }
  0xd7   :  { %4032 = vmatpush1.bf16.msra.mxu0 %v7295_v46  ;;  %4442 = vmatpush1.bf16.msra.mxu1 %v7298_v47  ;;  %v7387_v46 = vld [vmem:[%s10674_s1 + $0x884] ss:$16 sps:$4 sm:$0xff]   ;;  %v7390_v47 = vld [vmem:[%s10674_s1 + $0x88c] ss:$16 sps:$4 sm:$0xff]  }
  0xd8   :  { %4033 = vmatprep.subr.bf16.mxu0 %v7303_v48  ;;  %4443 = vmatprep.subr.bf16.mxu1 %v7306_v50  ;;  %v7385_v48 = vld [vmem:[%s10674_s1 + $0x880] ss:$16 sps:$4 sm:$0xff]   ;;  %v7388_v50 = vld [vmem:[%s10674_s1 + $0x888] ss:$16 sps:$4 sm:$0xff]  }
  0xdb   :  { %4034 = vmatpush1.bf16.msra.mxu0 %v7301_v51  ;;  %4444 = vmatpush1.bf16.msra.mxu1 %v7304_v53  ;;  %v7393_v51 = vld [vmem:[%s10674_s1 + $0x8a4] ss:$16 sps:$4 sm:$0xff]   ;;  %v7396_v53 = vld [vmem:[%s10674_s1 + $0x8ac] ss:$16 sps:$4 sm:$0xff]  }
  0xdc   :  { %4035 = vmatprep.subr.bf16.mxu0 %v7309_v54  ;;  %4445 = vmatprep.subr.bf16.mxu1 %v7312_v55  ;;  %v7391_v54 = vld [vmem:[%s10674_s1 + $0x8a0] ss:$16 sps:$4 sm:$0xff]   ;;  %v7394_v55 = vld [vmem:[%s10674_s1 + $0x8a8] ss:$16 sps:$4 sm:$0xff]  }
  0xdf   :  { %4036 = vmatpush1.bf16.msra.mxu0 %v7307_v56  ;;  %4446 = vmatpush1.bf16.msra.mxu1 %v7310_v57  ;;  %v7399_v56 = vld [vmem:[%s10674_s1 + $0x8c4] ss:$16 sps:$4 sm:$0xff]   ;;  %v7402_v57 = vld [vmem:[%s10674_s1 + $0x8cc] ss:$16 sps:$4 sm:$0xff]  }
  0xe0   :  { %4037 = vmatprep.subr.bf16.mxu0 %v7315_v58  ;;  %4447 = vmatprep.subr.bf16.mxu1 %v7318_v59  ;;  %v7397_v58 = vld [vmem:[%s10674_s1 + $0x8c0] ss:$16 sps:$4 sm:$0xff]   ;;  %v7400_v59 = vld [vmem:[%s10674_s1 + $0x8c8] ss:$16 sps:$4 sm:$0xff]  }
  0xe3   :  { %4038 = vmatpush1.bf16.msra.mxu0 %v7313_v60  ;;  %4448 = vmatpush1.bf16.msra.mxu1 %v7316_v61  ;;  %v7405_v60 = vld [vmem:[%s10674_s1 + $0x8e4] ss:$16 sps:$4 sm:$0xff]   ;;  %v7408_v61 = vld [vmem:[%s10674_s1 + $0x8ec] ss:$16 sps:$4 sm:$0xff]  }
  0xe4   :  { %4039 = vmatprep.subr.bf16.mxu0 %v7321_v62  ;;  %4449 = vmatprep.subr.bf16.mxu1 %v7324_v63  ;;  %v7403_v62 = vld [vmem:[%s10674_s1 + $0x8e0] ss:$16 sps:$4 sm:$0xff]   ;;  %v7406_v63 = vld [vmem:[%s10674_s1 + $0x8e8] ss:$16 sps:$4 sm:$0xff]  }
  0xe7   :  { %4040 = vmatpush1.bf16.msra.mxu0 %v7319_v0  ;;  %4450 = vmatpush1.bf16.msra.mxu1 %v7322_v1  ;;  %v7411_v0 = vld [vmem:[%s10674_s1 + $0x904] ss:$16 sps:$4 sm:$0xff]   ;;  %v7414_v1 = vld [vmem:[%s10674_s1 + $0x90c] ss:$16 sps:$4 sm:$0xff]  }
  0xe8   :  { %4041 = vmatprep.subr.bf16.mxu0 %v7327_v2  ;;  %4451 = vmatprep.subr.bf16.mxu1 %v7330_v3  ;;  %v7409_v2 = vld [vmem:[%s10674_s1 + $0x900] ss:$16 sps:$4 sm:$0xff]   ;;  %v7412_v3 = vld [vmem:[%s10674_s1 + $0x908] ss:$16 sps:$4 sm:$0xff]  }
  0xeb   :  { %4042 = vmatpush1.bf16.msra.mxu0 %v7325_v4  ;;  %4452 = vmatpush1.bf16.msra.mxu1 %v7328_v5  ;;  %v7417_v4 = vld [vmem:[%s10674_s1 + $0x924] ss:$16 sps:$4 sm:$0xff]   ;;  %v7420_v5 = vld [vmem:[%s10674_s1 + $0x92c] ss:$16 sps:$4 sm:$0xff]  }
  0xec   :  { %4043 = vmatprep.subr.bf16.mxu0 %v7333_v6  ;;  %4453 = vmatprep.subr.bf16.mxu1 %v7336_v7  ;;  %v7415_v6 = vld [vmem:[%s10674_s1 + $0x920] ss:$16 sps:$4 sm:$0xff]   ;;  %v7418_v7 = vld [vmem:[%s10674_s1 + $0x928] ss:$16 sps:$4 sm:$0xff]  }
  0xef   :  { %4044 = vmatpush1.bf16.msra.mxu0 %v7331_v8  ;;  %4454 = vmatpush1.bf16.msra.mxu1 %v7334_v9  ;;  %v7423_v8 = vld [vmem:[%s10674_s1 + $0x944] ss:$16 sps:$4 sm:$0xff]   ;;  %v7426_v9 = vld [vmem:[%s10674_s1 + $0x94c] ss:$16 sps:$4 sm:$0xff]  }
  0xf0   :  { %4045 = vmatprep.subr.bf16.mxu0 %v7339_v10  ;;  %4455 = vmatprep.subr.bf16.mxu1 %v7342_v11  ;;  %v7421_v10 = vld [vmem:[%s10674_s1 + $0x940] ss:$16 sps:$4 sm:$0xff]   ;;  %v7424_v11 = vld [vmem:[%s10674_s1 + $0x948] ss:$16 sps:$4 sm:$0xff]  }
  0xf3   :  { %4046 = vmatpush1.bf16.msra.mxu0 %v7337_v12  ;;  %4456 = vmatpush1.bf16.msra.mxu1 %v7340_v52  ;;  %v7429_v12 = vld [vmem:[%s10674_s1 + $0x964] ss:$16 sps:$4 sm:$0xff]   ;;  %v7432_v52 = vld [vmem:[%s10674_s1 + $0x96c] ss:$16 sps:$4 sm:$0xff]  }
  0xf4   :  { %4047 = vmatprep.subr.bf16.mxu0 %v7345_v15  ;;  %4457 = vmatprep.subr.bf16.mxu1 %v7348_v16  ;;  %v7427_v15 = vld [vmem:[%s10674_s1 + $0x960] ss:$16 sps:$4 sm:$0xff]   ;;  %v7430_v16 = vld [vmem:[%s10674_s1 + $0x968] ss:$16 sps:$4 sm:$0xff]  }
  0xf7   :  { %4048 = vmatpush1.bf16.msra.mxu0 %v7343_v17  ;;  %4458 = vmatpush1.bf16.msra.mxu1 %v7346_v18  ;;  %v7435_v17 = vld [vmem:[%s10674_s1 + $0x984] ss:$16 sps:$4 sm:$0xff]   ;;  %v7438_v18 = vld [vmem:[%s10674_s1 + $0x98c] ss:$16 sps:$4 sm:$0xff]  }
  0xf8   :  { %4049 = vmatprep.subr.bf16.mxu0 %v7351_v19  ;;  %4459 = vmatprep.subr.bf16.mxu1 %v7354_v20  ;;  %v7433_v19 = vld [vmem:[%s10674_s1 + $0x980] ss:$16 sps:$4 sm:$0xff]   ;;  %v7436_v20 = vld [vmem:[%s10674_s1 + $0x988] ss:$16 sps:$4 sm:$0xff]  }
  0xfb   :  { %4050 = vmatpush1.bf16.msra.mxu0 %v7349_v22  ;;  %4460 = vmatpush1.bf16.msra.mxu1 %v7352_v23  ;;  %v7441_v22 = vld [vmem:[%s10674_s1 + $0x9a4] ss:$16 sps:$4 sm:$0xff]   ;;  %v7444_v23 = vld [vmem:[%s10674_s1 + $0x9ac] ss:$16 sps:$4 sm:$0xff]  }
  0xfc   :  { %4051 = vmatprep.subr.bf16.mxu0 %v7357_v24  ;;  %4461 = vmatprep.subr.bf16.mxu1 %v7360_v13  ;;  %v7439_v24 = vld [vmem:[%s10674_s1 + $0x9a0] ss:$16 sps:$4 sm:$0xff]   ;;  %v7442_v13 = vld [vmem:[%s10674_s1 + $0x9a8] ss:$16 sps:$4 sm:$0xff]  }
  0xff   :  { %4052 = vmatpush1.bf16.msra.mxu0 %v7355_v27  ;;  %4462 = vmatpush1.bf16.msra.mxu1 %v7358_v28  ;;  %v7447_v27 = vld [vmem:[%s10674_s1 + $0x9c4] ss:$16 sps:$4 sm:$0xff]   ;;  %v7450_v28 = vld [vmem:[%s10674_s1 + $0x9cc] ss:$16 sps:$4 sm:$0xff]  }
 0x100   :  { %4062 = vmatprep.subr.bf16.mxu0 %v7363_v29  ;;  %4472 = vmatprep.subr.bf16.mxu1 %v7366_v14  ;;  %v7445_v29 = vld [vmem:[%s10674_s1 + $0x9c0] ss:$16 sps:$4 sm:$0xff]   ;;  %v7448_v14 = vld [vmem:[%s10674_s1 + $0x9c8] ss:$16 sps:$4 sm:$0xff]  }
 0x102   :  { %4054 = vmatmul.mubr.bf16.vlgmr.msra.gmra.mrb[0].mxu0 %v716_v31  ;;  %4464 = vmatmul.mubr.bf16.vlgmr.msra.gmra.mrb[0].mxu1 %v716_v31  ;;  %v7456_v31 = vld [vmem:[%s10674_s1 + $0x9ec] ss:$16 sps:$4 sm:$0xff]  }
 0x103   :  { %4063 = vmatpush1.bf16.msra.mxu0 %v7361_v25  ;;  %4473 = vmatpush1.bf16.msra.mxu1 %v7364_v32  ;;  %v7451_v25 = vld [vmem:[%s10674_s1 + $0x9e0] ss:$16 sps:$4 sm:$0xff]   ;;  %v7454_v32 = vld [vmem:[%s10674_s1 + $0x9e8] ss:$16 sps:$4 sm:$0xff]  }
 0x104   :  { %4064 = vmatprep.subr.bf16.mxu0 %v7369_v33  ;;  %4474 = vmatprep.subr.bf16.mxu1 %v7372_v26  ;;  %v7459_v33 = vld [vmem:[%s10674_s1 + $0xa04] ss:$16 sps:$4 sm:$0xff]   ;;  %v7462_v26 = vld [vmem:[%s10674_s1 + $0xa0c] ss:$16 sps:$4 sm:$0xff]  }
 0x105   :  { %4094 = vmatprep.mubr.bf16.mxu0 %v9026_v34  ;;  %4504 = vmatprep.mubr.bf16.mxu1 %v9026_v34 }
 0x107   :  { %4065 = vmatpush1.bf16.msra.mxu0 %v7367_v35  ;;  %4475 = vmatpush1.bf16.msra.mxu1 %v7370_v36  ;;  %v9212_v35 = vrot.slane %v8983_v21, %v8325_v49  ;;  %v7457_v36 = vld [vmem:[%s10674_s1 + $0xa00] ss:$16 sps:$4 sm:$0xff]   ;;  %v7468_v21 = vld [vmem:[%s10674_s1 + $0xa2c] ss:$16 sps:$4 sm:$0xff]  }
 0x108   :  { %4066 = vmatprep.subr.bf16.mxu0 %v7375_v37  ;;  %4476 = vmatprep.subr.bf16.mxu1 %v7378_v38  ;;  %v7460_v37 = vld [vmem:[%s10674_s1 + $0xa08] ss:$16 sps:$4 sm:$0xff]   ;;  %v7465_v38 = vld [vmem:[%s10674_s1 + $0xa24] ss:$16 sps:$4 sm:$0xff]  }
 0x10b   :  { %4067 = vmatpush1.bf16.msra.mxu0 %v7373_v39  ;;  %4477 = vmatpush1.bf16.msra.mxu1 %v7376_v40  ;;  %v766_v39 = vcombine.high %v9026_v34, %v9026_v34  ;;  %v7463_v40 = vld [vmem:[%s10674_s1 + $0xa20] ss:$16 sps:$4 sm:$0xff]   ;;  %v7471_v34 = vld [vmem:[%s10674_s1 + $0xa44] ss:$16 sps:$4 sm:$0xff]  }
 0x10c   :  { %4068 = vmatprep.subr.bf16.mxu0 %v7381_v41  ;;  %4478 = vmatprep.subr.bf16.mxu1 %v7384_v43  ;;  %v7466_v41 = vld [vmem:[%s10674_s1 + $0xa28] ss:$16 sps:$4 sm:$0xff]   ;;  %v7474_v43 = vld [vmem:[%s10674_s1 + $0xa4c] ss:$16 sps:$4 sm:$0xff]  }
 0x10f   :  { %4069 = vmatpush1.bf16.msra.mxu0 %v7379_v44  ;;  %4479 = vmatpush1.bf16.msra.mxu1 %v7382_v45  ;;  %v7469_v44 = vld [vmem:[%s10674_s1 + $0xa40] ss:$16 sps:$4 sm:$0xff]   ;;  %v7472_v45 = vld [vmem:[%s10674_s1 + $0xa48] ss:$16 sps:$4 sm:$0xff]  }
 0x110   :  { %4070 = vmatprep.subr.bf16.mxu0 %v7387_v46  ;;  %4480 = vmatprep.subr.bf16.mxu1 %v7390_v47  ;;  %v7477_v46 = vld [vmem:[%s10674_s1 + $0xa64] ss:$16 sps:$4 sm:$0xff]   ;;  %v7480_v47 = vld [vmem:[%s10674_s1 + $0xa6c] ss:$16 sps:$4 sm:$0xff]  }
 0x113   :  { %4071 = vmatpush1.bf16.msra.mxu0 %v7385_v48  ;;  %4481 = vmatpush1.bf16.msra.mxu1 %v7388_v50  ;;  %v7475_v48 = vld [vmem:[%s10674_s1 + $0xa60] ss:$16 sps:$4 sm:$0xff]   ;;  %v7478_v50 = vld [vmem:[%s10674_s1 + $0xa68] ss:$16 sps:$4 sm:$0xff]  }
 0x114   :  { %4072 = vmatprep.subr.bf16.mxu0 %v7393_v51  ;;  %4482 = vmatprep.subr.bf16.mxu1 %v7396_v53  ;;  %v7483_v51 = vld [vmem:[%s10674_s1 + $0xa84] ss:$16 sps:$4 sm:$0xff]   ;;  %v7486_v53 = vld [vmem:[%s10674_s1 + $0xa8c] ss:$16 sps:$4 sm:$0xff]  }
 0x117   :  { %4073 = vmatpush1.bf16.msra.mxu0 %v7391_v54  ;;  %4483 = vmatpush1.bf16.msra.mxu1 %v7394_v55  ;;  %v7481_v54 = vld [vmem:[%s10674_s1 + $0xa80] ss:$16 sps:$4 sm:$0xff]   ;;  %v7484_v55 = vld [vmem:[%s10674_s1 + $0xa88] ss:$16 sps:$4 sm:$0xff]  }
 0x118   :  { %4074 = vmatprep.subr.bf16.mxu0 %v7399_v56  ;;  %4484 = vmatprep.subr.bf16.mxu1 %v7402_v57  ;;  %v7489_v56 = vld [vmem:[%s10674_s1 + $0xaa4] ss:$16 sps:$4 sm:$0xff]   ;;  %v7492_v57 = vld [vmem:[%s10674_s1 + $0xaac] ss:$16 sps:$4 sm:$0xff]  }
 0x11b   :  { %4075 = vmatpush1.bf16.msra.mxu0 %v7397_v58  ;;  %4485 = vmatpush1.bf16.msra.mxu1 %v7400_v59  ;;  %v7487_v58 = vld [vmem:[%s10674_s1 + $0xaa0] ss:$16 sps:$4 sm:$0xff]   ;;  %v7490_v59 = vld [vmem:[%s10674_s1 + $0xaa8] ss:$16 sps:$4 sm:$0xff]  }
 0x11c   :  { %4076 = vmatprep.subr.bf16.mxu0 %v7405_v60  ;;  %4486 = vmatprep.subr.bf16.mxu1 %v7408_v61  ;;  %v7495_v60 = vld [vmem:[%s10674_s1 + $0xac4] ss:$16 sps:$4 sm:$0xff]   ;;  %v7498_v61 = vld [vmem:[%s10674_s1 + $0xacc] ss:$16 sps:$4 sm:$0xff]  }
 0x11f   :  { %4077 = vmatpush1.bf16.msra.mxu0 %v7403_v62  ;;  %4487 = vmatpush1.bf16.msra.mxu1 %v7406_v63  ;;  %v7493_v62 = vld [vmem:[%s10674_s1 + $0xac0] ss:$16 sps:$4 sm:$0xff]   ;;  %v7496_v63 = vld [vmem:[%s10674_s1 + $0xac8] ss:$16 sps:$4 sm:$0xff]  }
 0x120   :  { %4078 = vmatprep.subr.bf16.mxu0 %v7411_v0  ;;  %4488 = vmatprep.subr.bf16.mxu1 %v7414_v1  ;;  %v7501_v0 = vld [vmem:[%s10674_s1 + $0xae4] ss:$16 sps:$4 sm:$0xff]   ;;  %v7504_v1 = vld [vmem:[%s10674_s1 + $0xaec] ss:$16 sps:$4 sm:$0xff]  }
 0x123   :  { %4079 = vmatpush1.bf16.msra.mxu0 %v7409_v2  ;;  %4489 = vmatpush1.bf16.msra.mxu1 %v7412_v3  ;;  %v7499_v2 = vld [vmem:[%s10674_s1 + $0xae0] ss:$16 sps:$4 sm:$0xff]   ;;  %v7502_v3 = vld [vmem:[%s10674_s1 + $0xae8] ss:$16 sps:$4 sm:$0xff]  }
 0x124   :  { %4080 = vmatprep.subr.bf16.mxu0 %v7417_v4  ;;  %4490 = vmatprep.subr.bf16.mxu1 %v7420_v5  ;;  %v7507_v4 = vld [vmem:[%s10674_s1 + $0xb04] ss:$16 sps:$4 sm:$0xff]   ;;  %v7510_v5 = vld [vmem:[%s10674_s1 + $0xb0c] ss:$16 sps:$4 sm:$0xff]  }
 0x127   :  { %4081 = vmatpush1.bf16.msra.mxu0 %v7415_v6  ;;  %4491 = vmatpush1.bf16.msra.mxu1 %v7418_v7  ;;  %v7505_v6 = vld [vmem:[%s10674_s1 + $0xb00] ss:$16 sps:$4 sm:$0xff]   ;;  %v7508_v7 = vld [vmem:[%s10674_s1 + $0xb08] ss:$16 sps:$4 sm:$0xff]  }
 0x128   :  { %4082 = vmatprep.subr.bf16.mxu0 %v7423_v8  ;;  %4492 = vmatprep.subr.bf16.mxu1 %v7426_v9  ;;  %v7513_v8 = vld [vmem:[%s10674_s1 + $0xb24] ss:$16 sps:$4 sm:$0xff]   ;;  %v7516_v9 = vld [vmem:[%s10674_s1 + $0xb2c] ss:$16 sps:$4 sm:$0xff]  }
 0x12b   :  { %4083 = vmatpush1.bf16.msra.mxu0 %v7421_v10  ;;  %4493 = vmatpush1.bf16.msra.mxu1 %v7424_v11  ;;  %v7511_v10 = vld [vmem:[%s10674_s1 + $0xb20] ss:$16 sps:$4 sm:$0xff]   ;;  %v7514_v11 = vld [vmem:[%s10674_s1 + $0xb28] ss:$16 sps:$4 sm:$0xff]  }
 0x12c   :  { %4084 = vmatprep.subr.bf16.mxu0 %v7429_v12  ;;  %4494 = vmatprep.subr.bf16.mxu1 %v7432_v52  ;;  %v7519_v12 = vld [vmem:[%s10674_s1 + $0xb44] ss:$16 sps:$4 sm:$0xff]   ;;  %v7522_v52 = vld [vmem:[%s10674_s1 + $0xb4c] ss:$16 sps:$4 sm:$0xff]  }
 0x12f   :  { %4085 = vmatpush1.bf16.msra.mxu0 %v7427_v15  ;;  %4495 = vmatpush1.bf16.msra.mxu1 %v7430_v16  ;;  %v7517_v15 = vld [vmem:[%s10674_s1 + $0xb40] ss:$16 sps:$4 sm:$0xff]   ;;  %v7520_v16 = vld [vmem:[%s10674_s1 + $0xb48] ss:$16 sps:$4 sm:$0xff]  }
 0x130   :  { %4086 = vmatprep.subr.bf16.mxu0 %v7435_v17  ;;  %4496 = vmatprep.subr.bf16.mxu1 %v7438_v18  ;;  %v7525_v17 = vld [vmem:[%s10674_s1 + $0xb64] ss:$16 sps:$4 sm:$0xff]   ;;  %v7528_v18 = vld [vmem:[%s10674_s1 + $0xb6c] ss:$16 sps:$4 sm:$0xff]  }
 0x133   :  { %4087 = vmatpush1.bf16.msra.mxu0 %v7433_v19  ;;  %4497 = vmatpush1.bf16.msra.mxu1 %v7436_v20  ;;  %v7523_v19 = vld [vmem:[%s10674_s1 + $0xb60] ss:$16 sps:$4 sm:$0xff]   ;;  %v7526_v20 = vld [vmem:[%s10674_s1 + $0xb68] ss:$16 sps:$4 sm:$0xff]  }
 0x134   :  { %4088 = vmatprep.subr.bf16.mxu0 %v7441_v22  ;;  %4498 = vmatprep.subr.bf16.mxu1 %v7444_v23  ;;  %v7531_v22 = vld [vmem:[%s10674_s1 + $0xb84] ss:$16 sps:$4 sm:$0xff]   ;;  %v7534_v23 = vld [vmem:[%s10674_s1 + $0xb8c] ss:$16 sps:$4 sm:$0xff]  }
 0x137   :  { %4089 = vmatpush1.bf16.msra.mxu0 %v7439_v24  ;;  %4499 = vmatpush1.bf16.msra.mxu1 %v7442_v13  ;;  %v7529_v24 = vld [vmem:[%s10674_s1 + $0xb80] ss:$16 sps:$4 sm:$0xff]   ;;  %v7532_v13 = vld [vmem:[%s10674_s1 + $0xb88] ss:$16 sps:$4 sm:$0xff]  }
 0x138   :  { %4090 = vmatprep.subr.bf16.mxu0 %v7447_v27  ;;  %4500 = vmatprep.subr.bf16.mxu1 %v7450_v28  ;;  %v7537_v27 = vld [vmem:[%s10674_s1 + $0xba4] ss:$16 sps:$4 sm:$0xff]   ;;  %v7540_v28 = vld [vmem:[%s10674_s1 + $0xbac] ss:$16 sps:$4 sm:$0xff]  }
 0x13b   :  { %4091 = vmatpush1.bf16.msra.mxu0 %v7445_v29  ;;  %4501 = vmatpush1.bf16.msra.mxu1 %v7448_v14  ;;  %v7535_v29 = vld [vmem:[%s10674_s1 + $0xba0] ss:$16 sps:$4 sm:$0xff]   ;;  %v7538_v14 = vld [vmem:[%s10674_s1 + $0xba8] ss:$16 sps:$4 sm:$0xff]  }
 0x13c   :  { %4092 = vmatprep.subr.bf16.mxu0 %v7453_v30  ;;  %4502 = vmatprep.subr.bf16.mxu1 %v7456_v31  ;;  %v7543_v30 = vld [vmem:[%s10674_s1 + $0xbc4] ss:$16 sps:$4 sm:$0xff]   ;;  %v7546_v31 = vld [vmem:[%s10674_s1 + $0xbcc] ss:$16 sps:$4 sm:$0xff]  }
 0x13f   :  { %4093 = vmatpush1.bf16.msra.mxu0 %v7451_v25  ;;  %4503 = vmatpush1.bf16.msra.mxu1 %v7454_v32  ;;  %v8122_v25 = vld [vmem:[%s10673_s0 + $0x8] sm:$0xff] }
 0x140   :  { %4103 = vmatprep.subr.bf16.mxu0 %v7459_v33  ;;  %4513 = vmatprep.subr.bf16.mxu1 %v7462_v26  ;;  %v719_v32 = vcombine.high %v8122_v25, %v8122_v25  ;;  %v7541_v33 = vld [vmem:[%s10674_s1 + $0xbc0] ss:$16 sps:$4 sm:$0xff]   ;;  %v7544_v26 = vld [vmem:[%s10674_s1 + $0xbc8] ss:$16 sps:$4 sm:$0xff]  }
 0x141   :  { %v7625_v25 = vld [vmem:[%s10674_s1 + $0xd80] ss:$16 sps:$4 sm:$0xff]  }
 0x142   :  { %4095 = vmatmul.mubr.bf16.vlgmr.msra.gmra.mrb[0].mxu0 %v9212_v35  ;;  %4505 = vmatmul.mubr.bf16.vlgmr.msra.gmra.mrb[0].mxu1 %v9212_v35 }
 0x143   :  { %4104 = vmatpush1.bf16.msra.mxu0 %v7457_v36  ;;  %4514 = vmatpush1.bf16.msra.mxu1 %v7460_v37  ;;  %v7549_v36 = vld [vmem:[%s10674_s1 + $0xbe4] ss:$16 sps:$4 sm:$0xff]   ;;  %v7552_v37 = vld [vmem:[%s10674_s1 + $0xbec] ss:$16 sps:$4 sm:$0xff]  }
 0x144   :  { %4105 = vmatprep.subr.bf16.mxu0 %v7465_v38  ;;  %4515 = vmatprep.subr.bf16.mxu1 %v7468_v21  ;;  %v9402_v38 = vrot.slane %v719_v32, %v8325_v49  ;;  %v7547_v21 = vld [vmem:[%s10674_s1 + $0xbe0] ss:$16 sps:$4 sm:$0xff]   ;;  %v7628_v32 = vld [vmem:[%s10674_s1 + $0xd88] ss:$16 sps:$4 sm:$0xff]  }
 0x145   :  { %4135 = vmatprep.mubr.bf16.mxu0 %v766_v39  ;;  %4545 = vmatprep.mubr.bf16.mxu1 %v766_v39  ;;  %v7550_v39 = vld [vmem:[%s10674_s1 + $0xbe8] ss:$16 sps:$4 sm:$0xff]  }
 0x147   :  { %4106 = vmatpush1.bf16.msra.mxu0 %v7463_v40  ;;  %4516 = vmatpush1.bf16.msra.mxu1 %v7466_v41  ;;  %v7555_v40 = vld [vmem:[%s10674_s1 + $0xc04] ss:$16 sps:$4 sm:$0xff]   ;;  %v7558_v41 = vld [vmem:[%s10674_s1 + $0xc0c] ss:$16 sps:$4 sm:$0xff]  }
 0x148   :  { %4107 = vmatprep.subr.bf16.mxu0 %v7471_v34  ;;  %4517 = vmatprep.subr.bf16.mxu1 %v7474_v43  ;;  %v735_v34 = vcombine.high %v9402_v38, %v9402_v38  ;;  %v764_v43 = vcombine.high %v9212_v35, %v9212_v35  ;;  %v7564_v35 = vld [vmem:[%s10674_s1 + $0xc2c] ss:$16 sps:$4 sm:$0xff]  }
 0x14b   :  { %4108 = vmatpush1.bf16.msra.mxu0 %v7469_v44  ;;  %4518 = vmatpush1.bf16.msra.mxu1 %v7472_v45  ;;  %v7553_v44 = vld [vmem:[%s10674_s1 + $0xc00] ss:$16 sps:$4 sm:$0xff]   ;;  %v7556_v45 = vld [vmem:[%s10674_s1 + $0xc08] ss:$16 sps:$4 sm:$0xff]  }
 0x14c   :  { %4109 = vmatprep.subr.bf16.mxu0 %v7477_v46  ;;  %4519 = vmatprep.subr.bf16.mxu1 %v7480_v47  ;;  %v7561_v46 = vld [vmem:[%s10674_s1 + $0xc24] ss:$16 sps:$4 sm:$0xff]   ;;  %v9433_v47 = vrot.slane %v735_v34, %v8325_v49 }
 0x14d   :  { %v7645_v34 = vld [vmem:[%s10674_s1 + $0xde4] ss:$16 sps:$4 sm:$0xff]  }
 0x14f   :  { %4110 = vmatpush1.bf16.msra.mxu0 %v7475_v48  ;;  %4520 = vmatpush1.bf16.msra.mxu1 %v7478_v50  ;;  %v7559_v48 = vld [vmem:[%s10674_s1 + $0xc20] ss:$16 sps:$4 sm:$0xff]   ;;  %v7562_v50 = vld [vmem:[%s10674_s1 + $0xc28] ss:$16 sps:$4 sm:$0xff]  }
 0x150   :  { %4111 = vmatprep.subr.bf16.mxu0 %v7483_v51  ;;  %4521 = vmatprep.subr.bf16.mxu1 %v7486_v53  ;;  %v7567_v51 = vld [vmem:[%s10674_s1 + $0xc44] ss:$16 sps:$4 sm:$0xff]   ;;  %v7570_v53 = vld [vmem:[%s10674_s1 + $0xc4c] ss:$16 sps:$4 sm:$0xff]  }
 0x153   :  { %4112 = vmatpush1.bf16.msra.mxu0 %v7481_v54  ;;  %4522 = vmatpush1.bf16.msra.mxu1 %v7484_v55  ;;  %v7565_v54 = vld [vmem:[%s10674_s1 + $0xc40] ss:$16 sps:$4 sm:$0xff]   ;;  %v7568_v55 = vld [vmem:[%s10674_s1 + $0xc48] ss:$16 sps:$4 sm:$0xff]  }
 0x154   :  { %4113 = vmatprep.subr.bf16.mxu0 %v7489_v56  ;;  %4523 = vmatprep.subr.bf16.mxu1 %v7492_v57  ;;  %v7573_v56 = vld [vmem:[%s10674_s1 + $0xc64] ss:$16 sps:$4 sm:$0xff]   ;;  %v7576_v57 = vld [vmem:[%s10674_s1 + $0xc6c] ss:$16 sps:$4 sm:$0xff]  }
 0x157   :  { %4114 = vmatpush1.bf16.msra.mxu0 %v7487_v58  ;;  %4524 = vmatpush1.bf16.msra.mxu1 %v7490_v59  ;;  %v7571_v58 = vld [vmem:[%s10674_s1 + $0xc60] ss:$16 sps:$4 sm:$0xff]   ;;  %v7574_v59 = vld [vmem:[%s10674_s1 + $0xc68] ss:$16 sps:$4 sm:$0xff]  }
 0x158   :  { %4115 = vmatprep.subr.bf16.mxu0 %v7495_v60  ;;  %4525 = vmatprep.subr.bf16.mxu1 %v7498_v61  ;;  %v7579_v60 = vld [vmem:[%s10674_s1 + $0xc84] ss:$16 sps:$4 sm:$0xff]   ;;  %v7582_v61 = vld [vmem:[%s10674_s1 + $0xc8c] ss:$16 sps:$4 sm:$0xff]  }
 0x15b   :  { %4116 = vmatpush1.bf16.msra.mxu0 %v7493_v62  ;;  %4526 = vmatpush1.bf16.msra.mxu1 %v7496_v63  ;;  %v7577_v62 = vld [vmem:[%s10674_s1 + $0xc80] ss:$16 sps:$4 sm:$0xff]   ;;  %v7580_v63 = vld [vmem:[%s10674_s1 + $0xc88] ss:$16 sps:$4 sm:$0xff]  }
 0x15c   :  { %4117 = vmatprep.subr.bf16.mxu0 %v7501_v0  ;;  %4527 = vmatprep.subr.bf16.mxu1 %v7504_v1  ;;  %v7585_v0 = vld [vmem:[%s10674_s1 + $0xca4] ss:$16 sps:$4 sm:$0xff]   ;;  %v7588_v1 = vld [vmem:[%s10674_s1 + $0xcac] ss:$16 sps:$4 sm:$0xff]  }
 0x15f   :  { %4118 = vmatpush1.bf16.msra.mxu0 %v7499_v2  ;;  %4528 = vmatpush1.bf16.msra.mxu1 %v7502_v3  ;;  %v7583_v2 = vld [vmem:[%s10674_s1 + $0xca0] ss:$16 sps:$4 sm:$0xff]   ;;  %v7586_v3 = vld [vmem:[%s10674_s1 + $0xca8] ss:$16 sps:$4 sm:$0xff]  }
 0x160   :  { %4119 = vmatprep.subr.bf16.mxu0 %v7507_v4  ;;  %4529 = vmatprep.subr.bf16.mxu1 %v7510_v5  ;;  %v7591_v4 = vld [vmem:[%s10674_s1 + $0xcc4] ss:$16 sps:$4 sm:$0xff]   ;;  %v7594_v5 = vld [vmem:[%s10674_s1 + $0xccc] ss:$16 sps:$4 sm:$0xff]  }
 0x163   :  { %4120 = vmatpush1.bf16.msra.mxu0 %v7505_v6  ;;  %4530 = vmatpush1.bf16.msra.mxu1 %v7508_v7  ;;  %v7589_v6 = vld [vmem:[%s10674_s1 + $0xcc0] ss:$16 sps:$4 sm:$0xff]   ;;  %v7592_v7 = vld [vmem:[%s10674_s1 + $0xcc8] ss:$16 sps:$4 sm:$0xff]  }
 0x164   :  { %4121 = vmatprep.subr.bf16.mxu0 %v7513_v8  ;;  %4531 = vmatprep.subr.bf16.mxu1 %v7516_v9  ;;  %v7597_v8 = vld [vmem:[%s10674_s1 + $0xce4] ss:$16 sps:$4 sm:$0xff]   ;;  %v7600_v9 = vld [vmem:[%s10674_s1 + $0xcec] ss:$16 sps:$4 sm:$0xff]  }
 0x167   :  { %4122 = vmatpush1.bf16.msra.mxu0 %v7511_v10  ;;  %4532 = vmatpush1.bf16.msra.mxu1 %v7514_v11  ;;  %v7595_v10 = vld [vmem:[%s10674_s1 + $0xce0] ss:$16 sps:$4 sm:$0xff]   ;;  %v7598_v11 = vld [vmem:[%s10674_s1 + $0xce8] ss:$16 sps:$4 sm:$0xff]  }
 0x168   :  { %4123 = vmatprep.subr.bf16.mxu0 %v7519_v12  ;;  %4533 = vmatprep.subr.bf16.mxu1 %v7522_v52  ;;  %v7603_v12 = vld [vmem:[%s10674_s1 + $0xd04] ss:$16 sps:$4 sm:$0xff]   ;;  %v7606_v52 = vld [vmem:[%s10674_s1 + $0xd0c] ss:$16 sps:$4 sm:$0xff]  }
 0x16b   :  { %4124 = vmatpush1.bf16.msra.mxu0 %v7517_v15  ;;  %4534 = vmatpush1.bf16.msra.mxu1 %v7520_v16  ;;  %v7601_v15 = vld [vmem:[%s10674_s1 + $0xd00] ss:$16 sps:$4 sm:$0xff]   ;;  %v7604_v16 = vld [vmem:[%s10674_s1 + $0xd08] ss:$16 sps:$4 sm:$0xff]  }
 0x16c   :  { %4125 = vmatprep.subr.bf16.mxu0 %v7525_v17  ;;  %4535 = vmatprep.subr.bf16.mxu1 %v7528_v18  ;;  %v7609_v17 = vld [vmem:[%s10674_s1 + $0xd24] ss:$16 sps:$4 sm:$0xff]   ;;  %v7612_v18 = vld [vmem:[%s10674_s1 + $0xd2c] ss:$16 sps:$4 sm:$0xff]  }
 0x16f   :  { %4126 = vmatpush1.bf16.msra.mxu0 %v7523_v19  ;;  %4536 = vmatpush1.bf16.msra.mxu1 %v7526_v20  ;;  %v7607_v19 = vld [vmem:[%s10674_s1 + $0xd20] ss:$16 sps:$4 sm:$0xff]   ;;  %v7610_v20 = vld [vmem:[%s10674_s1 + $0xd28] ss:$16 sps:$4 sm:$0xff]  }
 0x170   :  { %4127 = vmatprep.subr.bf16.mxu0 %v7531_v22  ;;  %4537 = vmatprep.subr.bf16.mxu1 %v7534_v23  ;;  %v7615_v22 = vld [vmem:[%s10674_s1 + $0xd44] ss:$16 sps:$4 sm:$0xff]   ;;  %v7618_v23 = vld [vmem:[%s10674_s1 + $0xd4c] ss:$16 sps:$4 sm:$0xff]  }
 0x173   :  { %4128 = vmatpush1.bf16.msra.mxu0 %v7529_v24  ;;  %4538 = vmatpush1.bf16.msra.mxu1 %v7532_v13  ;;  %v7613_v24 = vld [vmem:[%s10674_s1 + $0xd40] ss:$16 sps:$4 sm:$0xff]   ;;  %v7616_v13 = vld [vmem:[%s10674_s1 + $0xd48] ss:$16 sps:$4 sm:$0xff]  }
 0x174   :  { %4129 = vmatprep.subr.bf16.mxu0 %v7537_v27  ;;  %4539 = vmatprep.subr.bf16.mxu1 %v7540_v28  ;;  %v7621_v27 = vld [vmem:[%s10674_s1 + $0xd64] ss:$16 sps:$4 sm:$0xff]   ;;  %v7624_v28 = vld [vmem:[%s10674_s1 + $0xd6c] ss:$16 sps:$4 sm:$0xff]  }
 0x177   :  { %4130 = vmatpush1.bf16.msra.mxu0 %v7535_v29  ;;  %4540 = vmatpush1.bf16.msra.mxu1 %v7538_v14  ;;  %v7619_v29 = vld [vmem:[%s10674_s1 + $0xd60] ss:$16 sps:$4 sm:$0xff]   ;;  %v7622_v14 = vld [vmem:[%s10674_s1 + $0xd68] ss:$16 sps:$4 sm:$0xff]  }
 0x178   :  { %4131 = vmatprep.subr.bf16.mxu0 %v7543_v30  ;;  %4541 = vmatprep.subr.bf16.mxu1 %v7546_v31  ;;  %v7627_v30 = vld [vmem:[%s10674_s1 + $0xd84] ss:$16 sps:$4 sm:$0xff]   ;;  %v7630_v31 = vld [vmem:[%s10674_s1 + $0xd8c] ss:$16 sps:$4 sm:$0xff]  }
 0x17b   :  { %4132 = vmatpush1.bf16.msra.mxu0 %v7541_v33  ;;  %4542 = vmatpush1.bf16.msra.mxu1 %v7544_v26  ;;  %v7633_v33 = vld [vmem:[%s10674_s1 + $0xda4] ss:$16 sps:$4 sm:$0xff]   ;;  %v7636_v26 = vld [vmem:[%s10674_s1 + $0xdac] ss:$16 sps:$4 sm:$0xff]  }
 0x17c   :  { %4133 = vmatprep.subr.bf16.mxu0 %v7549_v36  ;;  %4543 = vmatprep.subr.bf16.mxu1 %v7552_v37  ;;  %v7631_v36 = vld [vmem:[%s10674_s1 + $0xda0] ss:$16 sps:$4 sm:$0xff]   ;;  %v7634_v37 = vld [vmem:[%s10674_s1 + $0xda8] ss:$16 sps:$4 sm:$0xff]  }
 0x17f   :  { %4134 = vmatpush1.bf16.msra.mxu0 %v7547_v21  ;;  %4544 = vmatpush1.bf16.msra.mxu1 %v7550_v39  ;;  %v7639_v21 = vld [vmem:[%s10674_s1 + $0xdc4] ss:$16 sps:$4 sm:$0xff]   ;;  %v7642_v39 = vld [vmem:[%s10674_s1 + $0xdcc] ss:$16 sps:$4 sm:$0xff]  }
 0x180   :  { %4144 = vmatprep.subr.bf16.mxu0 %v7555_v40  ;;  %4554 = vmatprep.subr.bf16.mxu1 %v7558_v41  ;;  %v7637_v40 = vld [vmem:[%s10674_s1 + $0xdc0] ss:$16 sps:$4 sm:$0xff]   ;;  %v7640_v41 = vld [vmem:[%s10674_s1 + $0xdc8] ss:$16 sps:$4 sm:$0xff]  }
 0x182   :  { %4136 = vmatmul.mubr.bf16.vlgmr.msra.gmra.mrb[0].mxu0 %v764_v43  ;;  %4546 = vmatmul.mubr.bf16.vlgmr.msra.gmra.mrb[0].mxu1 %v764_v43  ;;  %v7648_v43 = vld [vmem:[%s10674_s1 + $0xdec] ss:$16 sps:$4 sm:$0xff]  }
 0x183   :  { %4145 = vmatpush1.bf16.msra.mxu0 %v7553_v44  ;;  %4555 = vmatpush1.bf16.msra.mxu1 %v7556_v45  ;;  %v7643_v44 = vld [vmem:[%s10674_s1 + $0xde0] ss:$16 sps:$4 sm:$0xff]   ;;  %v7646_v45 = vld [vmem:[%s10674_s1 + $0xde8] ss:$16 sps:$4 sm:$0xff]  }
 0x184   :  { %4146 = vmatprep.subr.bf16.mxu0 %v7561_v46  ;;  %4556 = vmatprep.subr.bf16.mxu1 %v7564_v35  ;;  %v7652_v46 = vld [vmem:[%s10674_s1 + $0xe04] ss:$16 sps:$4 sm:$0xff]   ;;  %v7655_v35 = vld [vmem:[%s10674_s1 + $0xe0c] ss:$16 sps:$4 sm:$0xff]  }
 0x185   :  { %4176 = vmatprep.mubr.bf16.mxu0 %v9433_v47  ;;  %4586 = vmatprep.mubr.bf16.mxu1 %v9433_v47 }
 0x187   :  { %4147 = vmatpush1.bf16.msra.mxu0 %v7559_v48  ;;  %4557 = vmatpush1.bf16.msra.mxu1 %v7562_v50  ;;  %v9619_v48 = vrot.slane %v9402_v38, %v8325_v49  ;;  %v7650_v50 = vld [vmem:[%s10674_s1 + $0xe00] ss:$16 sps:$4 sm:$0xff]   ;;  %v7661_v38 = vld [vmem:[%s10674_s1 + $0xe2c] ss:$16 sps:$4 sm:$0xff]  }
 0x188   :  { %4148 = vmatprep.subr.bf16.mxu0 %v7567_v51  ;;  %4558 = vmatprep.subr.bf16.mxu1 %v7570_v53  ;;  %v7653_v51 = vld [vmem:[%s10674_s1 + $0xe08] ss:$16 sps:$4 sm:$0xff]   ;;  %v7658_v53 = vld [vmem:[%s10674_s1 + $0xe24] ss:$16 sps:$4 sm:$0xff]  }
 0x18b   :  { %4149 = vmatpush1.bf16.msra.mxu0 %v7565_v54  ;;  %4559 = vmatpush1.bf16.msra.mxu1 %v7568_v55  ;;  %v767_v54 = vcombine.high %v9433_v47, %v9433_v47  ;;  %v7656_v55 = vld [vmem:[%s10674_s1 + $0xe20] ss:$16 sps:$4 sm:$0xff]   ;;  %v7664_v47 = vld [vmem:[%s10674_s1 + $0xe44] ss:$16 sps:$4 sm:$0xff]  }
 0x18c   :  { %4150 = vmatprep.subr.bf16.mxu0 %v7573_v56  ;;  %4560 = vmatprep.subr.bf16.mxu1 %v7576_v57  ;;  %v7659_v56 = vld [vmem:[%s10674_s1 + $0xe28] ss:$16 sps:$4 sm:$0xff]   ;;  %v7667_v57 = vld [vmem:[%s10674_s1 + $0xe4c] ss:$16 sps:$4 sm:$0xff]  }
 0x18f   :  { %4151 = vmatpush1.bf16.msra.mxu0 %v7571_v58  ;;  %4561 = vmatpush1.bf16.msra.mxu1 %v7574_v59  ;;  %v7662_v58 = vld [vmem:[%s10674_s1 + $0xe40] ss:$16 sps:$4 sm:$0xff]   ;;  %v7665_v59 = vld [vmem:[%s10674_s1 + $0xe48] ss:$16 sps:$4 sm:$0xff]  }
 0x190   :  { %4152 = vmatprep.subr.bf16.mxu0 %v7579_v60  ;;  %4562 = vmatprep.subr.bf16.mxu1 %v7582_v61  ;;  %v7670_v60 = vld [vmem:[%s10674_s1 + $0xe64] ss:$16 sps:$4 sm:$0xff]   ;;  %v7673_v61 = vld [vmem:[%s10674_s1 + $0xe6c] ss:$16 sps:$4 sm:$0xff]  }
 0x193   :  { %4153 = vmatpush1.bf16.msra.mxu0 %v7577_v62  ;;  %4563 = vmatpush1.bf16.msra.mxu1 %v7580_v63  ;;  %v7668_v62 = vld [vmem:[%s10674_s1 + $0xe60] ss:$16 sps:$4 sm:$0xff]   ;;  %v7671_v63 = vld [vmem:[%s10674_s1 + $0xe68] ss:$16 sps:$4 sm:$0xff]  }
 0x194   :  { %4154 = vmatprep.subr.bf16.mxu0 %v7585_v0  ;;  %4564 = vmatprep.subr.bf16.mxu1 %v7588_v1  ;;  %v7676_v0 = vld [vmem:[%s10674_s1 + $0xe84] ss:$16 sps:$4 sm:$0xff]   ;;  %v7679_v1 = vld [vmem:[%s10674_s1 + $0xe8c] ss:$16 sps:$4 sm:$0xff]  }
 0x197   :  { %4155 = vmatpush1.bf16.msra.mxu0 %v7583_v2  ;;  %4565 = vmatpush1.bf16.msra.mxu1 %v7586_v3  ;;  %v7674_v2 = vld [vmem:[%s10674_s1 + $0xe80] ss:$16 sps:$4 sm:$0xff]   ;;  %v7677_v3 = vld [vmem:[%s10674_s1 + $0xe88] ss:$16 sps:$4 sm:$0xff]  }
 0x198   :  { %4156 = vmatprep.subr.bf16.mxu0 %v7591_v4  ;;  %4566 = vmatprep.subr.bf16.mxu1 %v7594_v5  ;;  %v7682_v4 = vld [vmem:[%s10674_s1 + $0xea4] ss:$16 sps:$4 sm:$0xff]   ;;  %v7685_v5 = vld [vmem:[%s10674_s1 + $0xeac] ss:$16 sps:$4 sm:$0xff]  }
 0x19b   :  { %4157 = vmatpush1.bf16.msra.mxu0 %v7589_v6  ;;  %4567 = vmatpush1.bf16.msra.mxu1 %v7592_v7 }
 0x19c   :  { %4158 = vmatprep.subr.bf16.mxu0 %v7597_v8  ;;  %4568 = vmatprep.subr.bf16.mxu1 %v7600_v9 }
 0x19f   :  { %4159 = vmatpush1.bf16.msra.mxu0 %v7595_v10  ;;  %4569 = vmatpush1.bf16.msra.mxu1 %v7598_v11 }
 0x1a0   :  { %4160 = vmatprep.subr.bf16.mxu0 %v7603_v12  ;;  %4570 = vmatprep.subr.bf16.mxu1 %v7606_v52 }
 0x1a3   :  { %4161 = vmatpush1.bf16.msra.mxu0 %v7601_v15  ;;  %4571 = vmatpush1.bf16.msra.mxu1 %v7604_v16 }
 0x1a4   :  { %4162 = vmatprep.subr.bf16.mxu0 %v7609_v17  ;;  %4572 = vmatprep.subr.bf16.mxu1 %v7612_v18 }
 0x1a7   :  { %4163 = vmatpush1.bf16.msra.mxu0 %v7607_v19  ;;  %4573 = vmatpush1.bf16.msra.mxu1 %v7610_v20 }
 0x1a8   :  { %4164 = vmatprep.subr.bf16.mxu0 %v7615_v22  ;;  %4574 = vmatprep.subr.bf16.mxu1 %v7618_v23 }
 0x1ab   :  { %4165 = vmatpush1.bf16.msra.mxu0 %v7613_v24  ;;  %4575 = vmatpush1.bf16.msra.mxu1 %v7616_v13 }
 0x1ac   :  { %4166 = vmatprep.subr.bf16.mxu0 %v7621_v27  ;;  %4576 = vmatprep.subr.bf16.mxu1 %v7624_v28 }
 0x1af   :  { %4167 = vmatpush1.bf16.msra.mxu0 %v7619_v29  ;;  %4577 = vmatpush1.bf16.msra.mxu1 %v7622_v14 }
 0x1b0   :  { %4168 = vmatprep.subr.bf16.mxu0 %v7627_v30  ;;  %4578 = vmatprep.subr.bf16.mxu1 %v7630_v31 }
 0x1b3   :  { %4169 = vmatpush1.bf16.msra.mxu0 %v7625_v25  ;;  %4579 = vmatpush1.bf16.msra.mxu1 %v7628_v32 }
 0x1b4   :  { %4170 = vmatprep.subr.bf16.mxu0 %v7633_v33  ;;  %4580 = vmatprep.subr.bf16.mxu1 %v7636_v26 }
 0x1b7   :  { %4171 = vmatpush1.bf16.msra.mxu0 %v7631_v36  ;;  %4581 = vmatpush1.bf16.msra.mxu1 %v7634_v37 }
 0x1b8   :  { %4172 = vmatprep.subr.bf16.mxu0 %v7639_v21  ;;  %4582 = vmatprep.subr.bf16.mxu1 %v7642_v39 }
 0x1bb   :  { %4173 = vmatpush1.bf16.msra.mxu0 %v7637_v40  ;;  %4583 = vmatpush1.bf16.msra.mxu1 %v7640_v41 }
 0x1bc   :  { %4174 = vmatprep.subr.bf16.mxu0 %v7645_v34  ;;  %4584 = vmatprep.subr.bf16.mxu1 %v7648_v43 }
 0x1bf   :  { %4175 = vmatpush1.bf16.msra.mxu0 %v7643_v44  ;;  %4585 = vmatpush1.bf16.msra.mxu1 %v7646_v45 }
 0x1c0   :  { %4185 = vmatprep.subr.bf16.mxu0 %v7652_v46  ;;  %4595 = vmatprep.subr.bf16.mxu1 %v7655_v35 }
 0x1c2   :  { %4177 = vmatmul.mubr.bf16.vlgmr.msra.gmra.mrb[0].mxu0 %v9619_v48  ;;  %4587 = vmatmul.mubr.bf16.vlgmr.msra.gmra.mrb[0].mxu1 %v9619_v48 }
 0x1c3   :  { %4186 = vmatpush1.bf16.msra.mxu0 %v7650_v50  ;;  %4596 = vmatpush1.bf16.msra.mxu1 %v7653_v51 }
 0x1c4   :  { %4187 = vmatprep.subr.bf16.mxu0 %v7658_v53  ;;  %4597 = vmatprep.subr.bf16.mxu1 %v7661_v38 }
 0x1c5   :  { %4217 = vmatprep.mubr.bf16.mxu0 %v767_v54  ;;  %4627 = vmatprep.mubr.bf16.mxu1 %v767_v54 }
 0x1c7   :  { %4188 = vmatpush1.bf16.msra.mxu0 %v7656_v55  ;;  %4598 = vmatpush1.bf16.msra.mxu1 %v7659_v56 }
 0x1c8   :  { %4189 = vmatprep.subr.bf16.mxu0 %v7664_v47  ;;  %4599 = vmatprep.subr.bf16.mxu1 %v7667_v57 }
 0x1cb   :  { %4190 = vmatpush1.bf16.msra.mxu0 %v7662_v58  ;;  %4600 = vmatpush1.bf16.msra.mxu1 %v7665_v59 }
 0x1cc   :  { %4191 = vmatprep.subr.bf16.mxu0 %v7670_v60  ;;  %4601 = vmatprep.subr.bf16.mxu1 %v7673_v61 }
 0x1cf   :  { %4192 = vmatpush1.bf16.msra.mxu0 %v7668_v62  ;;  %4602 = vmatpush1.bf16.msra.mxu1 %v7671_v63 }
 0x1d0   :  { %4193 = vmatprep.subr.bf16.mxu0 %v7676_v0  ;;  %4603 = vmatprep.subr.bf16.mxu1 %v7679_v1 }
 0x1d1   :  { %12 = vsyncpa [#allocation3], 0  ;;  %v7680_v6 = vld [vmem:[%s10674_s1 + $0xea0] ss:$16 sps:$4 sm:$0xff]   ;;  %v7683_v7 = vld [vmem:[%s10674_s1 + $0xea8] ss:$16 sps:$4 sm:$0xff]   ;;  %v765_v56 = vcombine.high %v9619_v48, %v9619_v48 }
 0x1d2   :  { %v7688_v8 = vld [vmem:[%s10674_s1 + $0xec4] ss:$16 sps:$4 sm:$0xff]   ;;  %v7691_v9 = vld [vmem:[%s10674_s1 + $0xecc] ss:$16 sps:$4 sm:$0xff]   ;;  %v7686_v10 = vld [vmem:[%s10674_s1 + $0xec0] ss:$16 sps:$4 sm:$0xff]  }
 0x1d3   :  { %4194 = vmatpush1.bf16.msra.mxu0 %v7674_v2  ;;  %4604 = vmatpush1.bf16.msra.mxu1 %v7677_v3  ;;  %v7689_v11 = vld [vmem:[%s10674_s1 + $0xec8] ss:$16 sps:$4 sm:$0xff]   ;;  %v7694_v12 = vld [vmem:[%s10674_s1 + $0xee4] ss:$16 sps:$4 sm:$0xff]   ;;  %v7697_v52 = vld [vmem:[%s10674_s1 + $0xeec] ss:$16 sps:$4 sm:$0xff]  }
 0x1d4   :  { %4195 = vmatprep.subr.bf16.mxu0 %v7682_v4  ;;  %4605 = vmatprep.subr.bf16.mxu1 %v7685_v5  ;;  %v7692_v15 = vld [vmem:[%s10674_s1 + $0xee0] ss:$16 sps:$4 sm:$0xff]   ;;  %v7695_v16 = vld [vmem:[%s10674_s1 + $0xee8] ss:$16 sps:$4 sm:$0xff]   ;;  %v7700_v17 = vld [vmem:[%s10674_s1 + $0xf04] ss:$16 sps:$4 sm:$0xff]  }
 0x1d5   :  { %v7703_v18 = vld [vmem:[%s10674_s1 + $0xf0c] ss:$16 sps:$4 sm:$0xff]   ;;  %v7698_v19 = vld [vmem:[%s10674_s1 + $0xf00] ss:$16 sps:$4 sm:$0xff]   ;;  %v7701_v20 = vld [vmem:[%s10674_s1 + $0xf08] ss:$16 sps:$4 sm:$0xff]  }
 0x1d6   :  { %v7706_v22 = vld [vmem:[%s10674_s1 + $0xf24] ss:$16 sps:$4 sm:$0xff]   ;;  %v7709_v23 = vld [vmem:[%s10674_s1 + $0xf2c] ss:$16 sps:$4 sm:$0xff]   ;;  %v7704_v24 = vld [vmem:[%s10674_s1 + $0xf20] ss:$16 sps:$4 sm:$0xff]  }
 0x1d7   :  { %4196 = vmatpush1.bf16.msra.mxu0 %v7680_v6  ;;  %4606 = vmatpush1.bf16.msra.mxu1 %v7683_v7  ;;  %v7707_v13 = vld [vmem:[%s10674_s1 + $0xf28] ss:$16 sps:$4 sm:$0xff]   ;;  %v7712_v27 = vld [vmem:[%s10674_s1 + $0xf44] ss:$16 sps:$4 sm:$0xff]   ;;  %v7715_v28 = vld [vmem:[%s10674_s1 + $0xf4c] ss:$16 sps:$4 sm:$0xff]  }
 0x1d8   :  { %4197 = vmatprep.subr.bf16.mxu0 %v7688_v8  ;;  %4607 = vmatprep.subr.bf16.mxu1 %v7691_v9  ;;  %v7710_v29 = vld [vmem:[%s10674_s1 + $0xf40] ss:$16 sps:$4 sm:$0xff]   ;;  %v7713_v14 = vld [vmem:[%s10674_s1 + $0xf48] ss:$16 sps:$4 sm:$0xff]   ;;  %v7718_v30 = vld [vmem:[%s10674_s1 + $0xf64] ss:$16 sps:$4 sm:$0xff]  }
 0x1d9   :  { %v7721_v31 = vld [vmem:[%s10674_s1 + $0xf6c] ss:$16 sps:$4 sm:$0xff]   ;;  %v7716_v25 = vld [vmem:[%s10674_s1 + $0xf60] ss:$16 sps:$4 sm:$0xff]   ;;  %v7719_v32 = vld [vmem:[%s10674_s1 + $0xf68] ss:$16 sps:$4 sm:$0xff]  }
 0x1da   :  { %v7724_v33 = vld [vmem:[%s10674_s1 + $0xf84] ss:$16 sps:$4 sm:$0xff]   ;;  %v7727_v26 = vld [vmem:[%s10674_s1 + $0xf8c] ss:$16 sps:$4 sm:$0xff]   ;;  %v7722_v36 = vld [vmem:[%s10674_s1 + $0xf80] ss:$16 sps:$4 sm:$0xff]  }
 0x1db   :  { %4198 = vmatpush1.bf16.msra.mxu0 %v7686_v10  ;;  %4608 = vmatpush1.bf16.msra.mxu1 %v7689_v11  ;;  %v7725_v37 = vld [vmem:[%s10674_s1 + $0xf88] ss:$16 sps:$4 sm:$0xff]   ;;  %v7730_v21 = vld [vmem:[%s10674_s1 + $0xfa4] ss:$16 sps:$4 sm:$0xff]   ;;  %v7733_v39 = vld [vmem:[%s10674_s1 + $0xfac] ss:$16 sps:$4 sm:$0xff]  }
 0x1dc   :  { %4199 = vmatprep.subr.bf16.mxu0 %v7694_v12  ;;  %4609 = vmatprep.subr.bf16.mxu1 %v7697_v52  ;;  %v7728_v40 = vld [vmem:[%s10674_s1 + $0xfa0] ss:$16 sps:$4 sm:$0xff]   ;;  %v7731_v41 = vld [vmem:[%s10674_s1 + $0xfa8] ss:$16 sps:$4 sm:$0xff]   ;;  %v7736_v34 = vld [vmem:[%s10674_s1 + $0xfc4] ss:$16 sps:$4 sm:$0xff]  }
 0x1dd   :  { %v7739_v43 = vld [vmem:[%s10674_s1 + $0xfcc] ss:$16 sps:$4 sm:$0xff]   ;;  %v7734_v44 = vld [vmem:[%s10674_s1 + $0xfc0] ss:$16 sps:$4 sm:$0xff]   ;;  %v7737_v45 = vld [vmem:[%s10674_s1 + $0xfc8] ss:$16 sps:$4 sm:$0xff]  }
 0x1de   :  { %v7742_v46 = vld [vmem:[%s10674_s1 + $0xfe4] ss:$16 sps:$4 sm:$0xff]   ;;  %v7745_v35 = vld [vmem:[%s10674_s1 + $0xfec] ss:$16 sps:$4 sm:$0xff]   ;;  %v7740_v51 = vld [vmem:[%s10674_s1 + $0xfe0] ss:$16 sps:$4 sm:$0xff]  }
 0x1df   :  { %4200 = vmatpush1.bf16.msra.mxu0 %v7692_v15  ;;  %4610 = vmatpush1.bf16.msra.mxu1 %v7695_v16  ;;  %v9808_v50 = vld.sshfl [vmem:[%s10673_s0 + $0x10] sm:$0x33 pattern:$0x75316420]  ;;  %v7743_v53 = vld [vmem:[%s10674_s1 + $0xfe8] ss:$16 sps:$4 sm:$0xff]  }
 0x1e0   :  { %4201 = vmatprep.subr.bf16.mxu0 %v7700_v17  ;;  %4611 = vmatprep.subr.bf16.mxu1 %v7703_v18  ;;  %v7748_v38 = vld [vmem:[%s10674_s1 + $0x1004] ss:$16 sps:$4 sm:$0xff]   ;;  %v7751_v54 = vld [vmem:[%s10674_s1 + $0x100c] ss:$16 sps:$4 sm:$0xff]   ;;  %v775_v55 = vcombine.high %v9808_v50, %v9808_v50  ;;  %v7746_v47 = vld [vmem:[%s10674_s1 + $0x1000] ss:$16 sps:$4 sm:$0xff]  }
 0x1e1   :  { %v7749_v57 = vld [vmem:[%s10674_s1 + $0x1008] ss:$16 sps:$4 sm:$0xff]   ;;  %v7754_v58 = vld [vmem:[%s10674_s1 + $0x1024] ss:$16 sps:$4 sm:$0xff]   ;;  %v7757_v48 = vld [vmem:[%s10674_s1 + $0x102c] ss:$16 sps:$4 sm:$0xff]  }
 0x1e2   :  { %v9839_v59 = vrot.slane %v775_v55, %v8325_v49  ;;  %v7752_v60 = vld [vmem:[%s10674_s1 + $0x1020] ss:$16 sps:$4 sm:$0xff]   ;;  %v7755_v61 = vld [vmem:[%s10674_s1 + $0x1028] ss:$16 sps:$4 sm:$0xff]   ;;  %v7760_v62 = vld [vmem:[%s10674_s1 + $0x1044] ss:$16 sps:$4 sm:$0xff]  }
 0x1e3   :  { %4202 = vmatpush1.bf16.msra.mxu0 %v7698_v19  ;;  %4612 = vmatpush1.bf16.msra.mxu1 %v7701_v20  ;;  %v7763_v63 = vld [vmem:[%s10674_s1 + $0x104c] ss:$16 sps:$4 sm:$0xff]   ;;  %v7758_v0 = vld [vmem:[%s10674_s1 + $0x1040] ss:$16 sps:$4 sm:$0xff]   ;;  %v7761_v1 = vld [vmem:[%s10674_s1 + $0x1048] ss:$16 sps:$4 sm:$0xff]  }
 0x1e4   :  { %4203 = vmatprep.subr.bf16.mxu0 %v7706_v22  ;;  %4613 = vmatprep.subr.bf16.mxu1 %v7709_v23  ;;  %v7766_v2 = vld [vmem:[%s10674_s1 + $0x1064] ss:$16 sps:$4 sm:$0xff]   ;;  %v7769_v3 = vld [vmem:[%s10674_s1 + $0x106c] ss:$16 sps:$4 sm:$0xff]   ;;  %v7764_v4 = vld [vmem:[%s10674_s1 + $0x1060] ss:$16 sps:$4 sm:$0xff]  }
 0x1e5   :  { %v7767_v5 = vld [vmem:[%s10674_s1 + $0x1068] ss:$16 sps:$4 sm:$0xff]   ;;  %v7772_v6 = vld [vmem:[%s10674_s1 + $0x1084] ss:$16 sps:$4 sm:$0xff]   ;;  %v7775_v7 = vld [vmem:[%s10674_s1 + $0x108c] ss:$16 sps:$4 sm:$0xff]  }
 0x1e6   :  { %v7770_v8 = vld [vmem:[%s10674_s1 + $0x1080] ss:$16 sps:$4 sm:$0xff]   ;;  %v7773_v9 = vld [vmem:[%s10674_s1 + $0x1088] ss:$16 sps:$4 sm:$0xff]   ;;  %v7778_v10 = vld [vmem:[%s10674_s1 + $0x10a4] ss:$16 sps:$4 sm:$0xff]  }
 0x1e7   :  { %4204 = vmatpush1.bf16.msra.mxu0 %v7704_v24  ;;  %4614 = vmatpush1.bf16.msra.mxu1 %v7707_v13  ;;  %v7781_v11 = vld [vmem:[%s10674_s1 + $0x10ac] ss:$16 sps:$4 sm:$0xff]   ;;  %v7776_v12 = vld [vmem:[%s10674_s1 + $0x10a0] ss:$16 sps:$4 sm:$0xff]   ;;  %v7779_v52 = vld [vmem:[%s10674_s1 + $0x10a8] ss:$16 sps:$4 sm:$0xff]  }
 0x1e8   :  { %4205 = vmatprep.subr.bf16.mxu0 %v7712_v27  ;;  %4615 = vmatprep.subr.bf16.mxu1 %v7715_v28  ;;  %v7784_v15 = vld [vmem:[%s10674_s1 + $0x10c4] ss:$16 sps:$4 sm:$0xff]   ;;  %v7787_v16 = vld [vmem:[%s10674_s1 + $0x10cc] ss:$16 sps:$4 sm:$0xff]   ;;  %v7782_v17 = vld [vmem:[%s10674_s1 + $0x10c0] ss:$16 sps:$4 sm:$0xff]  }
 0x1e9   :  { %v7785_v18 = vld [vmem:[%s10674_s1 + $0x10c8] ss:$16 sps:$4 sm:$0xff]   ;;  %v7790_v19 = vld [vmem:[%s10674_s1 + $0x10e4] ss:$16 sps:$4 sm:$0xff]   ;;  %v7793_v20 = vld [vmem:[%s10674_s1 + $0x10ec] ss:$16 sps:$4 sm:$0xff]  }
 0x1ea   :  { %v7788_v22 = vld [vmem:[%s10674_s1 + $0x10e0] ss:$16 sps:$4 sm:$0xff]   ;;  %v7791_v23 = vld [vmem:[%s10674_s1 + $0x10e8] ss:$16 sps:$4 sm:$0xff]   ;;  %v7796_v24 = vld [vmem:[%s10674_s1 + $0x1104] ss:$16 sps:$4 sm:$0xff]  }
 0x1eb   :  { %4206 = vmatpush1.bf16.msra.mxu0 %v7710_v29  ;;  %4616 = vmatpush1.bf16.msra.mxu1 %v7713_v14  ;;  %v7799_v13 = vld [vmem:[%s10674_s1 + $0x110c] ss:$16 sps:$4 sm:$0xff]   ;;  %v7794_v27 = vld [vmem:[%s10674_s1 + $0x1100] ss:$16 sps:$4 sm:$0xff]   ;;  %v7797_v28 = vld [vmem:[%s10674_s1 + $0x1108] ss:$16 sps:$4 sm:$0xff]  }
 0x1ec   :  { %4207 = vmatprep.subr.bf16.mxu0 %v7718_v30  ;;  %4617 = vmatprep.subr.bf16.mxu1 %v7721_v31  ;;  %v7802_v29 = vld [vmem:[%s10674_s1 + $0x1124] ss:$16 sps:$4 sm:$0xff]   ;;  %v7805_v14 = vld [vmem:[%s10674_s1 + $0x112c] ss:$16 sps:$4 sm:$0xff]   ;;  %v7800_v30 = vld [vmem:[%s10674_s1 + $0x1120] ss:$16 sps:$4 sm:$0xff]  }
 0x1ed   :  { %v7803_v31 = vld [vmem:[%s10674_s1 + $0x1128] ss:$16 sps:$4 sm:$0xff]   ;;  %v7838_v55 = vld [vmem:[%s10674_s1 + $0x11e4] ss:$16 sps:$4 sm:$0xff]   ;;  %vm3881_vm0 = vcmask 146432   ;;  %vm3885_vm1 = vcmask 1040384  }
 0x1ee   :  { %vm5504_vm2 = vcmask 949248   ;;  %vm5508_vm3 = vcmask 1041408   ;;  %s8149_s17 = smov [#allocation2]   ;;  %vm6038_vm4 = vcmask 74752  }
 0x1ef   :  { %4208 = vmatpush1.bf16.msra.mxu0 %v7716_v25  ;;  %4618 = vmatpush1.bf16.msra.mxu1 %v7719_v32  ;;  %v7808_v25 = vld [vmem:[%s10674_s1 + $0x1144] ss:$16 sps:$4 sm:$0xff]   ;;  %v7811_v32 = vld [vmem:[%s10674_s1 + $0x114c] ss:$16 sps:$4 sm:$0xff]   ;;  %s6046_s18 = sshll.u32 %s8149_s17, 4  ;;  %s6047_s18 = int_to_ptr.vmem [resolvable:$true] %s6046_s18 }
 0x1f0   :  { %4209 = vmatprep.subr.bf16.mxu0 %v7724_v33  ;;  %4619 = vmatprep.subr.bf16.mxu1 %v7727_v26  ;;  %v7806_v33 = vld [vmem:[%s10674_s1 + $0x1140] ss:$16 sps:$4 sm:$0xff]   ;;  %v7809_v26 = vld [vmem:[%s10674_s1 + $0x1148] ss:$16 sps:$4 sm:$0xff]   ;;  %s8124_s19 = scalar_lea.vmem %s6047_s18, 32  ;;  %p8129_p1 = scmp.lt.s32.totalorder %s6047_s18, %s6047_s18 }
 0x1f1   :  { %p8125_p0 = scmp.ne.s32.totalorder %s6047_s18, %s8124_s19  ;;  %p8130_p2 = scmp.lt.s32.totalorder %s8124_s19, %s8124_s19 }
 0x1f3   :  { %4210 = vmatpush1.bf16.msra.mxu0 %v7722_v36  ;;  %4620 = vmatpush1.bf16.msra.mxu1 %v7725_v37  ;;  %v7814_v36 = vld [vmem:[%s10674_s1 + $0x1164] ss:$16 sps:$4 sm:$0xff]   ;;  %v7817_v37 = vld [vmem:[%s10674_s1 + $0x116c] ss:$16 sps:$4 sm:$0xff]   ;;  %p8131_p3 = por %p8130_p2, %p8129_p1 }
 0x1f4   :  { %4211 = vmatprep.subr.bf16.mxu0 %v7730_v21  ;;  %4621 = vmatprep.subr.bf16.mxu1 %v7733_v39  ;;  %v7812_v21 = vld [vmem:[%s10674_s1 + $0x1160] ss:$16 sps:$4 sm:$0xff]   ;;  %v7815_v39 = vld [vmem:[%s10674_s1 + $0x1168] ss:$16 sps:$4 sm:$0xff]  }
 0x1f5   :  { %p8132_p4 = pnand %p8131_p3, %p8125_p0 }
 0x1f7   :  { %4212 = vmatpush1.bf16.msra.mxu0 %v7728_v40  ;;  %4622 = vmatpush1.bf16.msra.mxu1 %v7731_v41  ;;  %v7820_v40 = vld [vmem:[%s10674_s1 + $0x1184] ss:$16 sps:$4 sm:$0xff]   ;;  %v7823_v41 = vld [vmem:[%s10674_s1 + $0x118c] ss:$16 sps:$4 sm:$0xff]  }
 0x1f8   :  { %4213 = vmatprep.subr.bf16.mxu0 %v7736_v34  ;;  %4623 = vmatprep.subr.bf16.mxu1 %v7739_v43  ;;  %v7818_v34 = vld [vmem:[%s10674_s1 + $0x1180] ss:$16 sps:$4 sm:$0xff]   ;;  %v7821_v43 = vld [vmem:[%s10674_s1 + $0x1188] ss:$16 sps:$4 sm:$0xff]  }
 0x1fb   :  { %4214 = vmatpush1.bf16.msra.mxu0 %v7734_v44  ;;  %4624 = vmatpush1.bf16.msra.mxu1 %v7737_v45  ;;  %v7826_v44 = vld [vmem:[%s10674_s1 + $0x11a4] ss:$16 sps:$4 sm:$0xff]   ;;  %v7829_v45 = vld [vmem:[%s10674_s1 + $0x11ac] ss:$16 sps:$4 sm:$0xff]  }
 0x1fc   :  { %4215 = vmatprep.subr.bf16.mxu0 %v7742_v46  ;;  %4625 = vmatprep.subr.bf16.mxu1 %v7745_v35  ;;  %v7824_v46 = vld [vmem:[%s10674_s1 + $0x11a0] ss:$16 sps:$4 sm:$0xff]   ;;  %v7827_v35 = vld [vmem:[%s10674_s1 + $0x11a8] ss:$16 sps:$4 sm:$0xff]  }
 0x1ff   :  { %4216 = vmatpush1.bf16.msra.mxu0 %v7740_v51  ;;  %4626 = vmatpush1.bf16.msra.mxu1 %v7743_v53  ;;  %v7832_v51 = vld [vmem:[%s10674_s1 + $0x11c4] ss:$16 sps:$4 sm:$0xff]   ;;  %v7835_v53 = vld [vmem:[%s10674_s1 + $0x11cc] ss:$16 sps:$4 sm:$0xff]  }
 0x200   :  { %4226 = vmatprep.subr.bf16.mxu0 %v7748_v38  ;;  %4636 = vmatprep.subr.bf16.mxu1 %v7751_v54  ;;  %v7830_v38 = vld [vmem:[%s10674_s1 + $0x11c0] ss:$16 sps:$4 sm:$0xff]   ;;  %v7833_v54 = vld [vmem:[%s10674_s1 + $0x11c8] ss:$16 sps:$4 sm:$0xff]  }
 0x202   :  { %4218 = vmatmul.mubr.bf16.vlgmr.msra.gmra.mrb[0].mxu0 %v765_v56  ;;  %4628 = vmatmul.mubr.bf16.vlgmr.msra.gmra.mrb[0].mxu1 %v765_v56  ;;  %v7841_v56 = vld [vmem:[%s10674_s1 + $0x11ec] ss:$16 sps:$4 sm:$0xff]  }
 0x203   :  { %4227 = vmatpush1.bf16.msra.mxu0 %v7746_v47  ;;  %4637 = vmatpush1.bf16.msra.mxu1 %v7749_v57  ;;  %v7836_v47 = vld [vmem:[%s10674_s1 + $0x11e0] ss:$16 sps:$4 sm:$0xff]   ;;  %v7839_v57 = vld [vmem:[%s10674_s1 + $0x11e8] ss:$16 sps:$4 sm:$0xff]  }
 0x204   :  { %4228 = vmatprep.subr.bf16.mxu0 %v7754_v58  ;;  %4638 = vmatprep.subr.bf16.mxu1 %v7757_v48  ;;  %v7844_v58 = vld [vmem:[%s10674_s1 + $0x1204] ss:$16 sps:$4 sm:$0xff]   ;;  %v7847_v48 = vld [vmem:[%s10674_s1 + $0x120c] ss:$16 sps:$4 sm:$0xff]  }
 0x205   :  { %4258 = vmatprep.mubr.bf16.mxu0 %v9839_v59  ;;  %4668 = vmatprep.mubr.bf16.mxu1 %v9839_v59 }
 0x207   :  { %4229 = vmatpush1.bf16.msra.mxu0 %v7752_v60  ;;  %4639 = vmatpush1.bf16.msra.mxu1 %v7755_v61  ;;  %v10025_v60 = vrot.slane %v9808_v50, %v8325_v49  ;;  %v7842_v61 = vld [vmem:[%s10674_s1 + $0x1200] ss:$16 sps:$4 sm:$0xff]   ;;  %v7853_v49 = vld [vmem:[%s10674_s1 + $0x122c] ss:$16 sps:$4 sm:$0xff]   ;;  %v791_v50 = vcombine.high %v9839_v59, %v9839_v59  ;;  %v7856_v59 = vld [vmem:[%s10674_s1 + $0x1244] ss:$16 sps:$4 sm:$0xff]  }
 0x208   :  { %4230 = vmatprep.subr.bf16.mxu0 %v7760_v62  ;;  %4640 = vmatprep.subr.bf16.mxu1 %v7763_v63  ;;  %v7845_v62 = vld [vmem:[%s10674_s1 + $0x1208] ss:$16 sps:$4 sm:$0xff]   ;;  %v7850_v63 = vld [vmem:[%s10674_s1 + $0x1224] ss:$16 sps:$4 sm:$0xff]  }
 0x20b   :  { %4231 = vmatpush1.bf16.msra.mxu0 %v7758_v0  ;;  %4641 = vmatpush1.bf16.msra.mxu1 %v7761_v1  ;;  %v7848_v0 = vld [vmem:[%s10674_s1 + $0x1220] ss:$16 sps:$4 sm:$0xff]   ;;  %v7851_v1 = vld [vmem:[%s10674_s1 + $0x1228] ss:$16 sps:$4 sm:$0xff]  }
 0x20c   :  { %4232 = vmatprep.subr.bf16.mxu0 %v7766_v2  ;;  %4642 = vmatprep.subr.bf16.mxu1 %v7769_v3  ;;  %v7859_v2 = vld [vmem:[%s10674_s1 + $0x124c] ss:$16 sps:$4 sm:$0xff]   ;;  %v7854_v3 = vld [vmem:[%s10674_s1 + $0x1240] ss:$16 sps:$4 sm:$0xff]  }
 0x20f   :  { %4233 = vmatpush1.bf16.msra.mxu0 %v7764_v4  ;;  %4643 = vmatpush1.bf16.msra.mxu1 %v7767_v5  ;;  %v7857_v4 = vld [vmem:[%s10674_s1 + $0x1248] ss:$16 sps:$4 sm:$0xff]   ;;  %v7862_v5 = vld [vmem:[%s10674_s1 + $0x1264] ss:$16 sps:$4 sm:$0xff]  }
 0x210   :  { %4234 = vmatprep.subr.bf16.mxu0 %v7772_v6  ;;  %4644 = vmatprep.subr.bf16.mxu1 %v7775_v7  ;;  %v7865_v6 = vld [vmem:[%s10674_s1 + $0x126c] ss:$16 sps:$4 sm:$0xff]   ;;  %v7860_v7 = vld [vmem:[%s10674_s1 + $0x1260] ss:$16 sps:$4 sm:$0xff]  }
 0x213   :  { %4235 = vmatpush1.bf16.msra.mxu0 %v7770_v8  ;;  %4645 = vmatpush1.bf16.msra.mxu1 %v7773_v9  ;;  %v7863_v8 = vld [vmem:[%s10674_s1 + $0x1268] ss:$16 sps:$4 sm:$0xff]   ;;  %v7868_v9 = vld [vmem:[%s10674_s1 + $0x1284] ss:$16 sps:$4 sm:$0xff]  }
 0x214   :  { %4236 = vmatprep.subr.bf16.mxu0 %v7778_v10  ;;  %4646 = vmatprep.subr.bf16.mxu1 %v7781_v11  ;;  %v7871_v10 = vld [vmem:[%s10674_s1 + $0x128c] ss:$16 sps:$4 sm:$0xff]   ;;  %v7866_v11 = vld [vmem:[%s10674_s1 + $0x1280] ss:$16 sps:$4 sm:$0xff]  }
 0x217   :  { %4237 = vmatpush1.bf16.msra.mxu0 %v7776_v12  ;;  %4647 = vmatpush1.bf16.msra.mxu1 %v7779_v52  ;;  %v7869_v12 = vld [vmem:[%s10674_s1 + $0x1288] ss:$16 sps:$4 sm:$0xff]   ;;  %v7874_v52 = vld [vmem:[%s10674_s1 + $0x12a4] ss:$16 sps:$4 sm:$0xff]  }
 0x218   :  { %4238 = vmatprep.subr.bf16.mxu0 %v7784_v15  ;;  %4648 = vmatprep.subr.bf16.mxu1 %v7787_v16  ;;  %v7877_v15 = vld [vmem:[%s10674_s1 + $0x12ac] ss:$16 sps:$4 sm:$0xff]   ;;  %v7872_v16 = vld [vmem:[%s10674_s1 + $0x12a0] ss:$16 sps:$4 sm:$0xff]  }
 0x21b   :  { %4239 = vmatpush1.bf16.msra.mxu0 %v7782_v17  ;;  %4649 = vmatpush1.bf16.msra.mxu1 %v7785_v18  ;;  %v7875_v17 = vld [vmem:[%s10674_s1 + $0x12a8] ss:$16 sps:$4 sm:$0xff]   ;;  %v7880_v18 = vld [vmem:[%s10674_s1 + $0x12c4] ss:$16 sps:$4 sm:$0xff]  }
 0x21c   :  { %4240 = vmatprep.subr.bf16.mxu0 %v7790_v19  ;;  %4650 = vmatprep.subr.bf16.mxu1 %v7793_v20  ;;  %v7883_v19 = vld [vmem:[%s10674_s1 + $0x12cc] ss:$16 sps:$4 sm:$0xff]   ;;  %v7878_v20 = vld [vmem:[%s10674_s1 + $0x12c0] ss:$16 sps:$4 sm:$0xff]  }
 0x21f   :  { %4241 = vmatpush1.bf16.msra.mxu0 %v7788_v22  ;;  %4651 = vmatpush1.bf16.msra.mxu1 %v7791_v23  ;;  %v7881_v22 = vld [vmem:[%s10674_s1 + $0x12c8] ss:$16 sps:$4 sm:$0xff]   ;;  %v7886_v23 = vld [vmem:[%s10674_s1 + $0x12e4] ss:$16 sps:$4 sm:$0xff]  }
 0x220   :  { %4242 = vmatprep.subr.bf16.mxu0 %v7796_v24  ;;  %4652 = vmatprep.subr.bf16.mxu1 %v7799_v13  ;;  %v7889_v24 = vld [vmem:[%s10674_s1 + $0x12ec] ss:$16 sps:$4 sm:$0xff]   ;;  %v7884_v13 = vld [vmem:[%s10674_s1 + $0x12e0] ss:$16 sps:$4 sm:$0xff]  }
 0x223   :  { %4243 = vmatpush1.bf16.msra.mxu0 %v7794_v27  ;;  %4653 = vmatpush1.bf16.msra.mxu1 %v7797_v28  ;;  %v7887_v27 = vld [vmem:[%s10674_s1 + $0x12e8] ss:$16 sps:$4 sm:$0xff]   ;;  %v7892_v28 = vld [vmem:[%s10674_s1 + $0x1304] ss:$16 sps:$4 sm:$0xff]  }
 0x224   :  { %4244 = vmatprep.subr.bf16.mxu0 %v7802_v29  ;;  %4654 = vmatprep.subr.bf16.mxu1 %v7805_v14  ;;  %v7895_v29 = vld [vmem:[%s10674_s1 + $0x130c] ss:$16 sps:$4 sm:$0xff]   ;;  %v643_v14 = vld [vmem:[%s10674_s1 + $0x1320] sm:$0x11] }
 0x227   :  { %4245 = vmatpush1.bf16.msra.mxu0 %v7800_v30  ;;  %4655 = vmatpush1.bf16.msra.mxu1 %v7803_v31  ;;  %v644_v30 = vld [vmem:[%s10674_s1 + $0x1328] sm:$0x11]  ;;  %v7890_v31 = vld [vmem:[%s10674_s1 + $0x1300] ss:$16 sps:$4 sm:$0xff]  }
 0x228   :  { %4246 = vmatprep.subr.bf16.mxu0 %v7808_v25  ;;  %4656 = vmatprep.subr.bf16.mxu1 %v7811_v32  ;;  %v7893_v25 = vld [vmem:[%s10674_s1 + $0x1308] ss:$16 sps:$4 sm:$0xff]   ;;  %v6668_v32 = vcombine.high %v643_v14, %v643_v14 }
 0x22b   :  { %4247 = vmatpush1.bf16.msra.mxu0 %v7806_v33  ;;  %4657 = vmatpush1.bf16.msra.mxu1 %v7809_v26  ;;  %v6670_v33 = vcombine.high %v644_v30, %v644_v30  ;;  %v6667_v26 = vcombine.low %v643_v14, %v643_v14  ;;  %v7980_v14 = vld [vmem:[%s10676_s3 + $0x1a4] ss:$16 sps:$4 sm:$0xff]  }
 0x22c   :  { %4248 = vmatprep.subr.bf16.mxu0 %v7814_v36  ;;  %4658 = vmatprep.subr.bf16.mxu1 %v7817_v37  ;;  %v6669_v36 = vcombine.low %v644_v30, %v644_v30  ;;  %v7983_v30 = vld [vmem:[%s10676_s3 + $0x1ac] ss:$16 sps:$4 sm:$0xff]  }
 0x22d   :  { %v3887_v37 = vsel %vm3885_vm1, %v6667_v26, 0  ;;  %v7984_v26 = vld [vmem:[%s10676_s3 + $0x1c0] ss:$16 sps:$4 sm:$0xff]  }
 0x22f   :  { %4249 = vmatpush1.bf16.msra.mxu0 %v7812_v21  ;;  %4659 = vmatpush1.bf16.msra.mxu1 %v7815_v39  ;;  %v3893_v21 = vsel %vm3885_vm1, %v6669_v36, 0  ;;  %v7902_v39 = vld [vmem:[%s10676_s3 + $0x4] ss:$16 sps:$4 sm:$0xff]   ;;  %v7987_v36 = vld [vmem:[%s10676_s3 + $0x1c8] ss:$16 sps:$4 sm:$0xff]  }
 0x230   :  { %4250 = vmatprep.subr.bf16.mxu0 %v7820_v40  ;;  %4660 = vmatprep.subr.bf16.mxu1 %v7823_v41  ;;  %v7905_v40 = vld [vmem:[%s10676_s3 + $0xc] ss:$16 sps:$4 sm:$0xff]   ;;  %v790_v41 = vcombine.high %v10025_v60, %v10025_v60 }
 0x233   :  { %4251 = vmatpush1.bf16.msra.mxu0 %v7818_v34  ;;  %4661 = vmatpush1.bf16.msra.mxu1 %v7821_v43  ;;  %v7900_v34 = vld [vmem:[%s10676_s3] ss:$16 sps:$4 sm:$0xff]   ;;  %v7903_v43 = vld [vmem:[%s10676_s3 + $0x8] ss:$16 sps:$4 sm:$0xff]  }
 0x234   :  { %4252 = vmatprep.subr.bf16.mxu0 %v7826_v44  ;;  %4662 = vmatprep.subr.bf16.mxu1 %v7829_v45  ;;  %v7908_v44 = vld [vmem:[%s10676_s3 + $0x24] ss:$16 sps:$4 sm:$0xff]   ;;  %v7911_v45 = vld [vmem:[%s10676_s3 + $0x2c] ss:$16 sps:$4 sm:$0xff]  }
 0x237   :  { %4253 = vmatpush1.bf16.msra.mxu0 %v7824_v46  ;;  %4663 = vmatpush1.bf16.msra.mxu1 %v7827_v35  ;;  %v7906_v46 = vld [vmem:[%s10676_s3 + $0x20] ss:$16 sps:$4 sm:$0xff]   ;;  %v7909_v35 = vld [vmem:[%s10676_s3 + $0x28] ss:$16 sps:$4 sm:$0xff]  }
 0x238   :  { %4254 = vmatprep.subr.bf16.mxu0 %v7832_v51  ;;  %4664 = vmatprep.subr.bf16.mxu1 %v7835_v53  ;;  %v7914_v51 = vld [vmem:[%s10676_s3 + $0x44] ss:$16 sps:$4 sm:$0xff]   ;;  %v7917_v53 = vld [vmem:[%s10676_s3 + $0x4c] ss:$16 sps:$4 sm:$0xff]  }
 0x23b   :  { %4255 = vmatpush1.bf16.msra.mxu0 %v7830_v38  ;;  %4665 = vmatpush1.bf16.msra.mxu1 %v7833_v54  ;;  %v7912_v38 = vld [vmem:[%s10676_s3 + $0x40] ss:$16 sps:$4 sm:$0xff]   ;;  %v7915_v54 = vld [vmem:[%s10676_s3 + $0x48] ss:$16 sps:$4 sm:$0xff]  }
 0x23c   :  { %4256 = vmatprep.subr.bf16.mxu0 %v7838_v55  ;;  %4666 = vmatprep.subr.bf16.mxu1 %v7841_v56  ;;  %v7920_v55 = vld [vmem:[%s10676_s3 + $0x64] ss:$16 sps:$4 sm:$0xff]   ;;  %v7923_v56 = vld [vmem:[%s10676_s3 + $0x6c] ss:$16 sps:$4 sm:$0xff]  }
 0x23f   :  { %4257 = vmatpush1.bf16.msra.mxu0 %v7836_v47  ;;  %4667 = vmatpush1.bf16.msra.mxu1 %v7839_v57  ;;  %v7918_v47 = vld [vmem:[%s10676_s3 + $0x60] ss:$16 sps:$4 sm:$0xff]   ;;  %v7921_v57 = vld [vmem:[%s10676_s3 + $0x68] ss:$16 sps:$4 sm:$0xff]  }
 0x240   :  { %4267 = vmatprep.subr.bf16.mxu0 %v7844_v58  ;;  %4677 = vmatprep.subr.bf16.mxu1 %v7847_v48  ;;  %v7926_v58 = vld [vmem:[%s10676_s3 + $0x84] ss:$16 sps:$4 sm:$0xff]   ;;  %v7929_v48 = vld [vmem:[%s10676_s3 + $0x8c] ss:$16 sps:$4 sm:$0xff]  }
 0x242   :  { %4259 = vmatmul.mubr.bf16.vlgmr.msra.gmra.mrb[0].mxu0 %v10025_v60  ;;  %4669 = vmatmul.mubr.bf16.vlgmr.msra.gmra.mrb[0].mxu1 %v10025_v60  ;;  %v7924_v60 = vld [vmem:[%s10676_s3 + $0x80] ss:$16 sps:$4 sm:$0xff]  }
 0x243   :  { %4268 = vmatpush1.bf16.msra.mxu0 %v7842_v61  ;;  %4678 = vmatpush1.bf16.msra.mxu1 %v7845_v62  ;;  %v7927_v61 = vld [vmem:[%s10676_s3 + $0x88] ss:$16 sps:$4 sm:$0xff]   ;;  %v7932_v62 = vld [vmem:[%s10676_s3 + $0xa4] ss:$16 sps:$4 sm:$0xff]  }
 0x244   :  { %4269 = vmatprep.subr.bf16.mxu0 %v7850_v63  ;;  %4679 = vmatprep.subr.bf16.mxu1 %v7853_v49  ;;  %v7935_v63 = vld [vmem:[%s10676_s3 + $0xac] ss:$16 sps:$4 sm:$0xff]   ;;  %v7930_v49 = vld [vmem:[%s10676_s3 + $0xa0] ss:$16 sps:$4 sm:$0xff]  }
 0x245   :  { %6672 = vmatprep.mubr.msk.bf16.mxu0 %vm3881_vm0, %v791_v50  ;;  %6674 = vmatprep.mubr.msk.bf16.mxu1 %vm3881_vm0, %v791_v50  ;;  %v7933_v50 = vld [vmem:[%s10676_s3 + $0xa8] ss:$16 sps:$4 sm:$0xff]  }
 0x247   :  { %4270 = vmatpush1.bf16.msra.mxu0 %v7848_v0  ;;  %4680 = vmatpush1.bf16.msra.mxu1 %v7851_v1  ;;  %v7938_v0 = vld [vmem:[%s10676_s3 + $0xc4] ss:$16 sps:$4 sm:$0xff]   ;;  %v7941_v1 = vld [vmem:[%s10676_s3 + $0xcc] ss:$16 sps:$4 sm:$0xff]  }
 0x248   :  { %4271 = vmatprep.subr.bf16.mxu0 %v7856_v59  ;;  %4681 = vmatprep.subr.bf16.mxu1 %v7859_v2  ;;  %v7936_v59 = vld [vmem:[%s10676_s3 + $0xc0] ss:$16 sps:$4 sm:$0xff]   ;;  %v7939_v2 = vld [vmem:[%s10676_s3 + $0xc8] ss:$16 sps:$4 sm:$0xff]  }
 0x24b   :  { %4272 = vmatpush1.bf16.msra.mxu0 %v7854_v3  ;;  %4682 = vmatpush1.bf16.msra.mxu1 %v7857_v4  ;;  %v7944_v3 = vld [vmem:[%s10676_s3 + $0xe4] ss:$16 sps:$4 sm:$0xff]   ;;  %v7947_v4 = vld [vmem:[%s10676_s3 + $0xec] ss:$16 sps:$4 sm:$0xff]  }
 0x24c   :  { %4273 = vmatprep.subr.bf16.mxu0 %v7862_v5  ;;  %4683 = vmatprep.subr.bf16.mxu1 %v7865_v6  ;;  %v7942_v5 = vld [vmem:[%s10676_s3 + $0xe0] ss:$16 sps:$4 sm:$0xff]   ;;  %v7945_v6 = vld [vmem:[%s10676_s3 + $0xe8] ss:$16 sps:$4 sm:$0xff]  }
 0x24f   :  { %4274 = vmatpush1.bf16.msra.mxu0 %v7860_v7  ;;  %4684 = vmatpush1.bf16.msra.mxu1 %v7863_v8  ;;  %v7950_v7 = vld [vmem:[%s10676_s3 + $0x104] ss:$16 sps:$4 sm:$0xff]   ;;  %v7953_v8 = vld [vmem:[%s10676_s3 + $0x10c] ss:$16 sps:$4 sm:$0xff]  }
 0x250   :  { %4275 = vmatprep.subr.bf16.mxu0 %v7868_v9  ;;  %4685 = vmatprep.subr.bf16.mxu1 %v7871_v10  ;;  %v7948_v9 = vld [vmem:[%s10676_s3 + $0x100] ss:$16 sps:$4 sm:$0xff]   ;;  %v7951_v10 = vld [vmem:[%s10676_s3 + $0x108] ss:$16 sps:$4 sm:$0xff]  }
 0x253   :  { %4276 = vmatpush1.bf16.msra.mxu0 %v7866_v11  ;;  %4686 = vmatpush1.bf16.msra.mxu1 %v7869_v12  ;;  %v7956_v11 = vld [vmem:[%s10676_s3 + $0x124] ss:$16 sps:$4 sm:$0xff]   ;;  %v7959_v12 = vld [vmem:[%s10676_s3 + $0x12c] ss:$16 sps:$4 sm:$0xff]  }
 0x254   :  { %4277 = vmatprep.subr.bf16.mxu0 %v7874_v52  ;;  %4687 = vmatprep.subr.bf16.mxu1 %v7877_v15  ;;  %v7954_v52 = vld [vmem:[%s10676_s3 + $0x120] ss:$16 sps:$4 sm:$0xff]   ;;  %v7957_v15 = vld [vmem:[%s10676_s3 + $0x128] ss:$16 sps:$4 sm:$0xff]  }
 0x257   :  { %4278 = vmatpush1.bf16.msra.mxu0 %v7872_v16  ;;  %4688 = vmatpush1.bf16.msra.mxu1 %v7875_v17  ;;  %v7962_v16 = vld [vmem:[%s10676_s3 + $0x144] ss:$16 sps:$4 sm:$0xff]   ;;  %v7965_v17 = vld [vmem:[%s10676_s3 + $0x14c] ss:$16 sps:$4 sm:$0xff]  }
 0x258   :  { %4279 = vmatprep.subr.bf16.mxu0 %v7880_v18  ;;  %4689 = vmatprep.subr.bf16.mxu1 %v7883_v19  ;;  %v7960_v18 = vld [vmem:[%s10676_s3 + $0x140] ss:$16 sps:$4 sm:$0xff]   ;;  %v7963_v19 = vld [vmem:[%s10676_s3 + $0x148] ss:$16 sps:$4 sm:$0xff]  }
 0x25b   :  { %4280 = vmatpush1.bf16.msra.mxu0 %v7878_v20  ;;  %4690 = vmatpush1.bf16.msra.mxu1 %v7881_v22  ;;  %v7968_v20 = vld [vmem:[%s10676_s3 + $0x164] ss:$16 sps:$4 sm:$0xff]   ;;  %v7971_v22 = vld [vmem:[%s10676_s3 + $0x16c] ss:$16 sps:$4 sm:$0xff]  }
 0x25c   :  { %4281 = vmatprep.subr.bf16.mxu0 %v7886_v23  ;;  %4691 = vmatprep.subr.bf16.mxu1 %v7889_v24  ;;  %v7966_v23 = vld [vmem:[%s10676_s3 + $0x160] ss:$16 sps:$4 sm:$0xff]   ;;  %v7969_v24 = vld [vmem:[%s10676_s3 + $0x168] ss:$16 sps:$4 sm:$0xff]  }
 0x25f   :  { %4282 = vmatpush1.bf16.msra.mxu0 %v7884_v13  ;;  %4692 = vmatpush1.bf16.msra.mxu1 %v7887_v27  ;;  %v7974_v13 = vld [vmem:[%s10676_s3 + $0x184] ss:$16 sps:$4 sm:$0xff]   ;;  %v7977_v27 = vld [vmem:[%s10676_s3 + $0x18c] ss:$16 sps:$4 sm:$0xff]  }
 0x260   :  { %4283 = vmatprep.subr.bf16.mxu0 %v7892_v28  ;;  %4693 = vmatprep.subr.bf16.mxu1 %v7895_v29  ;;  %v7972_v28 = vld [vmem:[%s10676_s3 + $0x180] ss:$16 sps:$4 sm:$0xff]   ;;  %v7975_v29 = vld [vmem:[%s10676_s3 + $0x188] ss:$16 sps:$4 sm:$0xff]  }
 0x263   :  { %4284 = vmatpush1.bf16.msra.mxu0 %v7890_v31  ;;  %4694 = vmatpush1.bf16.msra.mxu1 %v7893_v25  ;;  %v7978_v31 = vld [vmem:[%s10676_s3 + $0x1a0] ss:$16 sps:$4 sm:$0xff]   ;;  %v7981_v25 = vld [vmem:[%s10676_s3 + $0x1a8] ss:$16 sps:$4 sm:$0xff]  }
 0x264   :  { %6671 = vmatprep.subr.msk.bf16.mxu0 %vm3885_vm1, %v6668_v32  ;;  %6673 = vmatprep.subr.msk.bf16.mxu1 %vm3885_vm1, %v6670_v33  ;;  %v7986_v32 = vld [vmem:[%s10676_s3 + $0x1c4] ss:$16 sps:$4 sm:$0xff]   ;;  %v7989_v33 = vld [vmem:[%s10676_s3 + $0x1cc] ss:$16 sps:$4 sm:$0xff]  }
 0x267   :  { %4286 = vmatpush1.bf16.msra.mxu0 %v3887_v37  ;;  %4696 = vmatpush1.bf16.msra.mxu1 %v3893_v21  ;;  %v7992_v37 = vld [vmem:[%s10676_s3 + $0x1e4] ss:$16 sps:$4 sm:$0xff]   ;;  %v7995_v21 = vld [vmem:[%s10676_s3 + $0x1ec] ss:$16 sps:$4 sm:$0xff]  }
 0x268   :  { %5521 = vmatprep.subr.bf16.mxu0 %v7902_v39  ;;  %5603 = vmatprep.subr.bf16.mxu1 %v7905_v40  ;;  %v7990_v39 = vld [vmem:[%s10676_s3 + $0x1e0] ss:$16 sps:$4 sm:$0xff]   ;;  %v7993_v40 = vld [vmem:[%s10676_s3 + $0x1e8] ss:$16 sps:$4 sm:$0xff]  }
 0x26a   :  { %4300 = vmatmul.mubr.bf16.vlgmr.msra.gmra.mrb[0].mxu0 %v790_v41  ;;  %4710 = vmatmul.mubr.bf16.vlgmr.msra.gmra.mrb[0].mxu1 %v790_v41  ;;  %v7998_v41 = vld [vmem:[%s10676_s3 + $0x204] ss:$16 sps:$4 sm:$0xff]  }
 0x26b   :  { %5522 = vmatpush1.bf16.msra.mxu0 %v7900_v34  ;;  %5604 = vmatpush1.bf16.msra.mxu1 %v7903_v43  ;;  %v8001_v34 = vld [vmem:[%s10676_s3 + $0x20c] ss:$16 sps:$4 sm:$0xff]   ;;  %v649_v43 = vsub.s32 0, %v8307_v42 }
 0x26c   :  { %5523 = vmatprep.subr.bf16.mxu0 %v7908_v44  ;;  %5605 = vmatprep.subr.bf16.mxu1 %v7911_v45  ;;  %v10343_v44 = vld [vmem:[%s10675_s2] sm:$0xf]  ;;  %v653_v45 = vsub.s32 1, %v8307_v42 }
 0x26f   :  { %5524 = vmatpush1.bf16.msra.mxu0 %v7906_v46  ;;  %5606 = vmatpush1.bf16.msra.mxu1 %v7909_v35  ;;  %v661_v46 = vsub.s32 3, %v8307_v42  ;;  %v650_v35 = vrot.slane %v10343_v44, %v649_v43 }
 0x270   :  { %5525 = vmatprep.subr.bf16.mxu0 %v7914_v51  ;;  %5607 = vmatprep.subr.bf16.mxu1 %v7917_v53  ;;  %v654_v51 = vrot.slane %v10343_v44, %v653_v45 }
 0x271   :  { %v662_v53 = vrot.slane %v10343_v44, %v661_v46 }
 0x273   :  { %5526 = vmatpush1.bf16.msra.mxu0 %v7912_v38  ;;  %5608 = vmatpush1.bf16.msra.mxu1 %v7915_v54 }
 0x274   :  { %5527 = vmatprep.subr.bf16.mxu0 %v7920_v55  ;;  %5609 = vmatprep.subr.bf16.mxu1 %v7923_v56 }
 0x277   :  { %5528 = vmatpush1.bf16.msra.mxu0 %v7918_v47  ;;  %5610 = vmatpush1.bf16.msra.mxu1 %v7921_v57 }
 0x278   :  { %5529 = vmatprep.subr.bf16.mxu0 %v7926_v58  ;;  %5611 = vmatprep.subr.bf16.mxu1 %v7929_v48 }
 0x27b   :  { %5530 = vmatpush1.bf16.msra.mxu0 %v7924_v60  ;;  %5612 = vmatpush1.bf16.msra.mxu1 %v7927_v61 }
 0x27c   :  { %5531 = vmatprep.subr.bf16.mxu0 %v7932_v62  ;;  %5613 = vmatprep.subr.bf16.mxu1 %v7935_v63 }
 0x27f   :  { %5532 = vmatpush1.bf16.msra.mxu0 %v7930_v49  ;;  %5614 = vmatpush1.bf16.msra.mxu1 %v7933_v50 }
 0x280   :  { %5533 = vmatprep.subr.bf16.mxu0 %v7938_v0  ;;  %5615 = vmatprep.subr.bf16.mxu1 %v7941_v1  ;;  %v7996_v1 = vld [vmem:[%s10676_s3 + $0x200] ss:$16 sps:$4 sm:$0xff]  }
 0x283   :  { %5534 = vmatpush1.bf16.msra.mxu0 %v7936_v59  ;;  %5616 = vmatpush1.bf16.msra.mxu1 %v7939_v2  ;;  %v7999_v59 = vld [vmem:[%s10676_s3 + $0x208] ss:$16 sps:$4 sm:$0xff]  }
 0x284   :  { %5535 = vmatprep.subr.bf16.mxu0 %v7944_v3  ;;  %5617 = vmatprep.subr.bf16.mxu1 %v7947_v4  ;;  %v8004_v3 = vld [vmem:[%s10676_s3 + $0x224] ss:$16 sps:$4 sm:$0xff]   ;;  %v8007_v4 = vld [vmem:[%s10676_s3 + $0x22c] ss:$16 sps:$4 sm:$0xff]  }
 0x287   :  { %5536 = vmatpush1.bf16.msra.mxu0 %v7942_v5  ;;  %5618 = vmatpush1.bf16.msra.mxu1 %v7945_v6  ;;  %v8002_v6 = vld [vmem:[%s10676_s3 + $0x220] ss:$16 sps:$4 sm:$0xff]  }
 0x288   :  { %5537 = vmatprep.subr.bf16.mxu0 %v7950_v7  ;;  %5619 = vmatprep.subr.bf16.mxu1 %v7953_v8  ;;  %v8005_v7 = vld [vmem:[%s10676_s3 + $0x228] ss:$16 sps:$4 sm:$0xff]   ;;  %v8010_v8 = vld [vmem:[%s10676_s3 + $0x244] ss:$16 sps:$4 sm:$0xff]  }
 0x28b   :  { %5538 = vmatpush1.bf16.msra.mxu0 %v7948_v9  ;;  %5620 = vmatpush1.bf16.msra.mxu1 %v7951_v10  ;;  %v8013_v9 = vld [vmem:[%s10676_s3 + $0x24c] ss:$16 sps:$4 sm:$0xff]   ;;  %v8008_v10 = vld [vmem:[%s10676_s3 + $0x240] ss:$16 sps:$4 sm:$0xff]  }
 0x28c   :  { %5539 = vmatprep.subr.bf16.mxu0 %v7956_v11  ;;  %5621 = vmatprep.subr.bf16.mxu1 %v7959_v12  ;;  %v8011_v11 = vld [vmem:[%s10676_s3 + $0x248] ss:$16 sps:$4 sm:$0xff]   ;;  %v8016_v12 = vld [vmem:[%s10676_s3 + $0x264] ss:$16 sps:$4 sm:$0xff]  }
 0x28f   :  { %5540 = vmatpush1.bf16.msra.mxu0 %v7954_v52  ;;  %5622 = vmatpush1.bf16.msra.mxu1 %v7957_v15  ;;  %v8019_v52 = vld [vmem:[%s10676_s3 + $0x26c] ss:$16 sps:$4 sm:$0xff]   ;;  %v8014_v15 = vld [vmem:[%s10676_s3 + $0x260] ss:$16 sps:$4 sm:$0xff]  }
 0x290   :  { %5541 = vmatprep.subr.bf16.mxu0 %v7962_v16  ;;  %5623 = vmatprep.subr.bf16.mxu1 %v7965_v17  ;;  %v8017_v16 = vld [vmem:[%s10676_s3 + $0x268] ss:$16 sps:$4 sm:$0xff]   ;;  %v8022_v17 = vld [vmem:[%s10676_s3 + $0x284] ss:$16 sps:$4 sm:$0xff]  }
 0x293   :  { %5542 = vmatpush1.bf16.msra.mxu0 %v7960_v18  ;;  %5624 = vmatpush1.bf16.msra.mxu1 %v7963_v19  ;;  %v8025_v18 = vld [vmem:[%s10676_s3 + $0x28c] ss:$16 sps:$4 sm:$0xff]   ;;  %v8020_v19 = vld [vmem:[%s10676_s3 + $0x280] ss:$16 sps:$4 sm:$0xff]  }
 0x294   :  { %5543 = vmatprep.subr.bf16.mxu0 %v7968_v20  ;;  %5625 = vmatprep.subr.bf16.mxu1 %v7971_v22  ;;  %v8023_v20 = vld [vmem:[%s10676_s3 + $0x288] ss:$16 sps:$4 sm:$0xff]   ;;  %v8028_v22 = vld [vmem:[%s10676_s3 + $0x2a4] ss:$16 sps:$4 sm:$0xff]  }
 0x297   :  { %5544 = vmatpush1.bf16.msra.mxu0 %v7966_v23  ;;  %5626 = vmatpush1.bf16.msra.mxu1 %v7969_v24  ;;  %v8031_v23 = vld [vmem:[%s10676_s3 + $0x2ac] ss:$16 sps:$4 sm:$0xff]   ;;  %v8026_v24 = vld [vmem:[%s10676_s3 + $0x2a0] ss:$16 sps:$4 sm:$0xff]  }
 0x298   :  { %5545 = vmatprep.subr.bf16.mxu0 %v7974_v13  ;;  %5627 = vmatprep.subr.bf16.mxu1 %v7977_v27  ;;  %v8029_v13 = vld [vmem:[%s10676_s3 + $0x2a8] ss:$16 sps:$4 sm:$0xff]   ;;  %v8034_v27 = vld [vmem:[%s10676_s3 + $0x2c4] ss:$16 sps:$4 sm:$0xff]  }
 0x29b   :  { %5546 = vmatpush1.bf16.msra.mxu0 %v7972_v28  ;;  %5628 = vmatpush1.bf16.msra.mxu1 %v7975_v29  ;;  %v8037_v28 = vld [vmem:[%s10676_s3 + $0x2cc] ss:$16 sps:$4 sm:$0xff]   ;;  %v8032_v29 = vld [vmem:[%s10676_s3 + $0x2c0] ss:$16 sps:$4 sm:$0xff]  }
 0x29c   :  { %5547 = vmatprep.subr.bf16.mxu0 %v7980_v14  ;;  %5629 = vmatprep.subr.bf16.mxu1 %v7983_v30  ;;  %v8035_v14 = vld [vmem:[%s10676_s3 + $0x2c8] ss:$16 sps:$4 sm:$0xff]   ;;  %v8040_v30 = vld [vmem:[%s10676_s3 + $0x2e4] ss:$16 sps:$4 sm:$0xff]  }
 0x29f   :  { %5548 = vmatpush1.bf16.msra.mxu0 %v7978_v31  ;;  %5630 = vmatpush1.bf16.msra.mxu1 %v7981_v25  ;;  %v8043_v31 = vld [vmem:[%s10676_s3 + $0x2ec] ss:$16 sps:$4 sm:$0xff]   ;;  %v8038_v25 = vld [vmem:[%s10676_s3 + $0x2e0] ss:$16 sps:$4 sm:$0xff]  }
 0x2a0   :  { %5549 = vmatprep.subr.bf16.mxu0 %v7986_v32  ;;  %5631 = vmatprep.subr.bf16.mxu1 %v7989_v33  ;;  %v8041_v32 = vld [vmem:[%s10676_s3 + $0x2e8] ss:$16 sps:$4 sm:$0xff]   ;;  %v8046_v33 = vld [vmem:[%s10676_s3 + $0x304] ss:$16 sps:$4 sm:$0xff]  }
 0x2a3   :  { %5550 = vmatpush1.bf16.msra.mxu0 %v7984_v26  ;;  %5632 = vmatpush1.bf16.msra.mxu1 %v7987_v36  ;;  %v8049_v26 = vld [vmem:[%s10676_s3 + $0x30c] ss:$16 sps:$4 sm:$0xff]   ;;  %v8044_v36 = vld [vmem:[%s10676_s3 + $0x300] ss:$16 sps:$4 sm:$0xff]  }
 0x2a4   :  { %5551 = vmatprep.subr.bf16.mxu0 %v7992_v37  ;;  %5633 = vmatprep.subr.bf16.mxu1 %v7995_v21  ;;  %v8047_v37 = vld [vmem:[%s10676_s3 + $0x308] ss:$16 sps:$4 sm:$0xff]   ;;  %v8052_v21 = vld [vmem:[%s10676_s3 + $0x324] ss:$16 sps:$4 sm:$0xff]  }
 0x2a7   :  { %5552 = vmatpush1.bf16.msra.mxu0 %v7990_v39  ;;  %5634 = vmatpush1.bf16.msra.mxu1 %v7993_v40  ;;  %v8055_v39 = vld [vmem:[%s10676_s3 + $0x32c] ss:$16 sps:$4 sm:$0xff]   ;;  %v8050_v40 = vld [vmem:[%s10676_s3 + $0x320] ss:$16 sps:$4 sm:$0xff]  }
 0x2a8   :  { %5562 = vmatprep.subr.bf16.mxu0 %v7998_v41  ;;  %5644 = vmatprep.subr.bf16.mxu1 %v8001_v34  ;;  %v8053_v41 = vld [vmem:[%s10676_s3 + $0x328] ss:$16 sps:$4 sm:$0xff]   ;;  %v8058_v34 = vld [vmem:[%s10676_s3 + $0x344] ss:$16 sps:$4 sm:$0xff]  }
 0x33d   :  { %v4301_v38 = vpop.f32.mrb[0].mxu0  ;;  %v10356_v54 = vpop.f32.mrb[0].mxu1 }
 0x33e   :  { %v6885_v55 = vadd.f32 %v4301_v38, %v650_v35  ;;  %v4303_v56 = vpop.f32.mrb[1].mxu0  ;;  %v4713_v47 = vpop.f32.mrb[1].mxu1  ;;  %v8061_v35 = vld [vmem:[%s10676_s3 + $0x34c] ss:$16 sps:$4 sm:$0xff]   ;;  %v8064_v38 = vld [vmem:[%s10676_s3 + $0x364] ss:$16 sps:$4 sm:$0xff]  }
 0x33f   :  { %v6886_v57 = vadd.f32 %v4303_v56, %v654_v51  ;;  %v6888_v58 = vadd.f32 %v4713_v47, %v662_v53  ;;  %v4305_v48 = vpop.f32.mrb[2].mxu0  ;;  %v4715_v60 = vpop.f32.mrb[2].mxu1  ;;  %v8056_v51 = vld [vmem:[%s10676_s3 + $0x340] ss:$16 sps:$4 sm:$0xff]   ;;  %v8059_v53 = vld [vmem:[%s10676_s3 + $0x348] ss:$16 sps:$4 sm:$0xff]  }
 0x340   :  { %v4718_v61 = vmax.f32 %v6885_v55, 0.0  ;;  %v4306_v62 = vpop.f32.mrb[3].mxu0  ;;  %v4716_v63 = vpop.f32.mrb[3].mxu1  ;;  %v8067_v55 = vld [vmem:[%s10676_s3 + $0x36c] ss:$16 sps:$4 sm:$0xff]  }
 0x341   :  { %v4719_v49 = vmax.f32 %v6886_v57, 0.0  ;;  %v4721_v50 = vmax.f32 %v6888_v58, 0.0  ;;  %v8062_v56 = vld [vmem:[%s10676_s3 + $0x360] ss:$16 sps:$4 sm:$0xff]   ;;  %v8065_v47 = vld [vmem:[%s10676_s3 + $0x368] ss:$16 sps:$4 sm:$0xff]  }
 0x342   :  { %v4722_v2 = vpack.c.bf16 %v4718_v61, %v4718_v61  ;;  %v8070_v57 = vld [vmem:[%s10676_s3 + $0x384] ss:$16 sps:$4 sm:$0xff]   ;;  %v8073_v58 = vld [vmem:[%s10676_s3 + $0x38c] ss:$16 sps:$4 sm:$0xff]   ;;  %v8068_v48 = vld [vmem:[%s10676_s3 + $0x380] ss:$16 sps:$4 sm:$0xff]  }
 0x343   :  { %v4723_v0 = vpack.c.bf16 %v4719_v49, %v4719_v49  ;;  %v4725_v5 = vpack.c.bf16 %v4721_v50, %v4721_v50  ;;  %v8071_v60 = vld [vmem:[%s10676_s3 + $0x388] ss:$16 sps:$4 sm:$0xff]   ;;  %v657_v61 = vsub.s32 2, %v8307_v42  ;;  %v8076_v62 = vld [vmem:[%s10676_s3 + $0x3a4] ss:$16 sps:$4 sm:$0xff]  }
 0x344   :  { %v8079_v63 = vld [vmem:[%s10676_s3 + $0x3ac] ss:$16 sps:$4 sm:$0xff]   ;;  %v8074_v49 = vld [vmem:[%s10676_s3 + $0x3a0] ss:$16 sps:$4 sm:$0xff]   ;;  %v8077_v50 = vld [vmem:[%s10676_s3 + $0x3a8] ss:$16 sps:$4 sm:$0xff]  }
 0x345   :  { %5553 = vmatprep.mubr.bf16.mxu0 %v4723_v0  ;;  %5635 = vmatprep.mubr.bf16.mxu1 %v4723_v0  ;;  %v8082_v0 = vld [vmem:[%s10676_s3 + $0x3c4] ss:$16 sps:$4 sm:$0xff]  }
 0x346   :  { %5554 = vmatmul.mubr.bf16.vlgmr.msra.gmra.mrb[4].mxu0 %v4722_v2  ;;  %5636 = vmatmul.mubr.bf16.vlgmr.msra.gmra.mrb[4].mxu1 %v4722_v2  ;;  %v4850_v2 = vld [vmem:[%s10676_s3 + $0x3e0] sm:$0x33] }
 0x347   :  { %5563 = vmatpush1.bf16.msra.mxu0 %v7996_v1  ;;  %5645 = vmatpush1.bf16.msra.mxu1 %v7999_v59  ;;  %v658_v1 = vrot.slane %v10343_v44, %v657_v61  ;;  %v8085_v59 = vld [vmem:[%s10676_s3 + $0x3cc] ss:$16 sps:$4 sm:$0xff]   ;;  %v8080_v44 = vld [vmem:[%s10676_s3 + $0x3c0] ss:$16 sps:$4 sm:$0xff]  }
 0x348   :  { %6804 = vmatprep.mubr.msk.bf16.mxu0 %vm5504_vm2, %v4725_v5  ;;  %6806 = vmatprep.mubr.msk.bf16.mxu1 %vm5504_vm2, %v4725_v5  ;;  %v6800_v5 = vcombine.high %v4850_v2, %v4850_v2 }
 0x349   :  { %5564 = vmatprep.subr.bf16.mxu0 %v8004_v3  ;;  %5646 = vmatprep.subr.bf16.mxu1 %v8007_v4  ;;  %v4851_v3 = vld [vmem:[%s10676_s3 + $0x3e8] sm:$0x33] }
 0x34a   :  { %v8083_v4 = vld [vmem:[%s10676_s3 + $0x3c8] ss:$16 sps:$4 sm:$0xff]  }
 0x34b   :  { %5565 = vmatpush1.bf16.msra.mxu0 %v8002_v6  ;;  %5647 = vmatpush1.bf16.msra.mxu1 %v8005_v7  ;;  %v6802_v6 = vcombine.high %v4851_v3, %v4851_v3  ;;  %v6887_v7 = vadd.f32 %v10356_v54, %v658_v1  ;;  %v8090_v54 = vld [vmem:[%s10678_s5 + $0x40] sm:$0xff]  }
 0x34c   :  { %5566 = vmatprep.subr.bf16.mxu0 %v8010_v8  ;;  %5648 = vmatprep.subr.bf16.mxu1 %v8013_v9  ;;  %v6799_v8 = vcombine.low %v4850_v2, %v4850_v2  ;;  %v6801_v9 = vcombine.low %v4851_v3, %v4851_v3 }
 0x34f   :  { %5567 = vmatpush1.bf16.msra.mxu0 %v8008_v10  ;;  %5649 = vmatpush1.bf16.msra.mxu1 %v8011_v11  ;;  %v4720_v10 = vmax.f32 %v6887_v7, 0.0  ;;  %v5510_v11 = vsel %vm5508_vm3, %v6799_v8, 0 }
 0x350   :  { %5568 = vmatprep.subr.bf16.mxu0 %v8016_v12  ;;  %5650 = vmatprep.subr.bf16.mxu1 %v8019_v52  ;;  %v5516_v12 = vsel %vm5508_vm3, %v6801_v9, 0  ;;  %v8091_v52 = vld [vmem:[%s10678_s5 + $0xc0] sm:$0xff]  }
 0x351   :  { %v6807_v9 = vld [vmem:[%s10679_s6] ss:$0 sm:$0xff] }
 0x353   :  { %5569 = vmatpush1.bf16.msra.mxu0 %v8014_v15  ;;  %5651 = vmatpush1.bf16.msra.mxu1 %v8017_v16  ;;  %v8092_v15 = vld [vmem:[%s10678_s5] sm:$0xff]  }
 0x354   :  { %5570 = vmatprep.subr.bf16.mxu0 %v8022_v17  ;;  %5652 = vmatprep.subr.bf16.mxu1 %v8025_v18  ;;  %v8093_v16 = vld [vmem:[%s10678_s5 + $0x80] sm:$0xff]   ;;  %v4724_v17 = vpack.c.bf16 %v4720_v10, %v4720_v10  ;;  %v8094_v18 = vld [vmem:[%s10678_s5 + $0x48] sm:$0xff]  }
 0x357   :  { %5571 = vmatpush1.bf16.msra.mxu0 %v8020_v19  ;;  %5653 = vmatpush1.bf16.msra.mxu1 %v8023_v20  ;;  %v8095_v19 = vld [vmem:[%s10678_s5 + $0xc8] sm:$0xff]  }
 0x358   :  { %5572 = vmatprep.subr.bf16.mxu0 %v8028_v22  ;;  %5654 = vmatprep.subr.bf16.mxu1 %v8031_v23  ;;  %v8096_v20 = vld [vmem:[%s10678_s5 + $0x8] sm:$0xff]   ;;  %v8098_v23 = vld [vmem:[%s10678_s5 + $0x50] sm:$0xff]  }
 0x359   :  { %v8097_v22 = vld [vmem:[%s10678_s5 + $0x88] sm:$0xff]  }
 0x35b   :  { %5573 = vmatpush1.bf16.msra.mxu0 %v8026_v24  ;;  %5655 = vmatpush1.bf16.msra.mxu1 %v8029_v13  ;;  %v8099_v24 = vld [vmem:[%s10678_s5 + $0xd0] sm:$0xff]  }
 0x35c   :  { %5574 = vmatprep.subr.bf16.mxu0 %v8034_v27  ;;  %5656 = vmatprep.subr.bf16.mxu1 %v8037_v28  ;;  %v8100_v13 = vld [vmem:[%s10678_s5 + $0x10] sm:$0xff]   ;;  %v8102_v28 = vld [vmem:[%s10678_s5 + $0x58] sm:$0xff]  }
 0x35d   :  { %v8101_v27 = vld [vmem:[%s10678_s5 + $0x90] sm:$0xff]  }
 0x35f   :  { %5575 = vmatpush1.bf16.msra.mxu0 %v8032_v29  ;;  %5657 = vmatpush1.bf16.msra.mxu1 %v8035_v14  ;;  %v8103_v29 = vld [vmem:[%s10678_s5 + $0xd8] sm:$0xff]  }
 0x360   :  { %5576 = vmatprep.subr.bf16.mxu0 %v8040_v30  ;;  %5658 = vmatprep.subr.bf16.mxu1 %v8043_v31  ;;  %v8104_v14 = vld [vmem:[%s10678_s5 + $0x18] sm:$0xff]   ;;  %v8106_v31 = vld [vmem:[%s10678_s5 + $0x60] sm:$0xff]  }
 0x361   :  { %v8105_v30 = vld [vmem:[%s10678_s5 + $0x98] sm:$0xff]  }
 0x363   :  { %5577 = vmatpush1.bf16.msra.mxu0 %v8038_v25  ;;  %5659 = vmatpush1.bf16.msra.mxu1 %v8041_v32  ;;  %v8107_v25 = vld [vmem:[%s10678_s5 + $0xe0] sm:$0xff]  }
 0x364   :  { %5578 = vmatprep.subr.bf16.mxu0 %v8046_v33  ;;  %5660 = vmatprep.subr.bf16.mxu1 %v8049_v26  ;;  %v8108_v32 = vld [vmem:[%s10678_s5 + $0x20] sm:$0xff]   ;;  %v8110_v26 = vld [vmem:[%s10678_s5 + $0x68] sm:$0xff]  }
 0x365   :  { %v8109_v33 = vld [vmem:[%s10678_s5 + $0xa0] sm:$0xff]  }
 0x367   :  { %5579 = vmatpush1.bf16.msra.mxu0 %v8044_v36  ;;  %5661 = vmatpush1.bf16.msra.mxu1 %v8047_v37  ;;  %v8111_v36 = vld [vmem:[%s10678_s5 + $0xe8] sm:$0xff]  }
 0x368   :  { %5580 = vmatprep.subr.bf16.mxu0 %v8052_v21  ;;  %5662 = vmatprep.subr.bf16.mxu1 %v8055_v39  ;;  %v8112_v37 = vld [vmem:[%s10678_s5 + $0x28] sm:$0xff]   ;;  %v8114_v39 = vld [vmem:[%s10678_s5 + $0x70] sm:$0xff]  }
 0x369   :  { %v8113_v21 = vld [vmem:[%s10678_s5 + $0xa8] sm:$0xff]  }
 0x36b   :  { %5581 = vmatpush1.bf16.msra.mxu0 %v8050_v40  ;;  %5663 = vmatpush1.bf16.msra.mxu1 %v8053_v41  ;;  %v8115_v40 = vld [vmem:[%s10678_s5 + $0xf0] sm:$0xff]  }
 0x36c   :  { %5582 = vmatprep.subr.bf16.mxu0 %v8058_v34  ;;  %5664 = vmatprep.subr.bf16.mxu1 %v8061_v35  ;;  %v8116_v41 = vld [vmem:[%s10678_s5 + $0x30] sm:$0xff]   ;;  %v8118_v35 = vld [vmem:[%s10678_s5 + $0x78] sm:$0xff]  }
 0x36d   :  { %v8117_v34 = vld [vmem:[%s10678_s5 + $0xb0] sm:$0xff]  }
 0x36f   :  { %5583 = vmatpush1.bf16.msra.mxu0 %v8056_v51  ;;  %5665 = vmatpush1.bf16.msra.mxu1 %v8059_v53  ;;  %v8119_v51 = vld [vmem:[%s10678_s5 + $0xf8] ss:$0 sps:$4 sm:$0x33]  }
 0x370   :  { %5584 = vmatprep.subr.bf16.mxu0 %v8064_v38  ;;  %5666 = vmatprep.subr.bf16.mxu1 %v8067_v55  ;;  %v8120_v53 = vld [vmem:[%s10678_s5 + $0x38] sm:$0xff]   ;;  %v4852_v55 = vld [vmem:[%s10677_s4] sm:$0xf] }
 0x371   :  { %v8121_v38 = vld [vmem:[%s10678_s5 + $0xb8] sm:$0xff]  }
 0x373   :  { %5585 = vmatpush1.bf16.msra.mxu0 %v8062_v56  ;;  %5667 = vmatpush1.bf16.msra.mxu1 %v8065_v47  ;;  %v4857_v56 = vrot.slane %v4852_v55, %v649_v43  ;;  %v4865_v47 = vrot.slane %v4852_v55, %v657_v61 }
 0x374   :  { %5586 = vmatprep.subr.bf16.mxu0 %v8070_v57  ;;  %5668 = vmatprep.subr.bf16.mxu1 %v8073_v58  ;;  %v4861_v57 = vrot.slane %v4852_v55, %v653_v45  ;;  %v4869_v58 = vrot.slane %v4852_v55, %v661_v46 }
 0x377   :  { %5587 = vmatpush1.bf16.msra.mxu0 %v8068_v48  ;;  %5669 = vmatpush1.bf16.msra.mxu1 %v8071_v60 }
 0x378   :  { %5588 = vmatprep.subr.bf16.mxu0 %v8076_v62  ;;  %5670 = vmatprep.subr.bf16.mxu1 %v8079_v63 }
 0x37b   :  { %5589 = vmatpush1.bf16.msra.mxu0 %v8074_v49  ;;  %5671 = vmatpush1.bf16.msra.mxu1 %v8077_v50 }
 0x37c   :  { %5590 = vmatprep.subr.bf16.mxu0 %v8082_v0  ;;  %5672 = vmatprep.subr.bf16.mxu1 %v8085_v59 }
 0x37f   :  { %5591 = vmatpush1.bf16.msra.mxu0 %v8080_v44  ;;  %5673 = vmatpush1.bf16.msra.mxu1 %v8083_v4 }
 0x380   :  { %6803 = vmatprep.subr.msk.bf16.mxu0 %vm5508_vm3, %v6800_v5  ;;  %6805 = vmatprep.subr.msk.bf16.mxu1 %vm5508_vm3, %v6802_v6 }
 0x383   :  { %5593 = vmatpush1.bf16.msra.mxu0 %v5510_v11  ;;  %5675 = vmatpush1.bf16.msra.mxu1 %v5516_v12 }
 0x384   :  { %6841 = vmatprep.subr.bf16.mxu0 %v8090_v54  ;;  %6863 = vmatprep.subr.bf16.mxu1 %v8091_v52 }
 0x386   :  { %5595 = vmatmul.mubr.bf16.vlgmr.msra.gmra.mrb[4].mxu0 %v4724_v17  ;;  %5677 = vmatmul.mubr.bf16.vlgmr.msra.gmra.mrb[4].mxu1 %v4724_v17 }
 0x387   :  { %6842 = vmatpush3.bf16.msra.mxu0 %v8092_v15  ;;  %6864 = vmatpush3.bf16.msra.mxu1 %v8093_v16 }
 0x388   :  { %6843 = vmatprep.subr.bf16.mxu0 %v8094_v18  ;;  %6865 = vmatprep.subr.bf16.mxu1 %v8095_v19 }
 0x38b   :  { %6844 = vmatpush3.bf16.msra.mxu0 %v8096_v20  ;;  %6866 = vmatpush3.bf16.msra.mxu1 %v8097_v22 }
 0x38c   :  { %6845 = vmatprep.subr.bf16.mxu0 %v8098_v23  ;;  %6867 = vmatprep.subr.bf16.mxu1 %v8099_v24 }
 0x38f   :  { %6846 = vmatpush3.bf16.msra.mxu0 %v8100_v13  ;;  %6868 = vmatpush3.bf16.msra.mxu1 %v8101_v27 }
 0x390   :  { %6847 = vmatprep.subr.bf16.mxu0 %v8102_v28  ;;  %6869 = vmatprep.subr.bf16.mxu1 %v8103_v29 }
 0x393   :  { %6848 = vmatpush3.bf16.msra.mxu0 %v8104_v14  ;;  %6870 = vmatpush3.bf16.msra.mxu1 %v8105_v30 }
 0x394   :  { %6849 = vmatprep.subr.bf16.mxu0 %v8106_v31  ;;  %6871 = vmatprep.subr.bf16.mxu1 %v8107_v25 }
 0x397   :  { %6850 = vmatpush3.bf16.msra.mxu0 %v8108_v32  ;;  %6872 = vmatpush3.bf16.msra.mxu1 %v8109_v33 }
 0x398   :  { %6851 = vmatprep.subr.bf16.mxu0 %v8110_v26  ;;  %6873 = vmatprep.subr.bf16.mxu1 %v8111_v36 }
 0x39b   :  { %6852 = vmatpush3.bf16.msra.mxu0 %v8112_v37  ;;  %6874 = vmatpush3.bf16.msra.mxu1 %v8113_v21 }
 0x39c   :  { %6853 = vmatprep.subr.bf16.mxu0 %v8114_v39  ;;  %6875 = vmatprep.subr.bf16.mxu1 %v8115_v40 }
 0x39f   :  { %6854 = vmatpush3.bf16.msra.mxu0 %v8116_v41  ;;  %6876 = vmatpush3.bf16.msra.mxu1 %v8117_v34 }
 0x3a0   :  { %6855 = vmatprep.subr.bf16.mxu0 %v8118_v35  ;;  %6973 = vmatprep.subr.msk.bf16.mxu1 %vm5508_vm3, %v8119_v51 }
 0x3a3   :  { %6856 = vmatpush3.bf16.msra.mxu0 %v8120_v53  ;;  %6878 = vmatpush3.bf16.msra.mxu1 %v8121_v38 }
 0x459   :  { %v5596_v48 = vpop.f32.mrb[4].mxu0  ;;  %v5678_v60 = vpop.f32.mrb[4].mxu1 }
 0x45a   :  { %v6889_v62 = vadd.f32 %v5596_v48, %v4857_v56  ;;  %v6891_v63 = vadd.f32 %v5678_v60, %v4865_v47  ;;  %v5598_v49 = vpop.f32.mrb[5].mxu0  ;;  %v5680_v50 = vpop.f32.mrb[5].mxu1 }
 0x45b   :  { %v6890_v0 = vadd.f32 %v5598_v49, %v4861_v57  ;;  %v6892_v1 = vadd.f32 %v5680_v50, %v4869_v58  ;;  %v5600_v59 = vpop.f32.mrb[6].mxu0  ;;  %v5682_v2 = vpop.f32.mrb[6].mxu1 }
 0x45c   :  { %v5685_v43 = vmax.f32 %v6889_v62, 0.0  ;;  %v5687_v3 = vmax.f32 %v6891_v63, 0.0  ;;  %v5601_v44 = vpop.f32.mrb[7].mxu0  ;;  %v5683_v61 = vpop.f32.mrb[7].mxu1 }
 0x45d   :  { %v5686_v4 = vmax.f32 %v6890_v0, 0.0  ;;  %v5688_v5 = vmax.f32 %v6892_v1, 0.0 }
 0x45e   :  { %v5689_v42 = vpack.c.bf16 %v5685_v43, %v5685_v43  ;;  %v5691_v46 = vpack.c.bf16 %v5687_v3, %v5687_v3 }
 0x45f   :  { %v5690_v45 = vpack.c.bf16 %v5686_v4, %v5686_v4  ;;  %v5692_v6 = vpack.c.bf16 %v5688_v5, %v5688_v5 }
 0x461   :  { %5990 = vmatprep.mubr.bf16.mxu0 %v5690_v45  ;;  %6840 = vmatprep.mubr.msk.bf16.mxu1 %vm5504_vm2, %v5692_v6 }
 0x462   :  { %5991 = vmatmul.mubr.bf16.vlgmr.msra.gmra.mrb[8].mxu0 %v5689_v42  ;;  %6031 = vmatmul.mubr.bf16.vlgmr.msra.gmra.mrb[8].mxu1 %v5691_v46 }
 0x535   :  { %v6857_v7 = vpop.f32.mrb[8].mxu0  ;;  %v6879_v8 = vpop.f32.mrb[8].mxu1 }
 0x536   :  { %v6858_v10 = vpop.f32.mrb[9].mxu0  ;;  %v6880_v11 = vpop.f32.mrb[9].mxu1 }
 0x537   :  { %v6859_v12 = vadd.f32 %v6858_v10, %v6857_v7  ;;  %v6881_v54 = vadd.f32 %v6880_v11, %v6879_v8  ;;  %v6860_v52 = vpop.f32.mrb[10].mxu0  ;;  %v6882_v15 = vpop.f32.mrb[10].mxu1 }
 0x538   :  { %v6861_v16 = vpop.f32.mrb[11].mxu0  ;;  %v6883_v17 = vpop.f32.mrb[11].mxu1 }
 0x539   :  { %v5993_v18 = vadd.f32 %v6859_v12, %v6807_v9 }
 0x53b   :  { %v6033_v19 = vadd.f32 %v6881_v54, %v5993_v18 }
 0x53d   :  { %6039 = vst.msk [vmem:[#allocation2] sm:$0x3] %vm6038_vm4, %v6033_v19 }
 0x53e   :  { %8135 = shalt.err (!%p8132_p4)
}
 0x53f   :  { %s8136_s21 = scalar_lea.hbm %s10680_s7, 32 }
 0x540   :  { %p8137_p5 = scmp.ne.s32.totalorder %s10680_s7, %s8136_s21  ;;  %p8140_p6 = scmp.lt.u32.totalorder %s8136_s21, %s10680_s7 }
 0x542   :  { %p8142_p7 = pnand %p8140_p6, %p8137_p5 }
 0x544   :  { %8145 = shalt.err (!%p8142_p7)
}
 0x545   :  { %6049 = dma.vmem_to_hbm [thread:$0]  %s6047_s18, 32, %s10680_s7, [#allocation3]  }
 0x546   :  { %8146 = dma.done.wait [#allocation3], 32  }
 0x547   :  { %8147 = vsyncadd [#allocation3], 4294967264 }
 0x548   :  { %6053 = vsyncpa [#allocation3], 1 }

</bundles_post_ra>
